<compile_context>
chip_gen: v5e
topology: v5e:2x2
jax: 0.10.0
libtpu: 0.0.40
codegen_flags: <defaults>
</compile_context>

<pallas_src>
import numpy as np
import jax
import jax.numpy as jnp
from jax import lax
from jax.experimental import pallas as pl
from jax.experimental.pallas import tpu as pltpu


TB = 128  # max batch tile (sized for v7x's 64 MiB VMEM; v5e/v6e can go to 256)


# ---------------------------------------------------------------------------
# Static gather table: xcat[b, r, dy*28 + w] = x[b, ybase(r) + dy, w]
#   rows 0..12  -> even conv1 output rows (y = 2r)
#   rows 16..28 -> odd  conv1 output rows (y = 2r+1)
#   rows 13..15, 29..31 -> zeros (index points at a zero pad slot)
# ---------------------------------------------------------------------------
def _build_xcat_index():
    idx = np.full((32, 84), 28 * 28, np.int32)          # default -> zero slot
    ybase = {}
    for r in range(13):
        ybase[r] = 2 * r
        ybase[16 + r] = 2 * r + 1
    for r, y0 in ybase.items():
        for dy in range(3):
            for w in range(28):
                idx[r, dy * 28 + w] = (y0 + dy) * 28 + w
    return idx


_XCAT_IDX = _build_xcat_index()


# ---------------------------------------------------------------------------
# Kernel: whole forward for one batch tile.  Both convs and the fused fc tail run
# on the MXU; pooling uses only aligned contiguous slices (plus one small 32-lane
# shift before the tiny fc matmuls).
# ---------------------------------------------------------------------------
def net_kernel(xcat_ref, w1t_ref, b1p_ref, w2t_ref, b2p_ref, fwt_ref, fbp_ref, o_ref):
    tb = o_ref.shape[0]
    wdt = w1t_ref.dtype  # bf16 on the fast path, f32 on the reference-accurate path

    # ---- conv1: ONE Toeplitz matmul, K=84 (3 dy tap-rows lane-concatenated), N=512.
    # Output lane layout: even x block at lanes x1*16+c (0..207), odd x block at
    # 256 + x1*16 + c (256..463); remaining lanes are zero.
    lhs1 = xcat_ref[...].reshape(tb * 32, 84)                 # layout-preserving (32 % 8 == 0)
    h1 = jnp.dot(lhs1, w1t_ref[...], preferred_element_type=jnp.float32)
    h1 = jnp.maximum(h1 + b1p_ref[...], 0.0)                  # bias + ReLU, lane-dense
    h1 = h1.reshape(tb, 32, 512)

    # ---- maxpool1 (2x2): both slices 8-sublane / 128-lane aligned, no relayout.
    p1y = jnp.maximum(h1[:, 0:16, :], h1[:, 16:32, :])        # y-pair max   (tb, 16, 512)
    p1 = jnp.maximum(p1y[:, :, 0:256], p1y[:, :, 256:512])    # x-pair max   (tb, 16, 256)
    # p1 lane = x1*16 + c (compact), rows 0..12 valid, rows 13..15 finite garbage.

    # ---- conv2: one Toeplitz matmul (K=256, compact pooled layout), the three dy
    # tap-rows live in the N axis (384-lane blocks), then shifted adds over rows.
    lhs2 = p1.reshape(tb * 16, 256).astype(wdt)               # layout-preserving (16 % 8 == 0)
    r2 = jnp.dot(lhs2, w2t_ref[...], preferred_element_type=jnp.float32)
    r2 = r2.reshape(tb, 16, 1152)
    acc2 = (r2[:, 0:11, 0:352]
            + r2[:, 1:12, 384:736]
            + r2[:, 2:13, 768:1120])                          # (tb, 11, 352): lane = x2*32 + c2
    h2 = jnp.maximum(acc2 + b2p_ref[...], 0.0)                # bias + ReLU

    # ---- maxpool2 (2x2 floor -> 5x5) + flatten + fused fc1@fc2, one small matmul
    # per pooled row, accumulated.  x-compaction is folded into the fc weights.
    out = None
    for y5 in range(5):
        m = jnp.maximum(h2[:, 2 * y5, :], h2[:, 2 * y5 + 1, :])   # (tb, 352) y-pair max
        mm = jnp.maximum(m[:, 0:320], m[:, 32:352])               # (tb, 320) x-pair max (loose)
        t = jnp.dot(mm.astype(wdt), fwt_ref[y5], preferred_element_type=jnp.float32)
        out = t if out is None else out + t                       # (tb, 128)
    o_ref[...] = out + fbp_ref[...]                               # col 0 = fc2 output


# ---------------------------------------------------------------------------
# Glue: pack the plain conv/fc parameters into Toeplitz / fused layouts (once).
# ---------------------------------------------------------------------------
def pack_params(params):
    w1, b1, w2, b2, fw1, fb1, fw2, fb2 = [np.asarray(p, np.float32) for p in params]

    def col1(x, c):  # conv1 output lane: even/odd x in separate 256-lane halves
        return (x // 2) * 16 + c + (256 if (x % 2) else 0)

    # conv1 Toeplitz: K = dy*28 + w (84), N = 512.
    w1t = np.zeros((84, 512), np.float32)
    b1p = np.zeros((1, 512), np.float32)
    for x in range(26):
        for c in range(16):
            n = col1(x, c)
            b1p[0, n] = b1[c]
            for dy in range(3):
                for dx in range(3):
                    w1t[dy * 28 + x + dx, n] = w1[dy, dx, 0, c]

    # conv2 Toeplitz: K = x1*16 + ci (compact pooled layout, 256), N = dy*384 + x2*32 + co.
    w2t = np.zeros((256, 1152), np.float32)
    for dy in range(3):
        for dx in range(3):
            for x2 in range(11):
                r0 = (x2 + dx) * 16
                c0 = dy * 384 + x2 * 32
                w2t[r0:r0 + 16, c0:c0 + 32] = w2[dy, dx, :, :]
    b2p = np.zeros((1, 352), np.float32)
    for x2 in range(11):
        b2p[0, x2 * 32:(x2 + 1) * 32] = b2

    # fused fc: fw12 = fw1 @ fw2 (800,1) with rows in PyTorch CHW-flatten order,
    # fb12 = fb1 @ fw2 + fb2.  Only output column 0 is used.
    fw12 = fw1 @ fw2                                              # (800, 1)
    fb12 = fb1.reshape(1, -1) @ fw2 + fb2.reshape(1, -1)          # (1, 1)
    fwt = np.zeros((5, 320, 128), np.float32)
    for y5 in range(5):
        for x5 in range(5):
            for co in range(32):
                fwt[y5, (2 * x5) * 32 + co, 0] = fw12[co * 25 + y5 * 5 + x5, 0]
    fbp = np.zeros((1, 128), np.float32)
    fbp[0, 0] = fb12[0, 0]

    return tuple(jnp.asarray(a) for a in (w1t, b1p, w2t, b2p, fwt, fbp))


# ---------------------------------------------------------------------------
# Wrapper: single-gather LHS construction, adaptive batch tile, pallas_call.
# ---------------------------------------------------------------------------
def _round_up(v, m):
    return ((v + m - 1) // m) * m


def net_forward(x_nchw, packed, *, mxu_dtype=jnp.bfloat16, tb_max=TB):
    """x_nchw: (B, 1, 28, 28) float32 (PyTorch layout). Returns (B, 1) float32."""
    w1t, b1p, w2t, b2p, fwt, fbp = packed
    if mxu_dtype != jnp.float32:
        w1t, w2t, fwt = (a.astype(mxu_dtype) for a in (w1t, w2t, fwt))  # biases stay f32

    x = x_nchw[:, 0, :, :].astype(jnp.float32)                    # (B, 28, 28)
    B = x.shape[0]

    # Adaptive batch tile: multiple of 8, capped at tb_max, aims for >= 2 grid steps
    # (keeps both v7x TensorCores busy) without padding tiny batches to 128.
    tb = min(tb_max, max(8, _round_up((B + 1) // 2, 8)))
    bp = _round_up(B, tb)

    # Single gather (fused with the bf16 cast) producing the conv1 Toeplitz LHS:
    # xcat[b, r, dy*28+w] = x[b, ybase(r)+dy, w]; pad rows read a zero slot.
    xflat = jnp.pad(x.reshape(B, 28 * 28).astype(mxu_dtype), ((0, 0), (0, 1)))
    xcat = jnp.take(xflat, jnp.asarray(_XCAT_IDX), axis=1)        # (B, 32, 84)
    if bp != B:
        xcat = jnp.pad(xcat, ((0, bp - B), (0, 0), (0, 0)))

    flops = 2 * bp * (32 * 84 * 512 + 16 * 256 * 1152 + 5 * 320 * 128)
    bytes_accessed = (int(xcat.size) * xcat.dtype.itemsize
                      + sum(int(a.size) * a.dtype.itemsize
                            for a in (w1t, b1p, w2t, b2p, fwt, fbp))
                      + bp * 128 * 4)

    # 48 MiB fits v7x's 64 MiB VMEM with headroom at tb<=128; v5e/v6e (128 MiB
    # physical) may use tb_max=256 which bumps the budget.  Do NOT use tb>128 on v7x.
    vmem_limit = 48 * 1024 * 1024 if tb <= 128 else 100 * 1024 * 1024

    out = pl.pallas_call(
        net_kernel,
        out_shape=jax.ShapeDtypeStruct((bp, 128), jnp.float32),
        grid=(bp // tb,),
        in_specs=[
            pl.BlockSpec((tb, 32, 84), lambda i: (i, 0, 0)),
            pl.BlockSpec(w1t.shape, lambda i: (0, 0)),
            pl.BlockSpec(b1p.shape, lambda i: (0, 0)),
            pl.BlockSpec(w2t.shape, lambda i: (0, 0)),
            pl.BlockSpec(b2p.shape, lambda i: (0, 0)),
            pl.BlockSpec(fwt.shape, lambda i: (0, 0, 0)),
            pl.BlockSpec(fbp.shape, lambda i: (0, 0)),
        ],
        out_specs=pl.BlockSpec((tb, 128), lambda i: (i, 0)),
        compiler_params=pltpu.CompilerParams(
            dimension_semantics=("parallel",),        # batch tiles across TensorCores
            vmem_limit_bytes=vmem_limit,
        ),
        cost_estimate=pl.CostEstimate(
            flops=flops, transcendentals=0, bytes_accessed=bytes_accessed),
    )(xcat, w1t, b1p, w2t, b2p, fwt, fbp)
    return out[:B, :1]


# ---------------------------------------------------------------------------
# Plain parameters (PyTorch-default-style init) + pure-JAX reference.
# ---------------------------------------------------------------------------
def init_params(key):
    ks = jax.random.split(key, 8)

    def u(k, shape, fan_in):
        b = 1.0 / float(fan_in) ** 0.5
        return jax.random.uniform(k, shape, jnp.float32, -b, b)

    w1 = u(ks[0], (3, 3, 1, 16), 9)        # HWIO
    b1 = u(ks[1], (16,), 9)
    w2 = u(ks[2], (3, 3, 16, 32), 144)     # HWIO
    b2 = u(ks[3], (32,), 144)
    fw1 = u(ks[4], (800, 10), 800)         # rows in PyTorch CHW-flatten order (= fc1.weight.T)
    fb1 = u(ks[5], (10,), 800)
    fw2 = u(ks[6], (10, 1), 10)            # (= fc2.weight.T)
    fb2 = u(ks[7], (1,), 10)
    return (w1, b1, w2, b2, fw1, fb1, fw2, fb2)


def net_reference(x_nchw, params):
    """Plain-JAX reference with the PyTorch module's semantics."""
    w1, b1, w2, b2, fw1, fb1, fw2, fb2 = params
    hp = jax.lax.Precision.HIGHEST
    x = jnp.transpose(x_nchw, (0, 2, 3, 1)).astype(jnp.float32)
    dn1 = lax.conv_dimension_numbers(x.shape, w1.shape, ('NHWC', 'HWIO', 'NHWC'))
    h = lax.conv_general_dilated(x, w1, (1, 1), 'VALID', dimension_numbers=dn1, precision=hp)
    h = jnp.maximum(h + b1.reshape(1, 1, 1, 16), 0.0)
    h = lax.reduce_window(h, -jnp.inf, lax.max, (1, 2, 2, 1), (1, 2, 2, 1), 'VALID')
    dn2 = lax.conv_dimension_numbers(h.shape, w2.shape, ('NHWC', 'HWIO', 'NHWC'))
    h = lax.conv_general_dilated(h, w2, (1, 1), 'VALID', dimension_numbers=dn2, precision=hp)
    h = jnp.maximum(h + b2.reshape(1, 1, 1, 32), 0.0)
    h = lax.reduce_window(h, -jnp.inf, lax.max, (1, 2, 2, 1), (1, 2, 2, 1), 'VALID')
    flat = jnp.transpose(h, (0, 3, 1, 2)).reshape(h.shape[0], -1)      # CHW flatten (PyTorch order)
    y = jnp.dot(flat, fw1, precision=hp) + fb1.reshape(1, -1)
    return jnp.dot(y, fw2, precision=hp) + fb2.reshape(1, -1)


if __name__ == "__main__":
    key = jax.random.PRNGKey(0)
    kx, kp = jax.random.split(key)
    # PyTorch-style NCHW input: MNIST-like 28x28 single channel, batch 2.
    x = jax.random.normal(kx, (2, 1, 28, 28), jnp.float32)
    params = init_params(kp)
    packed = pack_params(params)

    ref = net_reference(x, params)

    # f32 MXU operands (reference-accurate path).
    fwd_f32 = jax.jit(lambda xx: net_forward(xx, packed, mxu_dtype=jnp.float32))
    out = fwd_f32(x)
    jax.block_until_ready(out)
    assert out.shape == (2, 1), out.shape
    assert jnp.allclose(out, ref, rtol=1e-2, atol=1e-2), (out, ref)

    # bf16 MXU operands (default fast path: v5e/v6e/v7x), f32 accumulation.
    fwd_bf16 = jax.jit(lambda xx: net_forward(xx, packed))
    out_bf16 = fwd_bf16(x)
    jax.block_until_ready(out_bf16)
    assert jnp.allclose(out_bf16, ref, rtol=5e-2, atol=5e-2), (out_bf16, ref)

    print("KERNEL_OK")
</pallas_src>

<mosaic_0001>
module attributes {stable_mosaic.version = 11 : i64} {
  func.func @net_kernel(%arg0: i32, %arg1: memref<8x32x84xf32, #tpu.memory_space<vmem>>, %arg2: memref<84x512xf32, #tpu.memory_space<vmem>>, %arg3: memref<1x512xf32, #tpu.memory_space<vmem>>, %arg4: memref<256x1152xf32, #tpu.memory_space<vmem>>, %arg5: memref<1x352xf32, #tpu.memory_space<vmem>>, %arg6: memref<5x320x128xf32, #tpu.memory_space<vmem>>, %arg7: memref<1x128xf32, #tpu.memory_space<vmem>>, %arg8: memref<8x128xf32, #tpu.memory_space<vmem>>) attributes {dimension_semantics = [#tpu.dimension_semantics<parallel>], iteration_bounds = array<i64: 1>, scalar_prefetch = 0 : i64, scratch_operands = 0 : i64, tpu.core_type = #tpu.core_type<tc>, window_params = [{transform_indices = @transform_0, window_bounds = array<i64: 8, 32, 84>}, {pipeline_mode = #tpu.pipeline_mode<synchronous>, transform_indices = @transform_1, window_bounds = array<i64: 84, 512>}, {pipeline_mode = #tpu.pipeline_mode<synchronous>, transform_indices = @transform_2, window_bounds = array<i64: 1, 512>}, {pipeline_mode = #tpu.pipeline_mode<synchronous>, transform_indices = @transform_3, window_bounds = array<i64: 256, 1152>}, {pipeline_mode = #tpu.pipeline_mode<synchronous>, transform_indices = @transform_4, window_bounds = array<i64: 1, 352>}, {pipeline_mode = #tpu.pipeline_mode<synchronous>, transform_indices = @transform_5, window_bounds = array<i64: 5, 320, 128>}, {pipeline_mode = #tpu.pipeline_mode<synchronous>, transform_indices = @transform_6, window_bounds = array<i64: 1, 128>}, {transform_indices = @transform_7, window_bounds = array<i64: 8, 128>}]} {
    %c0 = arith.constant 0 : index
    %c0_0 = arith.constant 0 : index
    %c0_1 = arith.constant 0 : index
    %0 = vector.load %arg1[%c0, %c0_0, %c0_1] : memref<8x32x84xf32, #tpu.memory_space<vmem>>, vector<8x32x84xf32>
    %1 = vector.shape_cast %0 : vector<8x32x84xf32> to vector<256x84xf32>
    %c0_2 = arith.constant 0 : index
    %c0_3 = arith.constant 0 : index
    %2 = vector.load %arg2[%c0_2, %c0_3] : memref<84x512xf32, #tpu.memory_space<vmem>>, vector<84x512xf32>
    %cst = arith.constant dense<0.000000e+00> : vector<256x512xf32>
    %3 = tpu.matmul %1, %2, %cst {dimension_numbers = #tpu.dot_dimension_numbers<[1], [0], [0], [1], [0, 0, 1, 1], [], []>} : vector<256x84xf32>, vector<84x512xf32>, vector<256x512xf32> -> vector<256x512xf32>
    %c0_4 = arith.constant 0 : index
    %c0_5 = arith.constant 0 : index
    %4 = vector.load %arg3[%c0_4, %c0_5] : memref<1x512xf32, #tpu.memory_space<vmem>>, vector<1x512xf32>
    %5 = vector.broadcast %4 : vector<1x512xf32> to vector<256x512xf32>
    %6 = arith.addf %3, %5 : vector<256x512xf32>
    %cst_6 = arith.constant 0.000000e+00 : f32
    %7 = vector.broadcast %cst_6 : f32 to vector<256x512xf32>
    %8 = arith.maximumf %6, %7 : vector<256x512xf32>
    %9 = vector.shape_cast %8 : vector<256x512xf32> to vector<8x32x512xf32>
    %10 = vector.extract_strided_slice %9 {offsets = [0, 0, 0], sizes = [8, 16, 512], strides = [1, 1, 1]} : vector<8x32x512xf32> to vector<8x16x512xf32>
    %11 = vector.extract_strided_slice %9 {offsets = [0, 16, 0], sizes = [8, 16, 512], strides = [1, 1, 1]} : vector<8x32x512xf32> to vector<8x16x512xf32>
    %12 = arith.maximumf %10, %11 : vector<8x16x512xf32>
    %13 = vector.extract_strided_slice %12 {offsets = [0, 0, 0], sizes = [8, 16, 256], strides = [1, 1, 1]} : vector<8x16x512xf32> to vector<8x16x256xf32>
    %14 = vector.extract_strided_slice %12 {offsets = [0, 0, 256], sizes = [8, 16, 256], strides = [1, 1, 1]} : vector<8x16x512xf32> to vector<8x16x256xf32>
    %15 = arith.maximumf %13, %14 : vector<8x16x256xf32>
    %16 = vector.shape_cast %15 : vector<8x16x256xf32> to vector<128x256xf32>
    %c0_7 = arith.constant 0 : index
    %c0_8 = arith.constant 0 : index
    %17 = vector.load %arg4[%c0_7, %c0_8] : memref<256x1152xf32, #tpu.memory_space<vmem>>, vector<256x1152xf32>
    %cst_9 = arith.constant dense<0.000000e+00> : vector<128x1152xf32>
    %18 = tpu.matmul %16, %17, %cst_9 {dimension_numbers = #tpu.dot_dimension_numbers<[1], [0], [0], [1], [0, 0, 1, 1], [], []>} : vector<128x256xf32>, vector<256x1152xf32>, vector<128x1152xf32> -> vector<128x1152xf32>
    %19 = vector.shape_cast %18 : vector<128x1152xf32> to vector<8x16x1152xf32>
    %20 = vector.extract_strided_slice %19 {offsets = [0, 0, 0], sizes = [8, 11, 352], strides = [1, 1, 1]} : vector<8x16x1152xf32> to vector<8x11x352xf32>
    %21 = vector.extract_strided_slice %19 {offsets = [0, 1, 384], sizes = [8, 11, 352], strides = [1, 1, 1]} : vector<8x16x1152xf32> to vector<8x11x352xf32>
    %22 = arith.addf %20, %21 : vector<8x11x352xf32>
    %23 = vector.extract_strided_slice %19 {offsets = [0, 2, 768], sizes = [8, 11, 352], strides = [1, 1, 1]} : vector<8x16x1152xf32> to vector<8x11x352xf32>
    %24 = arith.addf %22, %23 : vector<8x11x352xf32>
    %c0_10 = arith.constant 0 : index
    %c0_11 = arith.constant 0 : index
    %25 = vector.load %arg5[%c0_10, %c0_11] : memref<1x352xf32, #tpu.memory_space<vmem>>, vector<1x352xf32>
    %26 = vector.shape_cast %25 : vector<1x352xf32> to vector<1x1x352xf32>
    %27 = vector.broadcast %26 : vector<1x1x352xf32> to vector<8x11x352xf32>
    %28 = arith.addf %24, %27 : vector<8x11x352xf32>
    %cst_12 = arith.constant 0.000000e+00 : f32
    %29 = vector.broadcast %cst_12 : f32 to vector<8x11x352xf32>
    %30 = arith.maximumf %28, %29 : vector<8x11x352xf32>
    %31 = vector.extract_strided_slice %30 {offsets = [0, 0, 0], sizes = [8, 1, 352], strides = [1, 1, 1]} : vector<8x11x352xf32> to vector<8x1x352xf32>
    %32 = vector.shape_cast %31 : vector<8x1x352xf32> to vector<8x352xf32>
    %33 = vector.extract_strided_slice %30 {offsets = [0, 1, 0], sizes = [8, 1, 352], strides = [1, 1, 1]} : vector<8x11x352xf32> to vector<8x1x352xf32>
    %34 = vector.shape_cast %33 : vector<8x1x352xf32> to vector<8x352xf32>
    %35 = arith.maximumf %32, %34 : vector<8x352xf32>
    %36 = vector.extract_strided_slice %35 {offsets = [0, 0], sizes = [8, 320], strides = [1, 1]} : vector<8x352xf32> to vector<8x320xf32>
    %37 = vector.extract_strided_slice %35 {offsets = [0, 32], sizes = [8, 320], strides = [1, 1]} : vector<8x352xf32> to vector<8x320xf32>
    %38 = arith.maximumf %36, %37 : vector<8x320xf32>
    %c0_13 = arith.constant 0 : index
    %c0_14 = arith.constant 0 : index
    %c0_15 = arith.constant 0 : index
    %39 = vector.load %arg6[%c0_13, %c0_14, %c0_15] : memref<5x320x128xf32, #tpu.memory_space<vmem>>, vector<1x320x128xf32>
    %40 = vector.shape_cast %39 : vector<1x320x128xf32> to vector<320x128xf32>
    %cst_16 = arith.constant dense<0.000000e+00> : vector<8x128xf32>
    %41 = tpu.matmul %38, %40, %cst_16 {dimension_numbers = #tpu.dot_dimension_numbers<[1], [0], [0], [1], [0, 0, 1, 1], [], []>} : vector<8x320xf32>, vector<320x128xf32>, vector<8x128xf32> -> vector<8x128xf32>
    %42 = vector.extract_strided_slice %30 {offsets = [0, 2, 0], sizes = [8, 1, 352], strides = [1, 1, 1]} : vector<8x11x352xf32> to vector<8x1x352xf32>
    %43 = vector.shape_cast %42 : vector<8x1x352xf32> to vector<8x352xf32>
    %44 = vector.extract_strided_slice %30 {offsets = [0, 3, 0], sizes = [8, 1, 352], strides = [1, 1, 1]} : vector<8x11x352xf32> to vector<8x1x352xf32>
    %45 = vector.shape_cast %44 : vector<8x1x352xf32> to vector<8x352xf32>
    %46 = arith.maximumf %43, %45 : vector<8x352xf32>
    %47 = vector.extract_strided_slice %46 {offsets = [0, 0], sizes = [8, 320], strides = [1, 1]} : vector<8x352xf32> to vector<8x320xf32>
    %48 = vector.extract_strided_slice %46 {offsets = [0, 32], sizes = [8, 320], strides = [1, 1]} : vector<8x352xf32> to vector<8x320xf32>
    %49 = arith.maximumf %47, %48 : vector<8x320xf32>
    %c1 = arith.constant 1 : index
    %c0_17 = arith.constant 0 : index
    %c0_18 = arith.constant 0 : index
    %50 = vector.load %arg6[%c1, %c0_17, %c0_18] : memref<5x320x128xf32, #tpu.memory_space<vmem>>, vector<1x320x128xf32>
    %51 = vector.shape_cast %50 : vector<1x320x128xf32> to vector<320x128xf32>
    %cst_19 = arith.constant dense<0.000000e+00> : vector<8x128xf32>
    %52 = tpu.matmul %49, %51, %cst_19 {dimension_numbers = #tpu.dot_dimension_numbers<[1], [0], [0], [1], [0, 0, 1, 1], [], []>} : vector<8x320xf32>, vector<320x128xf32>, vector<8x128xf32> -> vector<8x128xf32>
    %53 = arith.addf %41, %52 : vector<8x128xf32>
    %54 = vector.extract_strided_slice %30 {offsets = [0, 4, 0], sizes = [8, 1, 352], strides = [1, 1, 1]} : vector<8x11x352xf32> to vector<8x1x352xf32>
    %55 = vector.shape_cast %54 : vector<8x1x352xf32> to vector<8x352xf32>
    %56 = vector.extract_strided_slice %30 {offsets = [0, 5, 0], sizes = [8, 1, 352], strides = [1, 1, 1]} : vector<8x11x352xf32> to vector<8x1x352xf32>
    %57 = vector.shape_cast %56 : vector<8x1x352xf32> to vector<8x352xf32>
    %58 = arith.maximumf %55, %57 : vector<8x352xf32>
    %59 = vector.extract_strided_slice %58 {offsets = [0, 0], sizes = [8, 320], strides = [1, 1]} : vector<8x352xf32> to vector<8x320xf32>
    %60 = vector.extract_strided_slice %58 {offsets = [0, 32], sizes = [8, 320], strides = [1, 1]} : vector<8x352xf32> to vector<8x320xf32>
    %61 = arith.maximumf %59, %60 : vector<8x320xf32>
    %c2 = arith.constant 2 : index
    %c0_20 = arith.constant 0 : index
    %c0_21 = arith.constant 0 : index
    %62 = vector.load %arg6[%c2, %c0_20, %c0_21] : memref<5x320x128xf32, #tpu.memory_space<vmem>>, vector<1x320x128xf32>
    %63 = vector.shape_cast %62 : vector<1x320x128xf32> to vector<320x128xf32>
    %cst_22 = arith.constant dense<0.000000e+00> : vector<8x128xf32>
    %64 = tpu.matmul %61, %63, %cst_22 {dimension_numbers = #tpu.dot_dimension_numbers<[1], [0], [0], [1], [0, 0, 1, 1], [], []>} : vector<8x320xf32>, vector<320x128xf32>, vector<8x128xf32> -> vector<8x128xf32>
    %65 = arith.addf %53, %64 : vector<8x128xf32>
    %66 = vector.extract_strided_slice %30 {offsets = [0, 6, 0], sizes = [8, 1, 352], strides = [1, 1, 1]} : vector<8x11x352xf32> to vector<8x1x352xf32>
    %67 = vector.shape_cast %66 : vector<8x1x352xf32> to vector<8x352xf32>
    %68 = vector.extract_strided_slice %30 {offsets = [0, 7, 0], sizes = [8, 1, 352], strides = [1, 1, 1]} : vector<8x11x352xf32> to vector<8x1x352xf32>
    %69 = vector.shape_cast %68 : vector<8x1x352xf32> to vector<8x352xf32>
    %70 = arith.maximumf %67, %69 : vector<8x352xf32>
    %71 = vector.extract_strided_slice %70 {offsets = [0, 0], sizes = [8, 320], strides = [1, 1]} : vector<8x352xf32> to vector<8x320xf32>
    %72 = vector.extract_strided_slice %70 {offsets = [0, 32], sizes = [8, 320], strides = [1, 1]} : vector<8x352xf32> to vector<8x320xf32>
    %73 = arith.maximumf %71, %72 : vector<8x320xf32>
    %c3 = arith.constant 3 : index
    %c0_23 = arith.constant 0 : index
    %c0_24 = arith.constant 0 : index
    %74 = vector.load %arg6[%c3, %c0_23, %c0_24] : memref<5x320x128xf32, #tpu.memory_space<vmem>>, vector<1x320x128xf32>
    %75 = vector.shape_cast %74 : vector<1x320x128xf32> to vector<320x128xf32>
    %cst_25 = arith.constant dense<0.000000e+00> : vector<8x128xf32>
    %76 = tpu.matmul %73, %75, %cst_25 {dimension_numbers = #tpu.dot_dimension_numbers<[1], [0], [0], [1], [0, 0, 1, 1], [], []>} : vector<8x320xf32>, vector<320x128xf32>, vector<8x128xf32> -> vector<8x128xf32>
    %77 = arith.addf %65, %76 : vector<8x128xf32>
    %78 = vector.extract_strided_slice %30 {offsets = [0, 8, 0], sizes = [8, 1, 352], strides = [1, 1, 1]} : vector<8x11x352xf32> to vector<8x1x352xf32>
    %79 = vector.shape_cast %78 : vector<8x1x352xf32> to vector<8x352xf32>
    %80 = vector.extract_strided_slice %30 {offsets = [0, 9, 0], sizes = [8, 1, 352], strides = [1, 1, 1]} : vector<8x11x352xf32> to vector<8x1x352xf32>
    %81 = vector.shape_cast %80 : vector<8x1x352xf32> to vector<8x352xf32>
    %82 = arith.maximumf %79, %81 : vector<8x352xf32>
    %83 = vector.extract_strided_slice %82 {offsets = [0, 0], sizes = [8, 320], strides = [1, 1]} : vector<8x352xf32> to vector<8x320xf32>
    %84 = vector.extract_strided_slice %82 {offsets = [0, 32], sizes = [8, 320], strides = [1, 1]} : vector<8x352xf32> to vector<8x320xf32>
    %85 = arith.maximumf %83, %84 : vector<8x320xf32>
    %c4 = arith.constant 4 : index
    %c0_26 = arith.constant 0 : index
    %c0_27 = arith.constant 0 : index
    %86 = vector.load %arg6[%c4, %c0_26, %c0_27] : memref<5x320x128xf32, #tpu.memory_space<vmem>>, vector<1x320x128xf32>
    %87 = vector.shape_cast %86 : vector<1x320x128xf32> to vector<320x128xf32>
    %cst_28 = arith.constant dense<0.000000e+00> : vector<8x128xf32>
    %88 = tpu.matmul %85, %87, %cst_28 {dimension_numbers = #tpu.dot_dimension_numbers<[1], [0], [0], [1], [0, 0, 1, 1], [], []>} : vector<8x320xf32>, vector<320x128xf32>, vector<8x128xf32> -> vector<8x128xf32>
    %89 = arith.addf %77, %88 : vector<8x128xf32>
    %c0_29 = arith.constant 0 : index
    %c0_30 = arith.constant 0 : index
    %90 = vector.load %arg7[%c0_29, %c0_30] : memref<1x128xf32, #tpu.memory_space<vmem>>, vector<1x128xf32>
    %91 = vector.broadcast %90 : vector<1x128xf32> to vector<8x128xf32>
    %92 = arith.addf %89, %91 : vector<8x128xf32>
    %c0_31 = arith.constant 0 : index
    %c0_32 = arith.constant 0 : index
    %93 = vector.load %arg8[%c0_31, %c0_32] : memref<8x128xf32, #tpu.memory_space<vmem>>, vector<8x128xf32>
    tpu.vector_store %arg8[%c0_31, %c0_32], %92 {strides = array<i32>} : memref<8x128xf32, #tpu.memory_space<vmem>>, vector<8x128xf32>,
    return
  }
  func.func @transform_0(%arg0: i32) -> (i32, i32, i32) {
    %c0_i32 = arith.constant 0 : i32
    %c0_i32_0 = arith.constant 0 : i32
    %c0_i32_1 = arith.constant 0 : i32
    return %arg0, %c0_i32, %c0_i32_0 : i32, i32, i32
  }
  func.func @transform_1(%arg0: i32) -> (i32, i32) {
    %c0_i32 = arith.constant 0 : i32
    %c0_i32_0 = arith.constant 0 : i32
    %c0_i32_1 = arith.constant 0 : i32
    return %c0_i32, %c0_i32_0 : i32, i32
  }
  func.func @transform_2(%arg0: i32) -> (i32, i32) {
    %c0_i32 = arith.constant 0 : i32
    %c0_i32_0 = arith.constant 0 : i32
    %c0_i32_1 = arith.constant 0 : i32
    return %c0_i32, %c0_i32_0 : i32, i32
  }
  func.func @transform_3(%arg0: i32) -> (i32, i32) {
    %c0_i32 = arith.constant 0 : i32
    %c0_i32_0 = arith.constant 0 : i32
    %c0_i32_1 = arith.constant 0 : i32
    return %c0_i32, %c0_i32_0 : i32, i32
  }
  func.func @transform_4(%arg0: i32) -> (i32, i32) {
    %c0_i32 = arith.constant 0 : i32
    %c0_i32_0 = arith.constant 0 : i32
    %c0_i32_1 = arith.constant 0 : i32
    return %c0_i32, %c0_i32_0 : i32, i32
  }
  func.func @transform_5(%arg0: i32) -> (i32, i32, i32) {
    %c0_i32 = arith.constant 0 : i32
    %c0_i32_0 = arith.constant 0 : i32
    %c0_i32_1 = arith.constant 0 : i32
    %c0_i32_2 = arith.constant 0 : i32
    return %c0_i32, %c0_i32_0, %c0_i32_1 : i32, i32, i32
  }
  func.func @transform_6(%arg0: i32) -> (i32, i32) {
    %c0_i32 = arith.constant 0 : i32
    %c0_i32_0 = arith.constant 0 : i32
    %c0_i32_1 = arith.constant 0 : i32
    return %c0_i32, %c0_i32_0 : i32, i32
  }
  func.func @transform_7(%arg0: i32) -> (i32, i32) {
    %c0_i32 = arith.constant 0 : i32
    %c0_i32_0 = arith.constant 0 : i32
    return %arg0, %c0_i32 : i32, i32
  }
}

</mosaic_0001>

<bundles_post_ra>
// kernel: squeeze.1
= control target key start
LH: loop header
LB: loop body
LE: loop exit
PB: predicated region body
PF: predicated region fallthrough
CT: control target
= control target key end

     0   :  { %vm5_vm0 = vcmask 1041409   ;;  %vm65_vm1 = vcmask 97280   ;;  %vm21_vm2 = vcmask 31744   ;;  %s510_s24 = smov 116   ;;  %s511_s6 = smov 124   ;;  %vm69_vm3 = vcmask 130048   ;;  %s818_s0 = inlined_call_operand.vmem [shape: f32[2,28,28], index: 0, kind: input, shape index: {}]   ;;  %s819_s1 = inlined_call_operand.vmem [shape: f32[2,784], index: 1, kind: output, shape index: {}]  }
   0x1   :  { %v419_v0 = vld [vmem:[%s818_s0 + $0x1b] sm:$0x1]   ;;  %v411_v6 = vld [vmem:[%s818_s0 + $0x9] sm:$0x1]   ;;  %v423_v12 = vld [vmem:[%s818_s0 + $0x4] sm:$0x1]  }
   0x2   :  { %v420_v1 = vld [vmem:[%s818_s0 + $0x3a] sm:$0x2]   ;;  %v412_v7 = vld [vmem:[%s818_s0 + $0x28] sm:$0x2]   ;;  %v424_v14 = vld [vmem:[%s818_s0 + $0x23] sm:$0x2]  }
   0x3   :  { %v58_v2 = vsel %vm5_vm0, %v420_v1, %v419_v0  ;;  %v421_v3 = vld [vmem:[%s818_s0 + $0x1b] sm:$0x1]   ;;  %v413_v8 = vld [vmem:[%s818_s0 + $0x9] sm:$0x1]   ;;  %v14_v10 = vsel %vm5_vm0, %v412_v7, %v411_v6  ;;  %v425_v15 = vld [vmem:[%s818_s0 + $0x4] sm:$0x1]   ;;  %v80_v20 = vsel %vm5_vm0, %v424_v14, %v423_v12 }
   0x4   :  { %v422_v4 = vld [vmem:[%s818_s0 + $0x3a] sm:$0x2]   ;;  %v414_v11 = vld [vmem:[%s818_s0 + $0x28] sm:$0x2]   ;;  %v426_v16 = vld [vmem:[%s818_s0 + $0x23] sm:$0x2]  }
   0x5   :  { %v64_v5 = vsel %vm5_vm0, %v422_v4, %v421_v3  ;;  %v20_v13 = vsel %vm5_vm0, %v414_v11, %v413_v8  ;;  %v415_v18 = vld [vmem:[%s818_s0 + $0x12] sm:$0x1]   ;;  %v86_v21 = vsel %vm5_vm0, %v426_v16, %v425_v15  ;;  %vm43_vm4 = vcmask 64512   ;;  %v427_v26 = vld [vmem:[%s818_s0 + $0xd] sm:$0x1]   ;;  %s512_s19 = smov 112  }
   0x6   :  { %v66_v9 = vsel %vm65_vm1, %v64_v5, %v58_v2  ;;  %v22_v17 = vsel %vm21_vm2, %v20_v13, %v14_v10  ;;  %v416_v19 = vld [vmem:[%s818_s0 + $0x31] sm:$0x2]   ;;  %vm47_vm5 = vcmask 162816   ;;  %v88_v27 = vsel %vm69_vm3, %v86_v21, %v80_v20  ;;  %v428_v28 = vld [vmem:[%s818_s0 + $0x2c] sm:$0x2]   ;;  %s513_s20 = smov 108  }
   0x7   :  { %67 = vrot.lane.b32.xlu1 %v66_v9, %s510_s24  ;;  %23 = vrot.lane.b32.xlu0 %v22_v17, %s511_s6  ;;  %v417_v22 = vld [vmem:[%s818_s0 + $0x12] sm:$0x1]   ;;  %v36_v24 = vsel %vm5_vm0, %v416_v19, %v415_v18  ;;  %v429_v29 = vld [vmem:[%s818_s0 + $0xd] sm:$0x1]   ;;  %v101_v31 = vsel %vm5_vm0, %v428_v28, %v427_v26  ;;  %s514_s29 = smov 120   ;;  %vm25_vm6 = vcmask 195584  }
   0x8   :  { %v418_v23 = vld [vmem:[%s818_s0 + $0x31] sm:$0x2]   ;;  %v430_v30 = vld [vmem:[%s818_s0 + $0x2c] sm:$0x2]   ;;  %v431_v35 = vld [vmem:[%s818_s0 + $0x16] sm:$0x1]  }
   0x9   :  { %v42_v25 = vsel %vm5_vm0, %v418_v23, %v417_v22  ;;  %v107_v32 = vsel %vm5_vm0, %v430_v30, %v429_v29  ;;  %v432_v36 = vld [vmem:[%s818_s0 + $0x35] sm:$0x2]   ;;  %v437_v39 = vld [vmem:[%s818_s0 + $0x11] sm:$0x1]   ;;  %v435_v43 = vld [vmem:[%s818_s0 + $0x8] sm:$0x1]  }
   0xa   :  { %v44_v33 = vsel %vm43_vm4, %v42_v25, %v36_v24  ;;  %v109_v34 = vsel %vm47_vm5, %v107_v32, %v101_v31  ;;  %v433_v37 = vld [vmem:[%s818_s0 + $0x16] sm:$0x1]   ;;  %v438_v40 = vld [vmem:[%s818_s0 + $0x30] sm:$0x2]   ;;  %v123_v41 = vsel %vm5_vm0, %v432_v36, %v431_v35  ;;  %v436_v44 = vld [vmem:[%s818_s0 + $0x27] sm:$0x2]  }
   0xb   :  { %110 = vrot.lane.b32.xlu2 %v109_v34, %s513_s20  ;;  %v434_v38 = vld [vmem:[%s818_s0 + $0x35] sm:$0x2]   ;;  %v156_v45 = vsel %vm5_vm0, %v438_v40, %v437_v39  ;;  %v145_v47 = vsel %vm5_vm0, %v436_v44, %v435_v43  ;;  %s515_s9 = smov 92   ;;  %s516_s10 = smov 104   ;;  %v443_v48 = vld [vmem:[%s818_s0 + $0xc] sm:$0x1]  }
   0xc   :  { %v129_v42 = vsel %vm5_vm0, %v434_v38, %v433_v37  ;;  %s517_s13 = smov 96   ;;  %v444_v49 = vld [vmem:[%s818_s0 + $0x2b] sm:$0x2]   ;;  %v439_v50 = vld [vmem:[%s818_s0 + $0x1a] sm:$0x1]   ;;  %s518_s24 = smov 80  }
   0xd   :  { %v131_v46 = vsel %vm25_vm6, %v129_v42, %v123_v41  ;;  %v440_v51 = vld [vmem:[%s818_s0 + $0x39] sm:$0x2]   ;;  %v441_v52 = vld [vmem:[%s818_s0 + $0x3] sm:$0x1]   ;;  %v188_v54 = vsel %vm5_vm0, %v444_v49, %v443_v48  ;;  %s519_s25 = smov 88   ;;  %s520_s28 = smov 84  }
   0xe   :  { %v442_v53 = vld [vmem:[%s818_s0 + $0x22] sm:$0x2]   ;;  %v167_v55 = vsel %vm5_vm0, %v440_v51, %v439_v50  ;;  %v449_v57 = vld [vmem:[%s818_s0 + $0x10] sm:$0x1]   ;;  %v445_v59 = vld [vmem:[%s818_s0 + $0x15] sm:$0x1]  }
   0xf   :  { %89 = vrot.lane.b32.xlu1 %v88_v27, %s512_s19  ;;  %45 = vrot.lane.b32.xlu0 %v44_v33, %s514_s29  ;;  %v178_v56 = vsel %vm5_vm0, %v442_v53, %v441_v52  ;;  %v450_v58 = vld [vmem:[%s818_s0 + $0x2f] sm:$0x2]   ;;  %v446_v60 = vld [vmem:[%s818_s0 + $0x34] sm:$0x2]   ;;  %s522_s11 = smov 76   ;;  %s523_s14 = smov 68  }
  0x10   :  { %v447_v61 = vld [vmem:[%s818_s0 + $0x7] sm:$0x1]   ;;  %v221_v63 = vsel %vm5_vm0, %v450_v58, %v449_v57  ;;  %v199_v0 = vsel %vm5_vm0, %v446_v60, %v445_v59  ;;  %v455_v2 = vld [vmem:[%s818_s0 + $0xb] sm:$0x1]   ;;  %v451_v4 = vld [vmem:[%s818_s0 + $0x19] sm:$0x1]  }
  0x11   :  { %v448_v62 = vld [vmem:[%s818_s0 + $0x26] sm:$0x2]   ;;  %v456_v3 = vld [vmem:[%s818_s0 + $0x2a] sm:$0x2]   ;;  %v452_v5 = vld [vmem:[%s818_s0 + $0x38] sm:$0x2]  }
  0x12   :  { %v210_v1 = vsel %vm5_vm0, %v448_v62, %v447_v61  ;;  %v453_v6 = vld [vmem:[%s818_s0 + $0x2] sm:$0x1]   ;;  %v253_v8 = vsel %vm5_vm0, %v456_v3, %v455_v2  ;;  %v232_v9 = vsel %vm5_vm0, %v452_v5, %v451_v4  ;;  %s525_s26 = smov 60   ;;  %v461_v11 = vld [vmem:[%s818_s0 + $0xf] sm:$0x1]   ;;  %s526_s29 = smov 56  }
  0x13   :  { %132 = vrot.lane.b32.xlu2 %v131_v46, %s516_s10  ;;  %s521_s10 = smov 64   ;;  %v454_v7 = vld [vmem:[%s818_s0 + $0x21] sm:$0x2]   ;;  %v462_v12 = vld [vmem:[%s818_s0 + $0x2e] sm:$0x2]   ;;  %s528_s12 = smov 48  }
  0x14   :  { %v243_v10 = vsel %vm5_vm0, %v454_v7, %v453_v6  ;;  %v457_v13 = vld [vmem:[%s818_s0 + $0x14] sm:$0x1]   ;;  %v459_v15 = vld [vmem:[%s818_s0 + $0x6] sm:$0x1]   ;;  %v286_v17 = vsel %vm5_vm0, %v462_v12, %v461_v11  ;;  %v467_v20 = vld [vmem:[%s818_s0 + $0xa] sm:$0x1]  }
  0x15   :  { %v458_v14 = vld [vmem:[%s818_s0 + $0x33] sm:$0x2]   ;;  %v460_v16 = vld [vmem:[%s818_s0 + $0x25] sm:$0x2]   ;;  %s529_s15 = smov 40   ;;  %s531_s27 = smov 32  }
  0x16   :  { %v264_v18 = vsel %vm5_vm0, %v458_v14, %v457_v13  ;;  %v275_v19 = vsel %vm5_vm0, %v460_v16, %v459_v15  ;;  %v468_v21 = vld [vmem:[%s818_s0 + $0x29] sm:$0x2]   ;;  %v463_v22 = vld [vmem:[%s818_s0 + $0x18] sm:$0x1]   ;;  %v465_v24 = vld [vmem:[%s818_s0 + $0x1] sm:$0x1]  }
  0x17   :  { %157 = vrot.lane.b32.xlu1 %v156_v45, %s515_s9  ;;  %146 = vrot.lane.b32.xlu0 %v145_v47, %s517_s13  ;;  %v464_v23 = vld [vmem:[%s818_s0 + $0x37] sm:$0x2]   ;;  %v466_v25 = vld [vmem:[%s818_s0 + $0x20] sm:$0x2]   ;;  %v318_v26 = vsel %vm5_vm0, %v468_v21, %v467_v20  ;;  %s532_s30 = smov 28   ;;  %s534_s13 = smov 20  }
  0x18   :  { %v297_v27 = vsel %vm5_vm0, %v464_v23, %v463_v22  ;;  %v308_v28 = vsel %vm5_vm0, %v466_v25, %v465_v24  ;;  %v473_v29 = vld [vmem:[%s818_s0 + $0xe] sm:$0x1]   ;;  %v469_v31 = vld [vmem:[%s818_s0 + $0x13] sm:$0x1]   ;;  %v471_v33 = vld [vmem:[%s818_s0 + $0x5] sm:$0x1]  }
  0x19   :  { %v474_v30 = vld [vmem:[%s818_s0 + $0x2d] sm:$0x2]   ;;  %v470_v32 = vld [vmem:[%s818_s0 + $0x32] sm:$0x2]   ;;  %v472_v34 = vld [vmem:[%s818_s0 + $0x24] sm:$0x2]  }
  0x1a   :  { %v351_v35 = vsel %vm5_vm0, %v474_v30, %v473_v29  ;;  %v329_v36 = vsel %vm5_vm0, %v470_v32, %v469_v31  ;;  %v340_v37 = vsel %vm5_vm0, %v472_v34, %v471_v33  ;;  %v475_v38 = vld [vmem:[%s818_s0 + $0x17] sm:$0x1]   ;;  %s536_s19 = smov 4   ;;  %vm7_vm7 = vcmask 228352   ;;  %v2_v41 = vld [vmem:[%s818_s0] sm:$0x1]  }
  0x1b   :  { %168 = vrot.lane.b32.xlu2 %v167_v55, %s519_s25  ;;  %s524_s25 = smov 52   ;;  %v476_v39 = vld [vmem:[%s818_s0 + $0x36] sm:$0x2]   ;;  %v410_v42 = vld [vmem:[%s818_s0 + $0x1f] sm:$0x2]   ;;  %vm72_vm8 = vcmask 1048480  }
  0x1c   :  { %v362_v40 = vsel %vm5_vm0, %v476_v39, %v475_v38  ;;  %v6_v43 = vsel %vm5_vm0, %v410_v42, %v2_v41  ;;  %vm28_vm9 = vcmask 1048544   ;;  %vm115_vm10 = vcmask 1048416  }
  0x1d   :  { %8 = vst.msk [vmem:[#allocation0] sm:$0x3] %vm7_vm7, %v6_v43   ;;  %vm170_vm11 = vcmask 949952   ;;  %vm94_vm12 = vcmask 1048448   ;;  %vm50_vm13 = vcmask 1048512   ;;  %vm137_vm14 = vcmask 1048384  }
  0x1e   :  { %vm202_vm15 = vcmask 851552   ;;  %vm159_vm0 = vcmask 982752   ;;  %vm300_vm7 = vcmask 490752  }
  0x1f   :  { %189 = vrot.lane.b32.xlu1 %v188_v54, %s518_s24  ;;  %179 = vrot.lane.b32.xlu0 %v178_v56, %s520_s28 }
  0x23   :  { %200 = vrot.lane.b32.xlu2 %v199_v0, %s522_s11  ;;  %s527_s11 = smov 36  }
  0x27   :  { %222 = vrot.lane.b32.xlu1 %v221_v63, %s521_s10  ;;  %211 = vrot.lane.b32.xlu0 %v210_v1, %s523_s14  ;;  %s535_s14 = smov 12  }
  0x2b   :  { %233 = vrot.lane.b32.xlu2 %v232_v9, %s525_s26  ;;  %s530_s26 = smov 24  }
  0x2f   :  { %254 = vrot.lane.b32.xlu1 %v253_v8, %s524_s25  ;;  %244 = vrot.lane.b32.xlu0 %v243_v10, %s526_s29 }
  0x33   :  { %265 = vrot.lane.b32.xlu2 %v264_v18, %s528_s12  ;;  %s533_s12 = smov 8  }
  0x37   :  { %287 = vrot.lane.b32.xlu1 %v286_v17, %s527_s11  ;;  %276 = vrot.lane.b32.xlu0 %v275_v19, %s529_s15 }
  0x3b   :  { %298 = vrot.lane.b32.xlu2 %v297_v27, %s531_s27 }
  0x3f   :  { %319 = vrot.lane.b32.xlu1 %v318_v26, %s530_s26  ;;  %309 = vrot.lane.b32.xlu0 %v308_v28, %s532_s30 }
  0x43   :  { %330 = vrot.lane.b32.xlu2 %v329_v36, %s534_s13 }
  0x47   :  { %352 = vrot.lane.b32.xlu1 %v351_v35, %s533_s12  ;;  %341 = vrot.lane.b32.xlu0 %v340_v37, %s535_s14 }
  0x4b   :  { %363 = vrot.lane.b32.xlu2 %v362_v40, %s536_s19 }
  0x65   :  { %v111_v44 = vpop.permute.xlu2 %110  }
  0x6d   :  { %v133_v45 = vpop.permute.xlu2 %132  }
  0x75   :  { %v169_v47 = vpop.permute.xlu2 %168  }
  0x79   :  { %v68_v46 = vpop.permute.xlu1 %67   ;;  %v24_v48 = vpop.permute.xlu0 %23  }
  0x7a   :  { %71 = vst.msk [vmem:[#allocation0 + $0x30] sm:$0x3] %vm69_vm3, %v68_v46   ;;  %vm191_vm3 = vcmask 884352  }
  0x7b   :  { %74 = vst.msk [vmem:[#allocation0 + $0x28] sm:$0x3] %vm72_vm8, %v68_v46   ;;  %vm213_vm8 = vcmask 785952  }
  0x7c   :  { %27 = vst.msk [vmem:[#allocation0 + $0x10] sm:$0x3] %vm25_vm6, %v24_v48   ;;  %vm224_vm6 = vcmask 753152  }
  0x7d   :  { %30 = vst.msk [vmem:[#allocation0 + $0x8] sm:$0x3] %vm28_vm9, %v24_v48   ;;  %v201_v51 = vpop.permute.xlu2 %200   ;;  %vm256_vm9 = vcmask 654752  }
  0x7e   :  { %117 = vst.msk [vmem:[#allocation0 + $0x10] sm:$0x3] %vm115_vm10, %v111_v44   ;;  %vm332_vm10 = vcmask 392352  }
  0x7f   :  { %136 = vst.msk [vmem:[#allocation0 + $0x28] sm:$0x3] %vm21_vm2, %v133_v45   ;;  %vm148_vm2 = vcmask 1015552  }
  0x80   :  { %172 = vst.msk [vmem:[#allocation0 + $0x28] sm:$0x3] %vm170_vm11, %v169_v47   ;;  %vm246_vm11 = vcmask 687552  }
  0x81   :  { %v405_v49 = vld [vmem:[#allocation0 + $0x30] sm:$0x3]  ;;  %v90_v50 = vpop.permute.xlu1 %89   ;;  %v46_v52 = vpop.permute.xlu0 %45  }
  0x82   :  { %482 = vst [vmem:[%s819_s1 + $0xc] sm:$0x3] %v405_v49 }
  0x83   :  { %93 = vst.msk [vmem:[#allocation0 + $0x8] sm:$0x3] %vm65_vm1, %v90_v50   ;;  %vm235_vm1 = vcmask 720352  }
  0x84   :  { %95 = vst.msk [vmem:[#allocation0] sm:$0x3] %vm94_vm12, %v90_v50   ;;  %vm289_vm12 = vcmask 523552  }
  0x85   :  { %49 = vst.msk [vmem:[#allocation0 + $0x20] sm:$0x3] %vm47_vm5, %v46_v52   ;;  %v234_v54 = vpop.permute.xlu2 %233   ;;  %vm181_vm5 = vcmask 917152  }
  0x86   :  { %52 = vst.msk [vmem:[#allocation0 + $0x18] sm:$0x3] %vm50_vm13, %v46_v52   ;;  %vm278_vm13 = vcmask 556352  }
  0x87   :  { %114 = vst.msk [vmem:[#allocation0 + $0x18] sm:$0x3] %vm43_vm4, %v111_v44   ;;  %vm267_vm4 = vcmask 621952  }
  0x88   :  { %139 = vst.msk [vmem:[#allocation0 + $0x20] sm:$0x3] %vm137_vm14, %v133_v45   ;;  %vm365_vm14 = vcmask 261152  }
  0x89   :  { %v158_v53 = vpop.permute.xlu1 %157   ;;  %204 = vst.msk [vmem:[#allocation0 + $0x20] sm:$0x3] %vm202_vm15, %v201_v51   ;;  %v147_v55 = vpop.permute.xlu0 %146   ;;  %vm321_vm15 = vcmask 425152  }
  0x8a   :  { %161 = vst.msk [vmem:[#allocation0 + $0x18] sm:$0x3] %vm159_vm0, %v158_v53   ;;  %vm311_vm0 = vcmask 457952  }
  0x8b   :  { %237 = vst.msk [vmem:[#allocation0 + $0x28] sm:$0x3] %vm235_vm1, %v234_v54   ;;  %vm354_vm1 = vcmask 293952  }
  0x8c   :  { %150 = vst.msk [vmem:[#allocation0 + $0x8] sm:$0x3] %vm148_vm2, %v147_v55   ;;  %vm343_vm2 = vcmask 326752  }
  0x8d   :  { %v266_v57 = vpop.permute.xlu2 %265  }
  0x8e   :  { %269 = vst.msk [vmem:[#allocation0 + $0x20] sm:$0x3] %vm267_vm4, %v266_v57  }
  0x91   :  { %v190_v56 = vpop.permute.xlu1 %189   ;;  %v180_v58 = vpop.permute.xlu0 %179  }
  0x92   :  { %193 = vst.msk [vmem:[#allocation0 + $0x10] sm:$0x3] %vm191_vm3, %v190_v56  }
  0x93   :  { %182 = vst.msk [vmem:[#allocation0] sm:$0x3] %vm181_vm5, %v180_v58  }
  0x95   :  { %v299_v60 = vpop.permute.xlu2 %298  }
  0x96   :  { %302 = vst.msk [vmem:[#allocation0 + $0x28] sm:$0x3] %vm300_vm7, %v299_v60  }
  0x99   :  { %v223_v59 = vpop.permute.xlu1 %222   ;;  %v212_v61 = vpop.permute.xlu0 %211  }
  0x9a   :  { %226 = vst.msk [vmem:[#allocation0 + $0x18] sm:$0x3] %vm224_vm6, %v223_v59  }
  0x9b   :  { %215 = vst.msk [vmem:[#allocation0 + $0x8] sm:$0x3] %vm213_vm8, %v212_v61  }
  0x9d   :  { %v331_v63 = vpop.permute.xlu2 %330  }
  0x9e   :  { %334 = vst.msk [vmem:[#allocation0 + $0x20] sm:$0x3] %vm332_vm10, %v331_v63  }
  0xa1   :  { %v255_v62 = vpop.permute.xlu1 %254   ;;  %v245_v0 = vpop.permute.xlu0 %244  }
  0xa2   :  { %258 = vst.msk [vmem:[#allocation0 + $0x10] sm:$0x3] %vm256_vm9, %v255_v62  }
  0xa3   :  { %247 = vst.msk [vmem:[#allocation0] sm:$0x3] %vm246_vm11, %v245_v0  }
  0xa5   :  { %v364_v2 = vpop.permute.xlu2 %363   ;;  %v393_v3 = vld [vmem:[#allocation0 + $0x20] sm:$0x3] }
  0xa6   :  { %480 = vst [vmem:[%s819_s1 + $0x8] sm:$0x3] %v393_v3 }
  0xa7   :  { %367 = vst.msk [vmem:[#allocation0 + $0x28] sm:$0x3] %vm365_vm14, %v364_v2  }
  0xa9   :  { %v288_v1 = vpop.permute.xlu1 %287   ;;  %v277_v4 = vpop.permute.xlu0 %276  }
  0xaa   :  { %291 = vst.msk [vmem:[#allocation0 + $0x18] sm:$0x3] %vm289_vm12, %v288_v1  }
  0xab   :  { %280 = vst.msk [vmem:[#allocation0 + $0x8] sm:$0x3] %vm278_vm13, %v277_v4  }
  0xae   :  { %v399_v7 = vld [vmem:[#allocation0 + $0x28] sm:$0x3] }
  0xaf   :  { %481 = vst [vmem:[%s819_s1 + $0xa] sm:$0x3] %v399_v7 }
  0xb1   :  { %v320_v5 = vpop.permute.xlu1 %319   ;;  %v310_v6 = vpop.permute.xlu0 %309  }
  0xb2   :  { %323 = vst.msk [vmem:[#allocation0 + $0x10] sm:$0x3] %vm321_vm15, %v320_v5  }
  0xb3   :  { %312 = vst.msk [vmem:[#allocation0] sm:$0x3] %vm311_vm0, %v310_v6  }
  0xb9   :  { %v381_v8 = vld [vmem:[#allocation0 + $0x10] sm:$0x3]  ;;  %v353_v9 = vpop.permute.xlu1 %352   ;;  %v342_v11 = vpop.permute.xlu0 %341  }
  0xba   :  { %478 = vst [vmem:[%s819_s1 + $0x4] sm:$0x3] %v381_v8  ;;  %v370_v10 = vld [vmem:[#allocation0] sm:$0x3] }
  0xbb   :  { %356 = vst.msk [vmem:[#allocation0 + $0x18] sm:$0x3] %vm354_vm1, %v353_v9  }
  0xbc   :  { %373 = vst [vmem:[%s819_s1] sm:$0x3] %v370_v10 }
  0xbd   :  { %345 = vst.msk [vmem:[#allocation0 + $0x8] sm:$0x3] %vm343_vm2, %v342_v11  }
  0xc2   :  { %v387_v12 = vld [vmem:[#allocation0 + $0x18] sm:$0x3] }
  0xc3   :  { %479 = vst [vmem:[%s819_s1 + $0x6] sm:$0x3] %v387_v12 }
  0xc4   :  { %v375_v13 = vld [vmem:[#allocation0 + $0x8] sm:$0x3] }
  0xc5   :  { %477 = vst [vmem:[%s819_s1 + $0x2] sm:$0x3] %v375_v13 }

// kernel: _lambda_.1
= control target key start
LH: loop header
LB: loop body
LE: loop exit
PB: predicated region body
PF: predicated region fallthrough
CT: control target
= control target key end

     0   :  { %vm209_vm0 = vcmask 1043456   ;;  %vm112_vm1 = vcmask 687104   ;;  %vm2404_vm2 = vcmask 1046528   ;;  %vm2621_vm3 = vcmask 1045504   ;;  %s8588_s1 = inlined_call_operand.vmem [shape: f32[84,512], index: 1, kind: input, shape index: {}]   ;;  %s8589_s0 = inlined_call_operand.vmem [shape: f32[8,32,84], index: 0, kind: input, shape index: {}]   ;;  %s8590_s3 = inlined_call_operand.vmem [shape: f32[256,1152], index: 3, kind: input, shape index: {}]   ;;  %s8591_s2 = inlined_call_operand.vmem [shape: f32[1,512], index: 2, kind: input, shape index: {}]   ;;  %s8592_s4 = inlined_call_operand.vmem [shape: f32[1,352], index: 4, kind: input, shape index: {}]   ;;  %s8593_s5 = inlined_call_operand.vmem [shape: f32[5,320,128], index: 5, kind: input, shape index: {}]   ;;  %s8594_s6 = inlined_call_operand.vmem [shape: f32[1,128], index: 6, kind: input, shape index: {}]   ;;  %s8595_s7 = inlined_call_operand.vmem [shape: f32[8,128], index: 7, kind: output, shape index: {}]  }
   0x1   :  { %v98_v0 = vld [vmem:[%s8588_s1 + $0x140] sm:$0xf]  ;;  %v99_v1 = vld [vmem:[%s8588_s1 + $0x148] sm:$0xf]  ;;  %v100_v2 = vld [vmem:[%s8588_s1 + $0x150] sm:$0xf] }
   0x2   :  { %4162 = vmatpush.msk.msra.mxu0 %vm209_vm0, %v98_v0  ;;  %4195 = vmatpush.msk.msra.mxu1 %vm209_vm0, %v99_v1  ;;  %v101_v3 = vld [vmem:[%s8588_s1 + $0x158] sm:$0xf]  ;;  %v94_v4 = vld [vmem:[%s8588_s1 + $0x120] sm:$0xff]  ;;  %v95_v5 = vld [vmem:[%s8588_s1 + $0x128] sm:$0xff]  ;;  %vm3062_vm4 = vcmask 785408   ;;  %vm3234_vm5 = vcmask 1041409  }
   0x3   :  { %4228 = vmatpush.msk.msra.mxu2 %vm209_vm0, %v100_v2  ;;  %4261 = vmatpush.msk.msra.mxu3 %vm209_vm0, %v101_v3  ;;  %v96_v6 = vld [vmem:[%s8588_s1 + $0x130] sm:$0xff]  ;;  %v97_v7 = vld [vmem:[%s8588_s1 + $0x138] sm:$0xff]  ;;  %v90_v8 = vld [vmem:[%s8588_s1 + $0x100] sm:$0xff]  ;;  %vm3236_vm6 = vcmask 1042434   ;;  %vm3239_vm7 = vcmask 1043459   ;;  %vm3242_vm8 = vcmask 1044484  }
   0x4   :  { %228 = vmatpush.msra.mxu0 %v94_v4  ;;  %341 = vmatpush.msra.mxu1 %v95_v5  ;;  %v91_v9 = vld [vmem:[%s8588_s1 + $0x108] sm:$0xff]  ;;  %v92_v10 = vld [vmem:[%s8588_s1 + $0x110] sm:$0xff]  ;;  %v93_v11 = vld [vmem:[%s8588_s1 + $0x118] sm:$0xff]  ;;  %vm3245_vm9 = vcmask 1045509   ;;  %vm3248_vm10 = vcmask 1046534   ;;  %vm3251_vm11 = vcmask 1047559  }
   0x5   :  { %454 = vmatpush.msra.mxu2 %v96_v6  ;;  %567 = vmatpush.msra.mxu3 %v97_v7  ;;  %v86_v12 = vld [vmem:[%s8588_s1 + $0xe0] sm:$0xff]  ;;  %v87_v13 = vld [vmem:[%s8588_s1 + $0xe8] sm:$0xff]  ;;  %v88_v14 = vld [vmem:[%s8588_s1 + $0xf0] sm:$0xff]  ;;  %vm3283_vm12 = vcmask 523264  }
   0x6   :  { %229 = vmatpush.msra.mxu0 %v90_v8  ;;  %342 = vmatpush.msra.mxu1 %v91_v9  ;;  %v89_v15 = vld [vmem:[%s8588_s1 + $0xf8] sm:$0xff]  ;;  %v82_v16 = vld [vmem:[%s8588_s1 + $0xc0] sm:$0xff]  ;;  %v83_v17 = vld [vmem:[%s8588_s1 + $0xc8] sm:$0xff] }
   0x7   :  { %455 = vmatpush.msra.mxu2 %v92_v10  ;;  %568 = vmatpush.msra.mxu3 %v93_v11  ;;  %v84_v18 = vld [vmem:[%s8588_s1 + $0xd0] sm:$0xff]  ;;  %v85_v19 = vld [vmem:[%s8588_s1 + $0xd8] sm:$0xff]  ;;  %v78_v20 = vld [vmem:[%s8588_s1 + $0xa0] sm:$0xff] }
   0x8   :  { %230 = vmatpush.msra.mxu0 %v86_v12  ;;  %343 = vmatpush.msra.mxu1 %v87_v13  ;;  %v79_v21 = vld [vmem:[%s8588_s1 + $0xa8] sm:$0xff]  ;;  %v80_v22 = vld [vmem:[%s8588_s1 + $0xb0] sm:$0xff]  ;;  %v81_v23 = vld [vmem:[%s8588_s1 + $0xb8] sm:$0xff] }
   0x9   :  { %456 = vmatpush.msra.mxu2 %v88_v14  ;;  %569 = vmatpush.msra.mxu3 %v89_v15  ;;  %v74_v24 = vld [vmem:[%s8588_s1 + $0x80] sm:$0xff]  ;;  %v75_v25 = vld [vmem:[%s8588_s1 + $0x88] sm:$0xff]  ;;  %v76_v26 = vld [vmem:[%s8588_s1 + $0x90] sm:$0xff] }
   0xa   :  { %231 = vmatpush.msra.mxu0 %v82_v16  ;;  %344 = vmatpush.msra.mxu1 %v83_v17  ;;  %v77_v27 = vld [vmem:[%s8588_s1 + $0x98] sm:$0xff]  ;;  %v70_v28 = vld [vmem:[%s8588_s1 + $0x60] sm:$0xff]  ;;  %v71_v29 = vld [vmem:[%s8588_s1 + $0x68] sm:$0xff] }
   0xb   :  { %457 = vmatpush.msra.mxu2 %v84_v18  ;;  %570 = vmatpush.msra.mxu3 %v85_v19  ;;  %v72_v30 = vld [vmem:[%s8588_s1 + $0x70] sm:$0xff]  ;;  %v73_v31 = vld [vmem:[%s8588_s1 + $0x78] sm:$0xff]  ;;  %v66_v32 = vld [vmem:[%s8588_s1 + $0x40] sm:$0xff] }
   0xc   :  { %232 = vmatpush.msra.mxu0 %v78_v20  ;;  %345 = vmatpush.msra.mxu1 %v79_v21  ;;  %v67_v33 = vld [vmem:[%s8588_s1 + $0x48] sm:$0xff]  ;;  %v68_v34 = vld [vmem:[%s8588_s1 + $0x50] sm:$0xff]  ;;  %v69_v35 = vld [vmem:[%s8588_s1 + $0x58] sm:$0xff] }
   0xd   :  { %458 = vmatpush.msra.mxu2 %v80_v22  ;;  %571 = vmatpush.msra.mxu3 %v81_v23  ;;  %v62_v36 = vld [vmem:[%s8588_s1 + $0x20] sm:$0xff]  ;;  %v63_v37 = vld [vmem:[%s8588_s1 + $0x28] sm:$0xff]  ;;  %v64_v38 = vld [vmem:[%s8588_s1 + $0x30] sm:$0xff] }
   0xe   :  { %233 = vmatpush.msra.mxu0 %v74_v24  ;;  %346 = vmatpush.msra.mxu1 %v75_v25  ;;  %v65_v39 = vld [vmem:[%s8588_s1 + $0x38] sm:$0xff]  ;;  %v58_v40 = vld [vmem:[%s8588_s1] sm:$0xff]  ;;  %v59_v41 = vld [vmem:[%s8588_s1 + $0x8] sm:$0xff] }
   0xf   :  { %459 = vmatpush.msra.mxu2 %v76_v26  ;;  %572 = vmatpush.msra.mxu3 %v77_v27  ;;  %v60_v42 = vld [vmem:[%s8588_s1 + $0x10] sm:$0xff]  ;;  %v61_v43 = vld [vmem:[%s8588_s1 + $0x18] sm:$0xff]  ;;  %v26_v44 = vld [vmem:[%s8589_s0] sm:$0xff] }
  0x10   :  { %234 = vmatpush.msra.mxu0 %v70_v28  ;;  %347 = vmatpush.msra.mxu1 %v71_v29  ;;  %v1033_v45 = vld [vmem:[%s8590_s3 + $0x438] sm:$0xff]  ;;  %v27_v47 = vld [vmem:[%s8589_s0 + $0x8] sm:$0xff]  ;;  %v28_v48 = vld [vmem:[%s8589_s0 + $0x10] sm:$0xff] }
  0x11   :  { %460 = vmatpush.msra.mxu2 %v72_v30  ;;  %573 = vmatpush.msra.mxu3 %v73_v31  ;;  %v1177_v46 = vld [vmem:[%s8590_s3 + $0x8b8] sm:$0xff]  ;;  %v1024_v49 = vld [vmem:[%s8590_s3 + $0x3f0] sm:$0xff]  ;;  %v30_v52 = vld [vmem:[%s8589_s0 + $0x20] sm:$0xff] }
  0x12   :  { %235 = vmatpush.msra.mxu0 %v66_v32  ;;  %348 = vmatpush.msra.mxu1 %v67_v33  ;;  %v1168_v50 = vld [vmem:[%s8590_s3 + $0x870] sm:$0xff]  ;;  %v29_v51 = vld [vmem:[%s8589_s0 + $0x18] sm:$0xff]  ;;  %v1015_v53 = vld [vmem:[%s8590_s3 + $0x3a8] sm:$0xff] }
  0x13   :  { %461 = vmatpush.msra.mxu2 %v68_v34  ;;  %574 = vmatpush.msra.mxu3 %v69_v35  ;;  %v1159_v54 = vld [vmem:[%s8590_s3 + $0x828] sm:$0xff]  ;;  %v32_v56 = vld [vmem:[%s8589_s0 + $0x30] sm:$0xff]  ;;  %v1006_v57 = vld [vmem:[%s8590_s3 + $0x360] sm:$0xff] }
  0x14   :  { %236 = vmatpush.msra.mxu0 %v62_v36  ;;  %349 = vmatpush.msra.mxu1 %v63_v37  ;;  %v31_v55 = vld [vmem:[%s8589_s0 + $0x28] sm:$0xff]  ;;  %v1150_v58 = vld [vmem:[%s8590_s3 + $0x7e0] sm:$0xff]  ;;  %v33_v59 = vld [vmem:[%s8589_s0 + $0x38] sm:$0xff] }
  0x15   :  { %462 = vmatpush.msra.mxu2 %v64_v38  ;;  %575 = vmatpush.msra.mxu3 %v65_v39  ;;  %v34_v60 = vld [vmem:[%s8589_s0 + $0x40] sm:$0xff]  ;;  %v997_v61 = vld [vmem:[%s8590_s3 + $0x318] sm:$0xff]  ;;  %v35_v63 = vld [vmem:[%s8589_s0 + $0x48] sm:$0xff] }
  0x16   :  { %237 = vmatpush.msra.mxu0 %v58_v40  ;;  %350 = vmatpush.msra.mxu1 %v59_v41  ;;  %v1141_v62 = vld [vmem:[%s8590_s3 + $0x798] sm:$0xff]  ;;  %v36_v0 = vld [vmem:[%s8589_s0 + $0x50] sm:$0xff]  ;;  %v38_v4 = vld [vmem:[%s8589_s0 + $0x60] sm:$0xff] }
  0x17   :  { %463 = vmatpush.msra.mxu2 %v60_v42  ;;  %576 = vmatpush.msra.mxu3 %v61_v43  ;;  %v988_v1 = vld [vmem:[%s8590_s3 + $0x2d0] sm:$0xff]  ;;  %v37_v3 = vld [vmem:[%s8589_s0 + $0x58] sm:$0xff]  ;;  %v979_v5 = vld [vmem:[%s8590_s3 + $0x288] sm:$0xff] }
  0x18   :  { %4163 = vmatmul.msk.f32.vlgmr.msra.gmra.mxu0 %vm112_vm1, %v26_v44  ;;  %4196 = vmatmul.msk.f32.vlgmr.msra.gmra.mxu1 %vm112_vm1, %v26_v44  ;;  %v1132_v2 = vld [vmem:[%s8590_s3 + $0x750] sm:$0xff]  ;;  %v1123_v6 = vld [vmem:[%s8590_s3 + $0x708] sm:$0xff]  ;;  %v1034_v8 = vld [vmem:[%s8590_s3 + $0x440] sm:$0xff] }
  0x19   :  { %4229 = vmatmul.msk.f32.vlgmr.msra.gmra.mxu2 %vm112_vm1, %v26_v44  ;;  %4262 = vmatmul.msk.f32.vlgmr.msra.gmra.mxu3 %vm112_vm1, %v26_v44  ;;  %v39_v7 = vld [vmem:[%s8589_s0 + $0x68] sm:$0xff]  ;;  %v1178_v9 = vld [vmem:[%s8590_s3 + $0x8c0] sm:$0xff]  ;;  %v40_v10 = vld [vmem:[%s8589_s0 + $0x70] sm:$0xff] }
  0x1a   :  { %1186 = vmatpush.msrb.mxu0 %v1033_v45  ;;  %1251 = vmatpush.msrb.mxu1 %v1177_v46  ;;  %v970_v11 = vld [vmem:[%s8590_s3 + $0x240] sm:$0xff]  ;;  %v41_v13 = vld [vmem:[%s8589_s0 + $0x78] sm:$0xff]  ;;  %v43_v25 = vld [vmem:[%s8589_s0 + $0x88] sm:$0xff] }
  0x1b   :  { %1316 = vmatpush.msrb.mxu2 %v1034_v8  ;;  %1381 = vmatpush.msrb.mxu3 %v1178_v9  ;;  %v1114_v12 = vld [vmem:[%s8590_s3 + $0x6c0] sm:$0xff]  ;;  %v1025_v14 = vld [vmem:[%s8590_s3 + $0x3f8] sm:$0xff]  ;;  %v1016_v26 = vld [vmem:[%s8590_s3 + $0x3b0] sm:$0xff] }
  0x1c   :  { %1187 = vmatpush.msrb.mxu0 %v1024_v49  ;;  %1252 = vmatpush.msrb.mxu1 %v1168_v50  ;;  %v1169_v15 = vld [vmem:[%s8590_s3 + $0x878] sm:$0xff]  ;;  %v42_v18 = vld [vmem:[%s8589_s0 + $0x80] sm:$0xff]  ;;  %v1160_v27 = vld [vmem:[%s8590_s3 + $0x830] sm:$0xff] }
  0x1d   :  { %1317 = vmatpush.msrb.mxu2 %v1025_v14  ;;  %1382 = vmatpush.msrb.mxu3 %v1169_v15  ;;  %v961_v19 = vld [vmem:[%s8590_s3 + $0x1f8] sm:$0xff]  ;;  %v4923_v28 = vld [vmem:[%s8591_s2] sm:$0xf]  ;;  %v44_v33 = vld [vmem:[%s8589_s0 + $0x90] sm:$0xff] }
  0x1e   :  { %1188 = vmatpush.msrb.mxu0 %v1015_v53  ;;  %1253 = vmatpush.msrb.mxu1 %v1159_v54  ;;  %v1105_v20 = vld [vmem:[%s8590_s3 + $0x678] sm:$0xff]  ;;  %v4933_v34 = vperm.slane %v4923_v28, 2  ;;  %v4936_v35 = vperm.slane %v4923_v28, 3  ;;  %v952_v36 = vld [vmem:[%s8590_s3 + $0x1b0] sm:$0xff]  ;;  %v1142_v14 = vld [vmem:[%s8590_s3 + $0x7a0] sm:$0xff] }
  0x1f   :  { %1318 = vmatpush.msrb.mxu2 %v1016_v26  ;;  %1383 = vmatpush.msrb.mxu3 %v1160_v27  ;;  %v1096_v37 = vld [vmem:[%s8590_s3 + $0x630] sm:$0xff]  ;;  %v45_v46 = vld [vmem:[%s8589_s0 + $0x98] sm:$0xff] }
  0x20   :  { %4164 = vmatmul.msk.f32.gmra.mxu0 %vm112_vm1, %v27_v47  ;;  %4197 = vmatmul.msk.f32.gmra.mxu1 %vm112_vm1, %v27_v47 }
  0x21   :  { %4230 = vmatmul.msk.f32.gmra.mxu2 %vm112_vm1, %v27_v47  ;;  %4263 = vmatmul.msk.f32.gmra.mxu3 %vm112_vm1, %v27_v47 }
  0x22   :  { %1189 = vmatpush.msrb.mxu0 %v1006_v57  ;;  %1254 = vmatpush.msrb.mxu1 %v1150_v58 }
  0x24   :  { %1190 = vmatpush.msrb.mxu0 %v997_v61  ;;  %1255 = vmatpush.msrb.mxu1 %v1141_v62 }
  0x26   :  { %1191 = vmatpush.msrb.mxu0 %v988_v1  ;;  %1256 = vmatpush.msrb.mxu1 %v1132_v2 }
  0x28   :  { %4165 = vmatmul.msk.f32.gmra.mxu0 %vm112_vm1, %v28_v48  ;;  %4198 = vmatmul.msk.f32.gmra.mxu1 %vm112_vm1, %v28_v48 }
  0x29   :  { %4231 = vmatmul.msk.f32.gmra.mxu2 %vm112_vm1, %v28_v48  ;;  %4264 = vmatmul.msk.f32.gmra.mxu3 %vm112_vm1, %v28_v48 }
  0x2a   :  { %1192 = vmatpush.msrb.mxu0 %v979_v5  ;;  %1257 = vmatpush.msrb.mxu1 %v1123_v6  ;;  %v943_v6 = vld [vmem:[%s8590_s3 + $0x168] sm:$0xff] }
  0x2c   :  { %1193 = vmatpush.msrb.mxu0 %v970_v11  ;;  %1258 = vmatpush.msrb.mxu1 %v1114_v12  ;;  %v47_v12 = vld [vmem:[%s8589_s0 + $0xa8] sm:$0xff] }
  0x2e   :  { %1194 = vmatpush.msrb.mxu0 %v961_v19  ;;  %1259 = vmatpush.msrb.mxu1 %v1105_v20 }
  0x30   :  { %4166 = vmatmul.msk.f32.gmra.mxu0 %vm112_vm1, %v29_v51  ;;  %4199 = vmatmul.msk.f32.gmra.mxu1 %vm112_vm1, %v29_v51 }
  0x31   :  { %4232 = vmatmul.msk.f32.gmra.mxu2 %vm112_vm1, %v29_v51  ;;  %4265 = vmatmul.msk.f32.gmra.mxu3 %vm112_vm1, %v29_v51 }
  0x32   :  { %1195 = vmatpush.msrb.mxu0 %v952_v36  ;;  %1260 = vmatpush.msrb.mxu1 %v1096_v37 }
  0x34   :  { %1196 = vmatpush.msrb.mxu0 %v943_v6 }
  0x38   :  { %4167 = vmatmul.msk.f32.gmra.mxu0 %vm112_vm1, %v30_v52  ;;  %4200 = vmatmul.msk.f32.gmra.mxu1 %vm112_vm1, %v30_v52 }
  0x39   :  { %4233 = vmatmul.msk.f32.gmra.mxu2 %vm112_vm1, %v30_v52  ;;  %4266 = vmatmul.msk.f32.gmra.mxu3 %vm112_vm1, %v30_v52 }
  0x40   :  { %4168 = vmatmul.msk.f32.gmra.mxu0 %vm112_vm1, %v31_v55  ;;  %4201 = vmatmul.msk.f32.gmra.mxu1 %vm112_vm1, %v31_v55 }
  0x41   :  { %4234 = vmatmul.msk.f32.gmra.mxu2 %vm112_vm1, %v31_v55  ;;  %4267 = vmatmul.msk.f32.gmra.mxu3 %vm112_vm1, %v31_v55  ;;  %v1007_v55 = vld [vmem:[%s8590_s3 + $0x368] sm:$0xff] }
  0x42   :  { %1319 = vmatpush.msrb.mxu2 %v1007_v55 }
  0x48   :  { %4169 = vmatmul.msk.f32.gmra.mxu0 %vm112_vm1, %v32_v56  ;;  %4202 = vmatmul.msk.f32.gmra.mxu1 %vm112_vm1, %v32_v56 }
  0x49   :  { %4235 = vmatmul.msk.f32.gmra.mxu2 %vm112_vm1, %v32_v56  ;;  %4268 = vmatmul.msk.f32.gmra.mxu3 %vm112_vm1, %v32_v56  ;;  %v1151_v56 = vld [vmem:[%s8590_s3 + $0x7e8] sm:$0xff] }
  0x4a   :  { %1384 = vmatpush.msrb.mxu3 %v1151_v56 }
  0x4c   :  { %1385 = vmatpush.msrb.mxu3 %v1142_v14 }
  0x50   :  { %4170 = vmatmul.msk.f32.gmra.mxu0 %vm112_vm1, %v33_v59  ;;  %4203 = vmatmul.msk.f32.gmra.mxu1 %vm112_vm1, %v33_v59 }
  0x51   :  { %4236 = vmatmul.msk.f32.gmra.mxu2 %vm112_vm1, %v33_v59  ;;  %4269 = vmatmul.msk.f32.gmra.mxu3 %vm112_vm1, %v33_v59 }
  0x58   :  { %4171 = vmatmul.msk.f32.gmra.mxu0 %vm112_vm1, %v34_v60  ;;  %4204 = vmatmul.msk.f32.gmra.mxu1 %vm112_vm1, %v34_v60 }
  0x59   :  { %4237 = vmatmul.msk.f32.gmra.mxu2 %vm112_vm1, %v34_v60  ;;  %4270 = vmatmul.msk.f32.gmra.mxu3 %vm112_vm1, %v34_v60 }
  0x60   :  { %4172 = vmatmul.msk.f32.gmra.mxu0 %vm112_vm1, %v35_v63  ;;  %4205 = vmatmul.msk.f32.gmra.mxu1 %vm112_vm1, %v35_v63 }
  0x61   :  { %4238 = vmatmul.msk.f32.gmra.mxu2 %vm112_vm1, %v35_v63  ;;  %4271 = vmatmul.msk.f32.gmra.mxu3 %vm112_vm1, %v35_v63  ;;  %v46_v63 = vld [vmem:[%s8589_s0 + $0xa0] sm:$0xff] }
  0x68   :  { %4173 = vmatmul.msk.f32.gmra.mxu0 %vm112_vm1, %v36_v0  ;;  %4206 = vmatmul.msk.f32.gmra.mxu1 %vm112_vm1, %v36_v0 }
  0x69   :  { %4239 = vmatmul.msk.f32.gmra.mxu2 %vm112_vm1, %v36_v0  ;;  %4272 = vmatmul.msk.f32.gmra.mxu3 %vm112_vm1, %v36_v0 }
  0x70   :  { %4174 = vmatmul.msk.f32.gmra.mxu0 %vm112_vm1, %v37_v3  ;;  %4207 = vmatmul.msk.f32.gmra.mxu1 %vm112_vm1, %v37_v3 }
  0x71   :  { %4240 = vmatmul.msk.f32.gmra.mxu2 %vm112_vm1, %v37_v3  ;;  %4273 = vmatmul.msk.f32.gmra.mxu3 %vm112_vm1, %v37_v3 }
  0x78   :  { %4175 = vmatmul.msk.f32.gmra.mxu0 %vm112_vm1, %v38_v4  ;;  %4208 = vmatmul.msk.f32.gmra.mxu1 %vm112_vm1, %v38_v4 }
  0x79   :  { %4241 = vmatmul.msk.f32.gmra.mxu2 %vm112_vm1, %v38_v4  ;;  %4274 = vmatmul.msk.f32.gmra.mxu3 %vm112_vm1, %v38_v4 }
  0x80   :  { %4176 = vmatmul.msk.f32.gmra.mxu0 %vm112_vm1, %v39_v7  ;;  %4209 = vmatmul.msk.f32.gmra.mxu1 %vm112_vm1, %v39_v7 }
  0x81   :  { %4242 = vmatmul.msk.f32.gmra.mxu2 %vm112_vm1, %v39_v7  ;;  %4275 = vmatmul.msk.f32.gmra.mxu3 %vm112_vm1, %v39_v7  ;;  %v1087_v7 = vld [vmem:[%s8590_s3 + $0x5e8] sm:$0xff] }
  0x82   :  { %1261 = vmatpush.msrb.mxu1 %v1087_v7  ;;  %v925_v7 = vld [vmem:[%s8590_s3 + $0xd8] sm:$0xff] }
  0x88   :  { %4177 = vmatmul.msk.f32.gmra.mxu0 %vm112_vm1, %v40_v10  ;;  %4210 = vmatmul.msk.f32.gmra.mxu1 %vm112_vm1, %v40_v10 }
  0x89   :  { %4243 = vmatmul.msk.f32.gmra.mxu2 %vm112_vm1, %v40_v10  ;;  %4276 = vmatmul.msk.f32.gmra.mxu3 %vm112_vm1, %v40_v10 }
  0x90   :  { %4178 = vmatmul.msk.f32.gmra.mxu0 %vm112_vm1, %v41_v13  ;;  %4211 = vmatmul.msk.f32.gmra.mxu1 %vm112_vm1, %v41_v13 }
  0x91   :  { %4244 = vmatmul.msk.f32.gmra.mxu2 %vm112_vm1, %v41_v13  ;;  %4277 = vmatmul.msk.f32.gmra.mxu3 %vm112_vm1, %v41_v13  ;;  %v998_v13 = vld [vmem:[%s8590_s3 + $0x320] sm:$0xff] }
  0x92   :  { %1320 = vmatpush.msrb.mxu2 %v998_v13 }
  0x95   :  { %v4886_v16 = vpop.f32.mrf.mxu0  ;;  %v4888_v17 = vpop.f32.mrf.mxu1 }
  0x98   :  { %4179 = vmatmul.msk.f32.gmra.mxu0 %vm112_vm1, %v42_v18  ;;  %4212 = vmatmul.msk.f32.gmra.mxu1 %vm112_vm1, %v42_v18 }
  0x99   :  { %4245 = vmatmul.msk.f32.gmra.mxu2 %vm112_vm1, %v42_v18  ;;  %4278 = vmatmul.msk.f32.gmra.mxu3 %vm112_vm1, %v42_v18 }
  0x9c   :  { %v465_v21 = vpop.f32.mrf.mxu2  ;;  %v578_v22 = vpop.f32.mrf.mxu3 }
  0x9d   :  { %v4903_v23 = vpop.f32.mrf.mxu0  ;;  %v4905_v24 = vpop.f32.mrf.mxu1  ;;  %v466_v38 = vadd.f32 %v465_v21, %v4933_v34  ;;  %v579_v39 = vadd.f32 %v578_v22, %v4936_v35  ;;  %v48_v21 = vld [vmem:[%s8589_s0 + $0xb0] sm:$0xff]  ;;  %v934_v22 = vld [vmem:[%s8590_s3 + $0x120] sm:$0xff] }
  0x9e   :  { %1197 = vmatpush.msrb.mxu0 %v934_v22 }
  0x9f   :  { %v676_v47 = vmax.f32 %v466_v38, 0.0  ;;  %v677_v48 = vmax.f32 %v579_v39, 0.0  ;;  %v49_v39 = vld [vmem:[%s8589_s0 + $0xb8] sm:$0xff] }
  0xa0   :  { %4180 = vmatmul.msk.f32.gmra.mxu0 %vm112_vm1, %v43_v25  ;;  %4213 = vmatmul.msk.f32.gmra.mxu1 %vm112_vm1, %v43_v25 }
  0xa1   :  { %4246 = vmatmul.msk.f32.gmra.mxu2 %vm112_vm1, %v43_v25  ;;  %4279 = vmatmul.msk.f32.gmra.mxu3 %vm112_vm1, %v43_v25  ;;  %v1078_v25 = vld [vmem:[%s8590_s3 + $0x5a0] sm:$0xff] }
  0xa2   :  { %1262 = vmatpush.msrb.mxu1 %v1078_v25  ;;  %1198 = vmatpush.msrb.mxu0 %v925_v7  ;;  %v53_v7 = vld [vmem:[%s8589_s0 + $0xd8] sm:$0xff] }
  0xa4   :  { %v468_v29 = vpop.f32.mrf.mxu2  ;;  %v581_v30 = vpop.f32.mrf.mxu3 }
  0xa5   :  { %v4925_v31 = vpop.f32.mrf.mxu0  ;;  %v4927_v32 = vpop.f32.mrf.mxu1  ;;  %v469_v53 = vadd.f32 %v468_v29, %v4933_v34  ;;  %v582_v54 = vadd.f32 %v581_v30, %v4936_v35 }
  0xa7   :  { %v680_v0 = vmax.f32 %v469_v53, 0.0  ;;  %v681_v1 = vmax.f32 %v582_v54, 0.0  ;;  %v1133_v53 = vld [vmem:[%s8590_s3 + $0x758] sm:$0xff] }
  0xa8   :  { %4181 = vmatmul.msk.f32.gmra.mxu0 %vm112_vm1, %v44_v33  ;;  %4214 = vmatmul.msk.f32.gmra.mxu1 %vm112_vm1, %v44_v33 }
  0xa9   :  { %4247 = vmatmul.msk.f32.gmra.mxu2 %vm112_vm1, %v44_v33  ;;  %4280 = vmatmul.msk.f32.gmra.mxu3 %vm112_vm1, %v44_v33 }
  0xaa   :  { %1386 = vmatpush.msrb.mxu3 %v1133_v53 }
  0xac   :  { %v471_v40 = vpop.f32.mrf.mxu2  ;;  %v584_v41 = vpop.f32.mrf.mxu3 }
  0xad   :  { %v472_v42 = vadd.f32 %v471_v40, %v4933_v34  ;;  %v585_v43 = vadd.f32 %v584_v41, %v4936_v35  ;;  %v4952_v44 = vpop.f32.mrf.mxu0  ;;  %v4954_v45 = vpop.f32.mrf.mxu1 }
  0xaf   :  { %v684_v49 = vmax.f32 %v472_v42, 0.0  ;;  %v685_v50 = vmax.f32 %v585_v43, 0.0 }
  0xb0   :  { %4182 = vmatmul.msk.f32.gmra.mxu0 %vm112_vm1, %v45_v46  ;;  %4215 = vmatmul.msk.f32.gmra.mxu1 %vm112_vm1, %v45_v46 }
  0xb1   :  { %v4961_v51 = vmax.f32 %v676_v47, %v684_v49  ;;  %v4963_v52 = vmax.f32 %v677_v48, %v685_v50  ;;  %4248 = vmatmul.msk.f32.gmra.mxu2 %vm112_vm1, %v45_v46  ;;  %4281 = vmatmul.msk.f32.gmra.mxu3 %vm112_vm1, %v45_v46  ;;  %v989_v50 = vld [vmem:[%s8590_s3 + $0x2d8] sm:$0xff] }
  0xb2   :  { %1321 = vmatpush.msrb.mxu2 %v989_v50  ;;  %v1060_v50 = vld [vmem:[%s8590_s3 + $0x510] sm:$0xff] }
  0xb4   :  { %v474_v57 = vpop.f32.mrf.mxu2  ;;  %v587_v58 = vpop.f32.mrf.mxu3 }
  0xb5   :  { %v475_v59 = vadd.f32 %v474_v57, %v4933_v34  ;;  %v588_v60 = vadd.f32 %v587_v58, %v4936_v35  ;;  %v4977_v61 = vpop.f32.mrf.mxu0  ;;  %v4979_v62 = vpop.f32.mrf.mxu1 }
  0xb7   :  { %v688_v2 = vmax.f32 %v475_v59, 0.0  ;;  %v689_v3 = vmax.f32 %v588_v60, 0.0  ;;  %v50_v60 = vld [vmem:[%s8589_s0 + $0xc0] sm:$0xff] }
  0xb8   :  { %4183 = vmatmul.msk.f32.gmra.mxu0 %vm112_vm1, %v46_v63  ;;  %4216 = vmatmul.msk.f32.gmra.mxu1 %vm112_vm1, %v46_v63 }
  0xb9   :  { %v4986_v4 = vmax.f32 %v680_v0, %v688_v2  ;;  %v4988_v5 = vmax.f32 %v681_v1, %v689_v3  ;;  %4249 = vmatmul.msk.f32.gmra.mxu2 %vm112_vm1, %v46_v63  ;;  %4282 = vmatmul.msk.f32.gmra.mxu3 %vm112_vm1, %v46_v63 }
  0xbc   :  { %v477_v8 = vpop.f32.mrf.mxu2  ;;  %v590_v9 = vpop.f32.mrf.mxu3 }
  0xbd   :  { %v4998_v10 = vpop.f32.mrf.mxu0  ;;  %v5000_v11 = vpop.f32.mrf.mxu1  ;;  %v478_v26 = vadd.f32 %v477_v8, %v4933_v34  ;;  %v591_v27 = vadd.f32 %v590_v9, %v4936_v35  ;;  %v1069_v8 = vld [vmem:[%s8590_s3 + $0x558] sm:$0xff] }
  0xbe   :  { %1263 = vmatpush.msrb.mxu1 %v1069_v8 }
  0xbf   :  { %v692_v40 = vmax.f32 %v478_v26, 0.0  ;;  %v693_v41 = vmax.f32 %v591_v27, 0.0 }
  0xc0   :  { %4184 = vmatmul.msk.f32.gmra.mxu0 %vm112_vm1, %v47_v12  ;;  %4217 = vmatmul.msk.f32.gmra.mxu1 %vm112_vm1, %v47_v12 }
  0xc1   :  { %4250 = vmatmul.msk.f32.gmra.mxu2 %vm112_vm1, %v47_v12  ;;  %4283 = vmatmul.msk.f32.gmra.mxu3 %vm112_vm1, %v47_v12 }
  0xc2   :  { %1264 = vmatpush.msrb.mxu1 %v1060_v50 }
  0xc4   :  { %v480_v15 = vpop.f32.mrf.mxu2  ;;  %v593_v18 = vpop.f32.mrf.mxu3 }
  0xc5   :  { %v5015_v19 = vpop.f32.mrf.mxu0  ;;  %v5017_v20 = vpop.f32.mrf.mxu1  ;;  %v481_v48 = vadd.f32 %v480_v15, %v4933_v34  ;;  %v594_v49 = vadd.f32 %v593_v18, %v4936_v35  ;;  %v51_v15 = vld [vmem:[%s8589_s0 + $0xc8] sm:$0xff]  ;;  %v980_v18 = vld [vmem:[%s8590_s3 + $0x290] sm:$0xff] }
  0xc6   :  { %1322 = vmatpush.msrb.mxu2 %v980_v18 }
  0xc7   :  { %v696_v63 = vmax.f32 %v481_v48, 0.0  ;;  %v697_v0 = vmax.f32 %v594_v49, 0.0  ;;  %v916_v49 = vld [vmem:[%s8590_s3 + $0x90] sm:$0xff] }
  0xc8   :  { %4185 = vmatmul.msk.f32.gmra.mxu0 %vm112_vm1, %v48_v21  ;;  %4218 = vmatmul.msk.f32.gmra.mxu1 %vm112_vm1, %v48_v21 }
  0xc9   :  { %4251 = vmatmul.msk.f32.gmra.mxu2 %vm112_vm1, %v48_v21  ;;  %4284 = vmatmul.msk.f32.gmra.mxu3 %vm112_vm1, %v48_v21  ;;  %v1124_v21 = vld [vmem:[%s8590_s3 + $0x710] sm:$0xff] }
  0xca   :  { %1387 = vmatpush.msrb.mxu3 %v1124_v21  ;;  %1199 = vmatpush.msrb.mxu0 %v916_v49 }
  0xcc   :  { %v483_v29 = vpop.f32.mrf.mxu2  ;;  %v596_v30 = vpop.f32.mrf.mxu3 }
  0xcd   :  { %v484_v33 = vadd.f32 %v483_v29, %v4933_v34  ;;  %v597_v36 = vadd.f32 %v596_v30, %v4936_v35  ;;  %v5036_v37 = vpop.f32.mrf.mxu0  ;;  %v5038_v38 = vpop.f32.mrf.mxu1  ;;  %v52_v29 = vld [vmem:[%s8589_s0 + $0xd0] sm:$0xff]  ;;  %v5103_v30 = vperm.slane %v4923_v28, 0 }
  0xcf   :  { %v700_v42 = vmax.f32 %v484_v33, 0.0  ;;  %v701_v43 = vmax.f32 %v597_v36, 0.0  ;;  %v5106_v33 = vperm.slane %v4923_v28, 1  ;;  %v971_v36 = vld [vmem:[%s8590_s3 + $0x248] sm:$0xff]  ;;  %v962_v28 = vld [vmem:[%s8590_s3 + $0x200] sm:$0xff] }
  0xd0   :  { %4186 = vmatmul.msk.f32.gmra.mxu0 %vm112_vm1, %v49_v39  ;;  %4219 = vmatmul.msk.f32.gmra.mxu1 %vm112_vm1, %v49_v39 }
  0xd1   :  { %v5045_v46 = vmax.f32 %v692_v40, %v700_v42  ;;  %v5047_v47 = vmax.f32 %v693_v41, %v701_v43  ;;  %4252 = vmatmul.msk.f32.gmra.mxu2 %vm112_vm1, %v49_v39  ;;  %4285 = vmatmul.msk.f32.gmra.mxu3 %vm112_vm1, %v49_v39  ;;  %v1115_v39 = vld [vmem:[%s8590_s3 + $0x6c8] sm:$0xff]  ;;  %v1106_v42 = vld [vmem:[%s8590_s3 + $0x680] sm:$0xff] }
  0xd2   :  { %1323 = vmatpush.msrb.mxu2 %v971_v36  ;;  %1388 = vmatpush.msrb.mxu3 %v1115_v39 }
  0xd4   :  { %v486_v54 = vpop.f32.mrf.mxu2  ;;  %v599_v55 = vpop.f32.mrf.mxu3  ;;  %1324 = vmatpush.msrb.mxu2 %v962_v28  ;;  %1389 = vmatpush.msrb.mxu3 %v1106_v42  ;;  %v935_v42 = vld [vmem:[%s8590_s3 + $0x128] sm:$0xff] }
  0xd5   :  { %v487_v56 = vadd.f32 %v486_v54, %v4933_v34  ;;  %v600_v57 = vadd.f32 %v599_v55, %v4936_v35  ;;  %v263_v58 = vpop.f32.mrf.mxu0  ;;  %v376_v59 = vpop.f32.mrf.mxu1  ;;  %v953_v55 = vld [vmem:[%s8590_s3 + $0x1b8] sm:$0xff] }
  0xd6   :  { %v264_v43 = vadd.f32 %v263_v58, %v5103_v30  ;;  %v377_v48 = vadd.f32 %v376_v59, %v5106_v33  ;;  %1325 = vmatpush.msrb.mxu2 %v953_v55 }
  0xd7   :  { %v704_v1 = vmax.f32 %v487_v56, 0.0  ;;  %v705_v2 = vmax.f32 %v600_v57, 0.0  ;;  %v1097_v56 = vld [vmem:[%s8590_s3 + $0x638] sm:$0xff] }
  0xd8   :  { %4187 = vmatmul.msk.f32.gmra.mxu0 %vm112_vm1, %v50_v60  ;;  %4220 = vmatmul.msk.f32.gmra.mxu1 %vm112_vm1, %v50_v60  ;;  %v706_v8 = vmax.f32 %v264_v43, 0.0  ;;  %v1079_v43 = vld [vmem:[%s8590_s3 + $0x5a8] sm:$0xff] }
  0xd9   :  { %v5066_v3 = vmax.f32 %v696_v63, %v704_v1  ;;  %v5068_v6 = vmax.f32 %v697_v0, %v705_v2  ;;  %4253 = vmatmul.msk.f32.gmra.mxu2 %vm112_vm1, %v50_v60  ;;  %4286 = vmatmul.msk.f32.gmra.mxu3 %vm112_vm1, %v50_v60 }
  0xda   :  { %1390 = vmatpush.msrb.mxu3 %v1097_v56  ;;  %v926_v56 = vld [vmem:[%s8590_s3 + $0xe0] sm:$0xff] }
  0xdc   :  { %v489_v9 = vpop.f32.mrf.mxu2  ;;  %v602_v12 = vpop.f32.mrf.mxu3 }
  0xdd   :  { %v5078_v13 = vpop.f32.mrf.mxu0  ;;  %v5080_v14 = vpop.f32.mrf.mxu1  ;;  %v490_v53 = vadd.f32 %v489_v9, %v4933_v34  ;;  %v603_v54 = vadd.f32 %v602_v12, %v4936_v35  ;;  %v707_v9 = vmax.f32 %v377_v48, 0.0 }
  0xde   :  { %v267_v48 = vadd.f32 %v5078_v13, %v5103_v30  ;;  %v380_v49 = vadd.f32 %v5080_v14, %v5106_v33  ;;  %v1070_v13 = vld [vmem:[%s8590_s3 + $0x560] sm:$0xff] }
  0xdf   :  { %v708_v12 = vmax.f32 %v490_v53, 0.0 }
  0xe0   :  { %4188 = vmatmul.msk.f32.gmra.mxu0 %vm112_vm1, %v51_v15  ;;  %4221 = vmatmul.msk.f32.gmra.mxu1 %vm112_vm1, %v51_v15 }
  0xe1   :  { %4254 = vmatmul.msk.f32.gmra.mxu2 %vm112_vm1, %v51_v15  ;;  %4287 = vmatmul.msk.f32.gmra.mxu3 %vm112_vm1, %v51_v15  ;;  %v709_v15 = vmax.f32 %v603_v54, 0.0 }
  0xe4   :  { %v5095_v22 = vpop.f32.mrf.mxu2  ;;  %v5097_v25 = vpop.f32.mrf.mxu3 }
  0xe5   :  { %v269_v26 = vpop.f32.mrf.mxu0  ;;  %v382_v27 = vpop.f32.mrf.mxu1  ;;  %v493_v50 = vadd.f32 %v5095_v22, %v4933_v34  ;;  %v606_v53 = vadd.f32 %v5097_v25, %v4936_v35 }
  0xe6   :  { %v270_v40 = vadd.f32 %v269_v26, %v5103_v30  ;;  %v383_v41 = vadd.f32 %v382_v27, %v5106_v33  ;;  %v944_v26 = vld [vmem:[%s8590_s3 + $0x170] sm:$0xff] }
  0xe7   :  { %v1088_v27 = vld [vmem:[%s8590_s3 + $0x5f0] sm:$0xff]  ;;  %1326 = vmatpush.msrb.mxu2 %v944_v26  ;;  %v1061_v26 = vld [vmem:[%s8590_s3 + $0x518] sm:$0xff] }
  0xe8   :  { %4189 = vmatmul.msk.f32.gmra.mxu0 %vm112_vm1, %v52_v29  ;;  %4222 = vmatmul.msk.f32.gmra.mxu1 %vm112_vm1, %v52_v29  ;;  %v714_v57 = vmax.f32 %v270_v40, 0.0  ;;  %v715_v58 = vmax.f32 %v383_v41, 0.0 }
  0xe9   :  { %4255 = vmatmul.msk.f32.gmra.mxu2 %vm112_vm1, %v52_v29  ;;  %4288 = vmatmul.msk.f32.gmra.mxu3 %vm112_vm1, %v52_v29 }
  0xea   :  { %v818_v29 = vmax.f32 %v706_v8, %v714_v57  ;;  %v819_v36 = vmax.f32 %v707_v9, %v715_v58  ;;  %1391 = vmatpush.msrb.mxu3 %v1088_v27  ;;  %1327 = vmatpush.msrb.mxu2 %v935_v42  ;;  %v711_v8 = vmax.f32 %v380_v49, 0.0  ;;  %v712_v9 = vmax.f32 %v493_v50, 0.0  ;;  %v1052_v42 = vld [vmem:[%s8590_s3 + $0x4d0] sm:$0xff]  ;;  %v899_v49 = vld [vmem:[%s8590_s3 + $0x8] sm:$0xff] }
  0xeb   :  { %v1043_v50 = vld [vmem:[%s8590_s3 + $0x488] sm:$0xff] }
  0xec   :  { %v495_v59 = vpop.f32.mrf.mxu2  ;;  %v608_v60 = vpop.f32.mrf.mxu3  ;;  %1392 = vmatpush.msrb.mxu3 %v1079_v43  ;;  %1328 = vmatpush.msrb.mxu2 %v926_v56 }
  0xed   :  { %v496_v63 = vadd.f32 %v495_v59, %v4933_v34  ;;  %v609_v0 = vadd.f32 %v608_v60, %v4936_v35  ;;  %v272_v1 = vpop.f32.mrf.mxu0  ;;  %v385_v2 = vpop.f32.mrf.mxu1 }
  0xee   :  { %v273_v39 = vadd.f32 %v272_v1, %v5103_v30  ;;  %v386_v28 = vadd.f32 %v385_v2, %v5106_v33  ;;  %v907_v1 = vld [vmem:[%s8590_s3 + $0x48] sm:$0xff]  ;;  %1393 = vmatpush.msrb.mxu3 %v1070_v13 }
  0xef   :  { %v716_v18 = vmax.f32 %v496_v63, 0.0  ;;  %v717_v21 = vmax.f32 %v609_v0, 0.0  ;;  %v54_v0 = vld [vmem:[%s8589_s0 + $0xe0] sm:$0xff]  ;;  %v1051_v2 = vld [vmem:[%s8590_s3 + $0x4c8] sm:$0xff]  ;;  %1200 = vmatpush.msrb.mxu0 %v907_v1 }
  0xf0   :  { %4190 = vmatmul.msk.f32.gmra.mxu0 %vm112_vm1, %v53_v7  ;;  %4223 = vmatmul.msk.f32.gmra.mxu1 %vm112_vm1, %v53_v7  ;;  %v718_v14 = vmax.f32 %v273_v39, 0.0  ;;  %v719_v22 = vmax.f32 %v386_v28, 0.0  ;;  %v908_v28 = vld [vmem:[%s8590_s3 + $0x50] sm:$0xff] }
  0xf1   :  { %v820_v40 = vmax.f32 %v708_v12, %v716_v18  ;;  %v821_v41 = vmax.f32 %v709_v15, %v717_v21  ;;  %4256 = vmatmul.msk.f32.gmra.mxu2 %vm112_vm1, %v53_v7  ;;  %4289 = vmatmul.msk.f32.gmra.mxu3 %vm112_vm1, %v53_v7  ;;  %v710_v7 = vmax.f32 %v267_v48, 0.0  ;;  %v713_v12 = vmax.f32 %v606_v53, 0.0  ;;  %v917_v21 = vld [vmem:[%s8590_s3 + $0x98] sm:$0xff] }
  0xf2   :  { %1265 = vmatpush.msrb.mxu1 %v1051_v2  ;;  %v823_v39 = vmax.f32 %v711_v8, %v719_v22  ;;  %1329 = vmatpush.msrb.mxu2 %v917_v21  ;;  %v246_v8 = vadd.f32 %v4925_v31, %v5103_v30  ;;  %v353_v31 = vadd.f32 %v4888_v17, %v5106_v33 }
  0xf3   :  { %v5173_v54 = vmax.f32 %v818_v29, %v820_v40  ;;  %v5175_v55 = vmax.f32 %v819_v36, %v821_v41  ;;  %v822_v27 = vmax.f32 %v710_v7, %v718_v14  ;;  %v898_v29 = vld [vmem:[%s8590_s3] sm:$0xff]  ;;  %1394 = vmatpush.msrb.mxu3 %v1061_v26  ;;  %v240_v7 = vadd.f32 %v4886_v16, %v5103_v30 }
  0xf4   :  { %v498_v57 = vpop.f32.mrf.mxu2  ;;  %v611_v58 = vpop.f32.mrf.mxu3  ;;  %v1042_v36 = vld [vmem:[%s8590_s3 + $0x480] sm:$0xff]  ;;  %1201 = vmatpush.msrb.mxu0 %v898_v29  ;;  %1330 = vmatpush.msrb.mxu2 %v908_v28  ;;  %v359_v16 = vadd.f32 %v4927_v32, %v5106_v33  ;;  %v682_v28 = vmax.f32 %v246_v8, 0.0  ;;  %v249_v32 = vadd.f32 %v4952_v44, %v5103_v30  ;;  %v243_v8 = vadd.f32 %v4903_v23, %v5103_v30 }
  0xf5   :  { %v499_v25 = vadd.f32 %v498_v57, %v4933_v34  ;;  %v612_v59 = vadd.f32 %v611_v58, %v4936_v35  ;;  %v5185_v60 = vpop.f32.mrf.mxu0  ;;  %v5187_v63 = vpop.f32.mrf.mxu1  ;;  %1266 = vmatpush.msrb.mxu1 %v1042_v36  ;;  %1395 = vmatpush.msrb.mxu3 %v1052_v42  ;;  %v55_v57 = vld [vmem:[%s8589_s0 + $0xe8] sm:$0xff]  ;;  %v674_v36 = vmax.f32 %v240_v7, 0.0  ;;  %v362_v23 = vadd.f32 %v4954_v45, %v5106_v33 }
  0xf6   :  { %1331 = vmatpush.msrb.mxu2 %v899_v49 }
  0xf7   :  { %v720_v15 = vmax.f32 %v499_v25, 0.0  ;;  %v721_v18 = vmax.f32 %v612_v59, 0.0  ;;  %1396 = vmatpush.msrb.mxu3 %v1043_v50 }
  0xf8   :  { %4191 = vmatmul.msk.f32.gmra.mxu0 %vm112_vm1, %v54_v0  ;;  %4224 = vmatmul.msk.f32.gmra.mxu1 %vm112_vm1, %v54_v0 }
  0xf9   :  { %v824_v40 = vmax.f32 %v712_v9, %v720_v15  ;;  %v825_v41 = vmax.f32 %v713_v12, %v721_v18  ;;  %4257 = vmatmul.msk.f32.gmra.mxu2 %vm112_vm1, %v54_v0  ;;  %4290 = vmatmul.msk.f32.gmra.mxu3 %vm112_vm1, %v54_v0  ;;  %v56_v0 = vld [vmem:[%s8589_s0 + $0xf0] sm:$0xff]  ;;  %v276_v9 = vadd.f32 %v5185_v60, %v5103_v30 }
  0xfa   :  { %v389_v12 = vadd.f32 %v5187_v63, %v5106_v33 }
  0xfb   :  { %v5220_v43 = vmax.f32 %v822_v27, %v824_v40  ;;  %v5222_v48 = vmax.f32 %v823_v39, %v825_v41  ;;  %v57_v41 = vld [vmem:[%s8589_s0 + $0xf8] sm:$0xff]  ;;  %v722_v42 = vmax.f32 %v276_v9, 0.0  ;;  %v356_v9 = vadd.f32 %v4905_v24, %v5106_v33 }
  0xfc   :  { %v501_v53 = vpop.f32.mrf.mxu2  ;;  %v614_v56 = vpop.f32.mrf.mxu3  ;;  %v723_v49 = vmax.f32 %v389_v12, 0.0 }
  0xfd   :  { %8673 = vst [vmem:[#allocation2_spill] sm:$0xff] %v5220_v43  ;;  %v278_v13 = vpop.f32.mrf.mxu0  ;;  %v391_v14 = vpop.f32.mrf.mxu1  ;;  %v502_v15 = vadd.f32 %v501_v53, %v4933_v34  ;;  %v615_v18 = vadd.f32 %v614_v56, %v4936_v35 }
  0xfe   :  { %8674 = vst [vmem:[#allocation3_spill] sm:$0xff] %v5222_v48  ;;  %v279_v12 = vadd.f32 %v278_v13, %v5103_v30 }
  0xff   :  { %v724_v50 = vmax.f32 %v502_v15, 0.0  ;;  %v725_v53 = vmax.f32 %v615_v18, 0.0  ;;  %v392_v15 = vadd.f32 %v391_v14, %v5106_v33 }
 0x100   :  { %4192 = vmatmul.msk.f32.gmra.mxu0 %vm112_vm1, %v55_v57  ;;  %4225 = vmatmul.msk.f32.gmra.mxu1 %vm112_vm1, %v55_v57  ;;  %v726_v45 = vmax.f32 %v279_v12, 0.0 }
 0x101   :  { %4258 = vmatmul.msk.f32.gmra.mxu2 %vm112_vm1, %v55_v57  ;;  %4291 = vmatmul.msk.f32.gmra.mxu3 %vm112_vm1, %v55_v57  ;;  %v683_v57 = vmax.f32 %v359_v16, 0.0 }
 0x104   :  { %v504_v58 = vpop.f32.mrf.mxu2  ;;  %v617_v22 = vpop.f32.mrf.mxu3 }
 0x105   :  { %v281_v25 = vpop.f32.mrf.mxu0  ;;  %v394_v59 = vpop.f32.mrf.mxu1  ;;  %v505_v18 = vadd.f32 %v504_v58, %v4933_v34  ;;  %v618_v16 = vadd.f32 %v617_v22, %v4936_v35 }
 0x106   :  { %v282_v1 = vadd.f32 %v281_v25, %v5103_v30  ;;  %v395_v2 = vadd.f32 %v394_v59, %v5106_v33 }
 0x108   :  { %4193 = vmatmul.msk.f32.gmra.mxu0 %vm112_vm1, %v56_v0  ;;  %4226 = vmatmul.msk.f32.gmra.mxu1 %vm112_vm1, %v56_v0  ;;  %v730_v21 = vmax.f32 %v282_v1, 0.0  ;;  %v731_v26 = vmax.f32 %v395_v2, 0.0  ;;  %v675_v1 = vmax.f32 %v353_v31, 0.0 }
 0x109   :  { %4259 = vmatmul.msk.f32.gmra.mxu2 %vm112_vm1, %v56_v0  ;;  %4292 = vmatmul.msk.f32.gmra.mxu3 %vm112_vm1, %v56_v0 }
 0x10a   :  { %v826_v25 = vmax.f32 %v722_v42, %v730_v21  ;;  %v827_v59 = vmax.f32 %v723_v49, %v731_v26  ;;  %v729_v42 = vmax.f32 %v618_v16, 0.0 }
 0x10c   :  { %v507_v27 = vpop.f32.mrf.mxu2  ;;  %v620_v29 = vpop.f32.mrf.mxu3 }
 0x10d   :  { %v508_v60 = vadd.f32 %v507_v27, %v4933_v34  ;;  %v621_v39 = vadd.f32 %v620_v29, %v4936_v35  ;;  %v284_v63 = vpop.f32.mrf.mxu0  ;;  %v397_v40 = vpop.f32.mrf.mxu1  ;;  %v802_v27 = vmax.f32 %v674_v36, %v682_v28  ;;  %v803_v29 = vmax.f32 %v675_v1, %v683_v57  ;;  %v1035_v1 = vld [vmem:[%s8590_s3 + $0x448] sm:$0xff] }
 0x10e   :  { %v285_v0 = vadd.f32 %v284_v63, %v5103_v30  ;;  %v398_v44 = vadd.f32 %v397_v40, %v5106_v33  ;;  %v728_v28 = vmax.f32 %v505_v18, 0.0  ;;  %1446 = vmatpush.msra.mxu0 %v1035_v1 }
 0x10f   :  { %v732_v56 = vmax.f32 %v508_v60, 0.0  ;;  %v733_v17 = vmax.f32 %v621_v39, 0.0  ;;  %v686_v39 = vmax.f32 %v249_v32, 0.0  ;;  %v5294_v40 = vmax.f32 %v802_v27, %v4961_v51 }
 0x110   :  { %4194 = vmatmul.msk.f32.gmra.mxu0 %vm112_vm1, %v57_v41  ;;  %4227 = vmatmul.msk.f32.gmra.mxu1 %vm112_vm1, %v57_v41  ;;  %v734_v31 = vmax.f32 %v285_v0, 0.0  ;;  %v735_v13 = vmax.f32 %v398_v44, 0.0  ;;  %v5297_v36 = vmax.f32 %v803_v29, %v4963_v52  ;;  %v679_v52 = vmax.f32 %v356_v9, 0.0 }
 0x111   :  { %v828_v2 = vmax.f32 %v724_v50, %v732_v56  ;;  %v829_v7 = vmax.f32 %v725_v53, %v733_v17  ;;  %4260 = vmatmul.msk.f32.gmra.mxu2 %vm112_vm1, %v57_v41  ;;  %4293 = vmatmul.msk.f32.gmra.mxu3 %vm112_vm1, %v57_v41  ;;  %v727_v41 = vmax.f32 %v392_v15, 0.0  ;;  %v687_v50 = vmax.f32 %v362_v23, 0.0 }
 0x112   :  { %v830_v53 = vmax.f32 %v726_v45, %v734_v31  ;;  %v678_v56 = vmax.f32 %v243_v8, 0.0  ;;  %v258_v44 = vadd.f32 %v5015_v19, %v5103_v30  ;;  %v371_v8 = vadd.f32 %v5017_v20, %v5106_v33 }
 0x113   :  { %v5281_v21 = vmax.f32 %v826_v25, %v828_v2  ;;  %v5283_v26 = vmax.f32 %v827_v59, %v829_v7  ;;  %v831_v17 = vmax.f32 %v727_v41, %v735_v13  ;;  %v1179_v2 = vld [vmem:[%s8590_s3 + $0x8c8] sm:$0xff]  ;;  %v807_v7 = vmax.f32 %v679_v52, %v687_v50 }
 0x114   :  { %v510_v60 = vpop.f32.mrf.mxu2  ;;  %v623_v24 = vpop.f32.mrf.mxu3  ;;  %v806_v25 = vmax.f32 %v678_v56, %v686_v39  ;;  %1511 = vmatpush.msra.mxu1 %v1179_v2  ;;  %v252_v19 = vadd.f32 %v4977_v61, %v5103_v30  ;;  %v365_v20 = vadd.f32 %v4979_v62, %v5106_v33  ;;  %v698_v29 = vmax.f32 %v258_v44, 0.0  ;;  %v1170_v61 = vld [vmem:[%s8590_s3 + $0x880] sm:$0xff]  ;;  %v999_v44 = vld [vmem:[%s8590_s3 + $0x328] sm:$0xff] }
 0x115   :  { %v511_v14 = vadd.f32 %v510_v60, %v4933_v34  ;;  %v624_v58 = vadd.f32 %v623_v24, %v4936_v35  ;;  %v5289_v63 = vpop.f32.mrf.mxu0  ;;  %v5291_v22 = vpop.f32.mrf.mxu1  ;;  %v5329_v27 = vmax.f32 %v807_v7, %v4988_v5  ;;  %v699_v23 = vmax.f32 %v371_v8, 0.0  ;;  %v1143_v8 = vld [vmem:[%s8590_s3 + $0x7a8] sm:$0xff] }
 0x116   :  { %v5326_v16 = vmax.f32 %v806_v25, %v4986_v4  ;;  %v1026_v4 = vld [vmem:[%s8590_s3 + $0x400] sm:$0xff]  ;;  %v690_v5 = vmax.f32 %v252_v19, 0.0  ;;  %v691_v62 = vmax.f32 %v365_v20, 0.0  ;;  %1512 = vmatpush.msra.mxu1 %v1170_v61  ;;  %v261_v24 = vadd.f32 %v5036_v37, %v5103_v30  ;;  %v1008_v25 = vld [vmem:[%s8590_s3 + $0x370] sm:$0xff] }
 0x117   :  { %v736_v32 = vmax.f32 %v511_v14, 0.0  ;;  %v737_v49 = vmax.f32 %v624_v58, 0.0  ;;  %1447 = vmatpush.msra.mxu0 %v1026_v4  ;;  %v374_v39 = vadd.f32 %v5038_v38, %v5106_v33  ;;  %v255_v41 = vadd.f32 %v4998_v10, %v5103_v30  ;;  %v990_v4 = vld [vmem:[%s8590_s3 + $0x2e0] sm:$0xff] }
 0x118   :  { %1202 = vmatmul.f32.vlgmr.msrb.gmra.mxu0 %v5294_v40  ;;  %1267 = vmatmul.f32.vlgmr.msrb.gmra.mxu1 %v5297_v36  ;;  %v810_v31 = vmax.f32 %v690_v5, %v698_v29  ;;  %v811_v60 = vmax.f32 %v691_v62, %v699_v23  ;;  %v702_v38 = vmax.f32 %v261_v24, 0.0  ;;  %v1134_v61 = vld [vmem:[%s8590_s3 + $0x760] sm:$0xff] }
 0x119   :  { %v832_v57 = vmax.f32 %v728_v28, %v736_v32  ;;  %v833_v51 = vmax.f32 %v729_v42, %v737_v49  ;;  %1332 = vmatmul.f32.vlgmr.msrb.gmra.mxu2 %v5294_v40  ;;  %1397 = vmatmul.f32.vlgmr.msrb.gmra.mxu3 %v5297_v36  ;;  %v368_v28 = vadd.f32 %v5000_v11, %v5106_v33  ;;  %v703_v32 = vmax.f32 %v374_v39, 0.0  ;;  %v1017_v11 = vld [vmem:[%s8590_s3 + $0x3b8] sm:$0xff] }
 0x11a   :  { %v5362_v42 = vmax.f32 %v810_v31, %v5045_v46  ;;  %v5365_v37 = vmax.f32 %v811_v60, %v5047_v47  ;;  %v694_v10 = vmax.f32 %v255_v41, 0.0  ;;  %v1161_v46 = vld [vmem:[%s8590_s3 + $0x838] sm:$0xff]  ;;  %1448 = vmatpush.msra.mxu0 %v1017_v11 }
 0x11b   :  { %v5303_v59 = vmax.f32 %v830_v53, %v832_v57  ;;  %v5305_v0 = vmax.f32 %v831_v17, %v833_v51  ;;  %v695_v49 = vmax.f32 %v368_v28, 0.0  ;;  %1513 = vmatpush.msra.mxu1 %v1161_v46  ;;  %v981_v41 = vld [vmem:[%s8590_s3 + $0x298] sm:$0xff] }
 0x11c   :  { %v5317_v9 = vpop.f32.mrf.mxu2  ;;  %v5319_v12 = vpop.f32.mrf.mxu3  ;;  %v814_v47 = vmax.f32 %v694_v10, %v702_v38  ;;  %1449 = vmatpush.msra.mxu0 %v1008_v25  ;;  %v1125_v28 = vld [vmem:[%s8590_s3 + $0x718] sm:$0xff] }
 0x11d   :  { %8675 = vst [vmem:[#allocation4_spill] sm:$0xff] %v5303_v59  ;;  %v5321_v15 = vpop.f32.mrf.mxu0  ;;  %v5323_v18 = vpop.f32.mrf.mxu1  ;;  %v815_v50 = vmax.f32 %v695_v49, %v703_v32  ;;  %v514_v38 = vadd.f32 %v5317_v9, %v4933_v34  ;;  %v627_v32 = vadd.f32 %v5319_v12, %v4936_v35 }
 0x11e   :  { %8676 = vst [vmem:[#allocation5_spill] sm:$0xff] %v5305_v0  ;;  %v5382_v51 = vmax.f32 %v814_v47, %v5066_v3  ;;  %v1152_v3 = vld [vmem:[%s8590_s3 + $0x7f0] sm:$0xff]  ;;  %1450 = vmatpush.msra.mxu0 %v999_v44  ;;  %v288_v47 = vadd.f32 %v5289_v63, %v5103_v30 }
 0x11f   :  { %v5385_v52 = vmax.f32 %v815_v50, %v5068_v6  ;;  %1514 = vmatpush.msra.mxu1 %v1152_v3  ;;  %v401_v50 = vadd.f32 %v5291_v22, %v5106_v33  ;;  %v740_v25 = vmax.f32 %v514_v38, 0.0  ;;  %v741_v3 = vmax.f32 %v627_v32, 0.0 }
 0x120   :  { %1205 = vmatmul.f32.gmra.mxu0 %v5326_v16  ;;  %1270 = vmatmul.f32.gmra.mxu1 %v5329_v27  ;;  %8677 = vst [vmem:[#allocation6_spill] sm:$0xff] %v5382_v51 }
 0x121   :  { %1335 = vmatmul.f32.gmra.mxu2 %v5326_v16  ;;  %1400 = vmatmul.f32.gmra.mxu3 %v5329_v27  ;;  %8678 = vst [vmem:[#allocation7_spill] sm:$0xff] %v5385_v52 }
 0x122   :  { %1515 = vmatpush.msra.mxu1 %v1143_v8  ;;  %1451 = vmatpush.msra.mxu0 %v990_v4  ;;  %v739_v8 = vmax.f32 %v401_v50, 0.0 }
 0x124   :  { %v5349_v13 = vpop.f32.mrf.mxu2  ;;  %v5351_v14 = vpop.f32.mrf.mxu3  ;;  %1516 = vmatpush.msra.mxu1 %v1134_v61  ;;  %1452 = vmatpush.msra.mxu0 %v981_v41 }
 0x125   :  { %v5353_v58 = vpop.f32.mrf.mxu0  ;;  %v5355_v45 = vpop.f32.mrf.mxu1 }
 0x126   :  { %1517 = vmatpush.msra.mxu1 %v1125_v28  ;;  %v294_v10 = vadd.f32 %v5353_v58, %v5103_v30  ;;  %v407_v49 = vadd.f32 %v5355_v45, %v5106_v33  ;;  %v738_v45 = vmax.f32 %v288_v47, 0.0  ;;  %v972_v28 = vld [vmem:[%s8590_s3 + $0x250] sm:$0xff] }
 0x127   :  { %1453 = vmatpush.msra.mxu0 %v972_v28 }
 0x128   :  { %1208 = vmatmul.f32.gmra.mxu0 %v5362_v42  ;;  %1273 = vmatmul.f32.gmra.mxu1 %v5365_v37  ;;  %v746_v58 = vmax.f32 %v294_v10, 0.0  ;;  %v747_v44 = vmax.f32 %v407_v49, 0.0 }
 0x129   :  { %1338 = vmatmul.f32.gmra.mxu2 %v5362_v42  ;;  %1403 = vmatmul.f32.gmra.mxu3 %v5365_v37 }
 0x12a   :  { %v834_v38 = vmax.f32 %v738_v45, %v746_v58  ;;  %v835_v32 = vmax.f32 %v739_v8, %v747_v44 }
 0x12c   :  { %v519_v53 = vpop.f32.mrf.mxu2  ;;  %v632_v56 = vpop.f32.mrf.mxu3 }
 0x12d   :  { %v5377_v17 = vpop.f32.mrf.mxu0  ;;  %v5379_v57 = vpop.f32.mrf.mxu1  ;;  %v520_v24 = vadd.f32 %v519_v53, %v4933_v34  ;;  %v633_v39 = vadd.f32 %v632_v56, %v4936_v35 }
 0x12e   :  { %v410_v41 = vadd.f32 %v5379_v57, %v5106_v33  ;;  %v404_v57 = vadd.f32 %v5323_v18, %v5106_v33 }
 0x12f   :  { %v748_v56 = vmax.f32 %v520_v24, 0.0  ;;  %v749_v12 = vmax.f32 %v633_v39, 0.0  ;;  %v517_v24 = vadd.f32 %v5349_v13, %v4933_v34  ;;  %v297_v39 = vadd.f32 %v5377_v17, %v5103_v30 }
 0x130   :  { %1211 = vmatmul.f32.gmra.mxu0 %v5382_v51  ;;  %1276 = vmatmul.f32.gmra.mxu1 %v5385_v52  ;;  %v291_v17 = vadd.f32 %v5321_v15, %v5103_v30  ;;  %v743_v18 = vmax.f32 %v404_v57, 0.0 }
 0x131   :  { %1341 = vmatmul.f32.gmra.mxu2 %v5382_v51  ;;  %1406 = vmatmul.f32.gmra.mxu3 %v5385_v52  ;;  %v836_v63 = vmax.f32 %v740_v25, %v748_v56  ;;  %v837_v22 = vmax.f32 %v741_v3, %v749_v12  ;;  %v750_v25 = vmax.f32 %v297_v39, 0.0  ;;  %v751_v3 = vmax.f32 %v410_v41, 0.0  ;;  %v963_v39 = vld [vmem:[%s8590_s3 + $0x208] sm:$0xff] }
 0x132   :  { %v744_v58 = vmax.f32 %v517_v24, 0.0  ;;  %v742_v15 = vmax.f32 %v291_v17, 0.0  ;;  %1454 = vmatpush.msra.mxu0 %v963_v39 }
 0x133   :  { %v5499_v50 = vmax.f32 %v834_v38, %v836_v63  ;;  %v5501_v56 = vmax.f32 %v835_v32, %v837_v22 }
 0x134   :  { %v5397_v1 = vpop.f32.mrf.mxu2  ;;  %v5399_v6 = vpop.f32.mrf.mxu3 }
 0x135   :  { %v5401_v2 = vpop.f32.mrf.mxu0  ;;  %v5403_v7 = vpop.f32.mrf.mxu1  ;;  %v523_v4 = vadd.f32 %v5397_v1, %v4933_v34  ;;  %v636_v61 = vadd.f32 %v5399_v6, %v4936_v35  ;;  %v1116_v1 = vld [vmem:[%s8590_s3 + $0x6d0] sm:$0xff]  ;;  %v630_v6 = vadd.f32 %v5351_v14, %v4936_v35 }
 0x136   :  { %1518 = vmatpush.msra.mxu1 %v1116_v1 }
 0x137   :  { %v752_v14 = vmax.f32 %v523_v4, 0.0  ;;  %v753_v12 = vmax.f32 %v636_v61, 0.0  ;;  %v745_v44 = vmax.f32 %v630_v6, 0.0  ;;  %v838_v4 = vmax.f32 %v742_v15, %v750_v25 }
 0x138   :  { %1214 = vmatmul.f32.gmra.mxu0 %v5173_v54  ;;  %1279 = vmatmul.f32.gmra.mxu1 %v5175_v55  ;;  %v839_v61 = vmax.f32 %v743_v18, %v751_v3  ;;  %v300_v6 = vadd.f32 %v5401_v2, %v5103_v30 }
 0x139   :  { %1344 = vmatmul.f32.gmra.mxu2 %v5173_v54  ;;  %1409 = vmatmul.f32.gmra.mxu3 %v5175_v55  ;;  %v840_v8 = vmax.f32 %v744_v58, %v752_v14  ;;  %v841_v63 = vmax.f32 %v745_v44, %v753_v12  ;;  %v954_v44 = vld [vmem:[%s8590_s3 + $0x1c0] sm:$0xff] }
 0x13a   :  { %v754_v2 = vmax.f32 %v300_v6, 0.0  ;;  %1455 = vmatpush.msra.mxu0 %v954_v44 }
 0x13c   :  { %v5415_v19 = vpop.f32.mrf.mxu2  ;;  %v5417_v20 = vpop.f32.mrf.mxu3 }
 0x13d   :  { %v5419_v29 = vpop.f32.mrf.mxu0  ;;  %v5421_v23 = vpop.f32.mrf.mxu1  ;;  %v526_v24 = vadd.f32 %v5415_v19, %v4933_v34  ;;  %v639_v41 = vadd.f32 %v5417_v20, %v4936_v35  ;;  %v5533_v20 = vmax.f32 %v838_v4, %v840_v8 }
 0x13f   :  { %v756_v14 = vmax.f32 %v526_v24, 0.0  ;;  %v757_v12 = vmax.f32 %v639_v41, 0.0 }
 0x140   :  { %1217 = vmatmul.f32.gmra.mxu0 %v5220_v43  ;;  %1282 = vmatmul.f32.gmra.mxu1 %v5222_v48 }
 0x141   :  { %1347 = vmatmul.f32.gmra.mxu2 %v5220_v43  ;;  %1412 = vmatmul.f32.gmra.mxu3 %v5222_v48 }
 0x144   :  { %v5433_v5 = vpop.f32.mrf.mxu2  ;;  %v5435_v62 = vpop.f32.mrf.mxu3 }
 0x145   :  { %v5437_v31 = vpop.f32.mrf.mxu0  ;;  %v5439_v60 = vpop.f32.mrf.mxu1  ;;  %v529_v4 = vadd.f32 %v5433_v5, %v4933_v34  ;;  %v1036_v5 = vld [vmem:[%s8590_s3 + $0x450] sm:$0xff] }
 0x146   :  { %v306_v28 = vadd.f32 %v5437_v31, %v5103_v30  ;;  %v5535_v31 = vmax.f32 %v839_v61, %v841_v63  ;;  %v642_v61 = vadd.f32 %v5435_v62, %v4936_v35  ;;  %v1180_v62 = vld [vmem:[%s8590_s3 + $0x8d0] sm:$0xff]  ;;  %1576 = vmatpush.msra.mxu2 %v1036_v5 }
 0x147   :  { %1641 = vmatpush.msra.mxu3 %v1180_v62 }
 0x148   :  { %1220 = vmatmul.f32.gmra.mxu0 %v5281_v21  ;;  %1285 = vmatmul.f32.gmra.mxu1 %v5283_v26  ;;  %v762_v25 = vmax.f32 %v306_v28, 0.0 }
 0x149   :  { %1350 = vmatmul.f32.gmra.mxu2 %v5281_v21  ;;  %1415 = vmatmul.f32.gmra.mxu3 %v5283_v26 }
 0x14a   :  { %v842_v24 = vmax.f32 %v754_v2, %v762_v25  ;;  %v1018_v2 = vld [vmem:[%s8590_s3 + $0x3c0] sm:$0xff] }
 0x14c   :  { %v531_v11 = vpop.f32.mrf.mxu2  ;;  %v644_v46 = vpop.f32.mrf.mxu3 }
 0x14d   :  { %v5465_v53 = vpop.f32.mrf.mxu0  ;;  %v5467_v9 = vpop.f32.mrf.mxu1  ;;  %v532_v45 = vadd.f32 %v531_v11, %v4933_v34  ;;  %v645_v22 = vadd.f32 %v644_v46, %v4936_v35  ;;  %v1107_v11 = vld [vmem:[%s8590_s3 + $0x688] sm:$0xff]  ;;  %v419_v46 = vadd.f32 %v5439_v60, %v5106_v33  ;;  %v413_v60 = vadd.f32 %v5403_v7, %v5106_v33  ;;  %v1098_v7 = vld [vmem:[%s8590_s3 + $0x640] sm:$0xff] }
 0x14e   :  { %1519 = vmatpush.msra.mxu1 %v1107_v11  ;;  %v309_v63 = vadd.f32 %v5465_v53, %v5103_v30  ;;  %v416_v53 = vadd.f32 %v5421_v23, %v5106_v33 }
 0x14f   :  { %v764_v38 = vmax.f32 %v532_v45, 0.0  ;;  %v765_v57 = vmax.f32 %v645_v22, 0.0  ;;  %v763_v3 = vmax.f32 %v419_v46, 0.0  ;;  %v755_v15 = vmax.f32 %v413_v60, 0.0  ;;  %v1027_v60 = vld [vmem:[%s8590_s3 + $0x408] sm:$0xff] }
 0x150   :  { %1223 = vmatmul.f32.gmra.mxu0 %v5303_v59  ;;  %1288 = vmatmul.f32.gmra.mxu1 %v5305_v0  ;;  %v422_v22 = vadd.f32 %v5467_v9, %v5106_v33 }
 0x151   :  { %1353 = vmatmul.f32.gmra.mxu2 %v5303_v59  ;;  %1418 = vmatmul.f32.gmra.mxu3 %v5305_v0  ;;  %v844_v58 = vmax.f32 %v756_v14, %v764_v38  ;;  %v845_v18 = vmax.f32 %v757_v12, %v765_v57  ;;  %v843_v39 = vmax.f32 %v755_v15, %v763_v3  ;;  %v1171_v57 = vld [vmem:[%s8590_s3 + $0x888] sm:$0xff]  ;;  %v760_v14 = vmax.f32 %v529_v4, 0.0  ;;  %v945_v15 = vld [vmem:[%s8590_s3 + $0x178] sm:$0xff] }
 0x152   :  { %1520 = vmatpush.msra.mxu1 %v1098_v7  ;;  %v767_v23 = vmax.f32 %v422_v22, 0.0  ;;  %v761_v12 = vmax.f32 %v642_v61, 0.0  ;;  %v759_v3 = vmax.f32 %v416_v53, 0.0  ;;  %1577 = vmatpush.msra.mxu2 %v1027_v60  ;;  %v1009_v22 = vld [vmem:[%s8590_s3 + $0x378] sm:$0xff] }
 0x153   :  { %v5573_v28 = vmax.f32 %v842_v24, %v844_v58  ;;  %v5575_v46 = vmax.f32 %v843_v39, %v845_v18  ;;  %v1162_v58 = vld [vmem:[%s8590_s3 + $0x840] sm:$0xff]  ;;  %1642 = vmatpush.msra.mxu3 %v1171_v57  ;;  %v1089_v18 = vld [vmem:[%s8590_s3 + $0x5f8] sm:$0xff]  ;;  %1456 = vmatpush.msra.mxu0 %v945_v15  ;;  %v1144_v57 = vld [vmem:[%s8590_s3 + $0x7b0] sm:$0xff] }
 0x154   :  { %v534_v13 = vpop.f32.mrf.mxu2  ;;  %v647_v10 = vpop.f32.mrf.mxu3  ;;  %1521 = vmatpush.msra.mxu1 %v1089_v18  ;;  %v1153_v4 = vld [vmem:[%s8590_s3 + $0x7f8] sm:$0xff]  ;;  %1578 = vmatpush.msra.mxu2 %v1018_v2  ;;  %v1135_v2 = vld [vmem:[%s8590_s3 + $0x768] sm:$0xff]  ;;  %v982_v15 = vld [vmem:[%s8590_s3 + $0x2a0] sm:$0xff] }
 0x155   :  { %v5495_v49 = vpop.f32.mrf.mxu0  ;;  %v5497_v47 = vpop.f32.mrf.mxu1  ;;  %v535_v45 = vadd.f32 %v534_v13, %v4933_v34  ;;  %v648_v8 = vadd.f32 %v647_v10, %v4936_v35  ;;  %v303_v10 = vadd.f32 %v5419_v29, %v5103_v30  ;;  %v766_v29 = vmax.f32 %v309_v63, 0.0  ;;  %1643 = vmatpush.msra.mxu3 %v1162_v58 }
 0x156   :  { %1579 = vmatpush.msra.mxu2 %v1009_v22  ;;  %v936_v22 = vld [vmem:[%s8590_s3 + $0x130] sm:$0xff] }
 0x157   :  { %v768_v6 = vmax.f32 %v535_v45, 0.0  ;;  %v769_v38 = vmax.f32 %v648_v8, 0.0  ;;  %v758_v25 = vmax.f32 %v303_v10, 0.0  ;;  %v847_v8 = vmax.f32 %v759_v3, %v767_v23  ;;  %1644 = vmatpush.msra.mxu3 %v1153_v4  ;;  %v991_v3 = vld [vmem:[%s8590_s3 + $0x2e8] sm:$0xff]  ;;  %v1080_v4 = vld [vmem:[%s8590_s3 + $0x5b0] sm:$0xff]  ;;  %1457 = vmatpush.msra.mxu0 %v936_v22 }
 0x158   :  { %1226 = vmatmul.f32.gmra.mxu0 %v5499_v50  ;;  %1291 = vmatmul.f32.gmra.mxu1 %v5501_v56 }
 0x159   :  { %1356 = vmatmul.f32.gmra.mxu2 %v5499_v50  ;;  %1421 = vmatmul.f32.gmra.mxu3 %v5501_v56  ;;  %v848_v44 = vmax.f32 %v760_v14, %v768_v6  ;;  %v849_v7 = vmax.f32 %v761_v12, %v769_v38  ;;  %v846_v45 = vmax.f32 %v758_v25, %v766_v29 }
 0x15a   :  { %1645 = vmatpush.msra.mxu3 %v1144_v57  ;;  %1522 = vmatpush.msra.mxu1 %v1080_v4 }
 0x15b   :  { %v5615_v29 = vmax.f32 %v846_v45, %v848_v44 }
 0x15c   :  { %v5523_v1 = vpop.f32.mrf.mxu2  ;;  %v5525_v19 = vpop.f32.mrf.mxu3  ;;  %1646 = vmatpush.msra.mxu3 %v1135_v2 }
 0x15d   :  { %v5529_v32 = vpop.f32.mrf.mxu0  ;;  %v5531_v17 = vpop.f32.mrf.mxu1  ;;  %v538_v61 = vadd.f32 %v5523_v1, %v4933_v34  ;;  %v651_v24 = vadd.f32 %v5525_v19, %v4936_v35  ;;  %8679 = vst [vmem:[#allocation8_spill] sm:$0xff] %v5615_v29  ;;  %v5617_v1 = vmax.f32 %v847_v8, %v849_v7  ;;  %v425_v19 = vadd.f32 %v5497_v47, %v5106_v33 }
 0x15f   :  { %8680 = vst [vmem:[#allocation9_spill] sm:$0xff] %v5617_v1  ;;  %v772_v14 = vmax.f32 %v538_v61, 0.0  ;;  %v773_v12 = vmax.f32 %v651_v24, 0.0  ;;  %v771_v58 = vmax.f32 %v425_v19, 0.0 }
 0x160   :  { %1229 = vmatmul.f32.gmra.mxu0 %v5533_v20  ;;  %1294 = vmatmul.f32.gmra.mxu1 %v5535_v31 }
 0x161   :  { %1359 = vmatmul.f32.gmra.mxu2 %v5533_v20  ;;  %1424 = vmatmul.f32.gmra.mxu3 %v5535_v31 }
 0x164   :  { %v5559_v11 = vpop.f32.mrf.mxu2  ;;  %v5561_v13 = vpop.f32.mrf.mxu3 }
 0x165   :  { %v317_v41 = vpop.f32.mrf.mxu0  ;;  %v430_v9 = vpop.f32.mrf.mxu1  ;;  %v541_v18 = vadd.f32 %v5559_v11, %v4933_v34  ;;  %v654_v45 = vadd.f32 %v5561_v13, %v4936_v35 }
 0x166   :  { %v318_v63 = vadd.f32 %v317_v41, %v5103_v30  ;;  %v431_v39 = vadd.f32 %v430_v9, %v5106_v33  ;;  %v312_v41 = vadd.f32 %v5495_v49, %v5103_v30  ;;  %v1000_v49 = vld [vmem:[%s8590_s3 + $0x330] sm:$0xff] }
 0x167   :  { %1580 = vmatpush.msra.mxu2 %v1000_v49  ;;  %v776_v49 = vmax.f32 %v541_v18, 0.0  ;;  %v777_v57 = vmax.f32 %v654_v45, 0.0  ;;  %v1071_v18 = vld [vmem:[%s8590_s3 + $0x568] sm:$0xff] }
 0x168   :  { %1232 = vmatmul.f32.gmra.mxu0 %v5573_v28  ;;  %1297 = vmatmul.f32.gmra.mxu1 %v5575_v46  ;;  %v778_v9 = vmax.f32 %v318_v63, 0.0  ;;  %v779_v25 = vmax.f32 %v431_v39, 0.0  ;;  %v770_v47 = vmax.f32 %v312_v41, 0.0  ;;  %v1126_v63 = vld [vmem:[%s8590_s3 + $0x720] sm:$0xff] }
 0x169   :  { %1362 = vmatmul.f32.gmra.mxu2 %v5573_v28  ;;  %1427 = vmatmul.f32.gmra.mxu3 %v5575_v46 }
 0x16a   :  { %v850_v8 = vmax.f32 %v770_v47, %v778_v9  ;;  %v851_v61 = vmax.f32 %v771_v58, %v779_v25  ;;  %1581 = vmatpush.msra.mxu2 %v991_v3  ;;  %1647 = vmatpush.msra.mxu3 %v1126_v63  ;;  %v1108_v25 = vld [vmem:[%s8590_s3 + $0x690] sm:$0xff] }
 0x16b   :  { %1523 = vmatpush.msra.mxu1 %v1071_v18  ;;  %v1045_v18 = vld [vmem:[%s8590_s3 + $0x498] sm:$0xff] }
 0x16c   :  { %v543_v10 = vpop.f32.mrf.mxu2  ;;  %v656_v53 = vpop.f32.mrf.mxu3  ;;  %1582 = vmatpush.msra.mxu2 %v982_v15  ;;  %v927_v15 = vld [vmem:[%s8590_s3 + $0xe8] sm:$0xff] }
 0x16d   :  { %v544_v5 = vadd.f32 %v543_v10, %v4933_v34  ;;  %v657_v62 = vadd.f32 %v656_v53, %v4936_v35  ;;  %v320_v6 = vpop.f32.mrf.mxu0  ;;  %v433_v38 = vpop.f32.mrf.mxu1  ;;  %v315_v10 = vadd.f32 %v5529_v32, %v5103_v30  ;;  %1458 = vmatpush.msra.mxu0 %v927_v15  ;;  %v901_v15 = vld [vmem:[%s8590_s3 + $0x18] sm:$0xff] }
 0x16e   :  { %v321_v24 = vadd.f32 %v320_v6, %v5103_v30  ;;  %v434_v11 = vadd.f32 %v433_v38, %v5106_v33  ;;  %v428_v6 = vadd.f32 %v5531_v17, %v5106_v33 }
 0x16f   :  { %v780_v23 = vmax.f32 %v544_v5, 0.0  ;;  %v781_v60 = vmax.f32 %v657_v62, 0.0  ;;  %v774_v47 = vmax.f32 %v315_v10, 0.0  ;;  %v1090_v10 = vld [vmem:[%s8590_s3 + $0x600] sm:$0xff] }
 0x170   :  { %1235 = vmatmul.f32.gmra.mxu0 %v5615_v29  ;;  %1300 = vmatmul.f32.gmra.mxu1 %v5617_v1  ;;  %v783_v17 = vmax.f32 %v434_v11, 0.0  ;;  %v775_v3 = vmax.f32 %v428_v6, 0.0  ;;  %v937_v6 = vld [vmem:[%s8590_s3 + $0x138] sm:$0xff] }
 0x171   :  { %1365 = vmatmul.f32.gmra.mxu2 %v5615_v29  ;;  %1430 = vmatmul.f32.gmra.mxu3 %v5617_v1  ;;  %v852_v44 = vmax.f32 %v772_v14, %v780_v23  ;;  %v853_v7 = vmax.f32 %v773_v12, %v781_v60  ;;  %v973_v23 = vld [vmem:[%s8590_s3 + $0x258] sm:$0xff]  ;;  %v782_v14 = vmax.f32 %v321_v24, 0.0  ;;  %v964_v12 = vld [vmem:[%s8590_s3 + $0x210] sm:$0xff] }
 0x172   :  { %v1117_v60 = vld [vmem:[%s8590_s3 + $0x6d8] sm:$0xff]  ;;  %1583 = vmatpush.msra.mxu2 %v973_v23  ;;  %v928_v23 = vld [vmem:[%s8590_s3 + $0xf0] sm:$0xff] }
 0x173   :  { %v5665_v38 = vmax.f32 %v850_v8, %v852_v44  ;;  %v5667_v19 = vmax.f32 %v851_v61, %v853_v7  ;;  %1648 = vmatpush.msra.mxu3 %v1117_v60  ;;  %v955_v44 = vld [vmem:[%s8590_s3 + $0x1c8] sm:$0xff]  ;;  %v854_v45 = vmax.f32 %v774_v47, %v782_v14  ;;  %v855_v8 = vmax.f32 %v775_v3, %v783_v17  ;;  %v1072_v60 = vld [vmem:[%s8590_s3 + $0x570] sm:$0xff] }
 0x174   :  { %v546_v39 = vpop.f32.mrf.mxu2  ;;  %v659_v13 = vpop.f32.mrf.mxu3  ;;  %v1099_v7 = vld [vmem:[%s8590_s3 + $0x648] sm:$0xff]  ;;  %1584 = vmatpush.msra.mxu2 %v964_v12  ;;  %v900_v14 = vld [vmem:[%s8590_s3 + $0x10] sm:$0xff] }
 0x175   :  { %v547_v53 = vadd.f32 %v546_v39, %v4933_v34  ;;  %v660_v41 = vadd.f32 %v659_v13, %v4936_v35  ;;  %v5659_v5 = vpop.f32.mrf.mxu0  ;;  %v5661_v62 = vpop.f32.mrf.mxu1  ;;  %8681 = vst [vmem:[#allocation10_spill] sm:$0xff] %v5667_v19  ;;  %1649 = vmatpush.msra.mxu3 %v1108_v25  ;;  %v918_v39 = vld [vmem:[%s8590_s3 + $0xa0] sm:$0xff]  ;;  %v1044_v17 = vld [vmem:[%s8590_s3 + $0x490] sm:$0xff]  ;;  %v919_v47 = vld [vmem:[%s8590_s3 + $0xa8] sm:$0xff] }
 0x176   :  { %1585 = vmatpush.msra.mxu2 %v955_v44  ;;  %v946_v13 = vld [vmem:[%s8590_s3 + $0x180] sm:$0xff]  ;;  %1459 = vmatpush.msra.mxu0 %v918_v39  ;;  %v1063_v3 = vld [vmem:[%s8590_s3 + $0x528] sm:$0xff] }
 0x177   :  { %v784_v32 = vmax.f32 %v547_v53, 0.0  ;;  %v785_v9 = vmax.f32 %v660_v41, 0.0  ;;  %1650 = vmatpush.msra.mxu3 %v1099_v7  ;;  %v1062_v53 = vld [vmem:[%s8590_s3 + $0x520] sm:$0xff]  ;;  %v909_v41 = vld [vmem:[%s8590_s3 + $0x58] sm:$0xff] }
 0x178   :  { %1238 = vmatmul.f32.gmra.mxu0 %v5665_v38  ;;  %1303 = vmatmul.f32.gmra.mxu1 %v5667_v19 }
 0x179   :  { %1368 = vmatmul.f32.gmra.mxu2 %v5665_v38  ;;  %1433 = vmatmul.f32.gmra.mxu3 %v5667_v19  ;;  %v856_v2 = vmax.f32 %v776_v49, %v784_v32  ;;  %v857_v58 = vmax.f32 %v777_v57, %v785_v9  ;;  %v1081_v32 = vld [vmem:[%s8590_s3 + $0x5b8] sm:$0xff] }
 0x17a   :  { %1586 = vmatpush.msra.mxu2 %v946_v13  ;;  %1651 = vmatpush.msra.mxu3 %v1090_v10  ;;  %v1053_v9 = vld [vmem:[%s8590_s3 + $0x4d8] sm:$0xff] }
 0x17b   :  { %v5701_v24 = vmax.f32 %v854_v45, %v856_v2  ;;  %v5703_v11 = vmax.f32 %v855_v8, %v857_v58  ;;  %1524 = vmatpush.msra.mxu1 %v1062_v53  ;;  %1460 = vmatpush.msra.mxu0 %v909_v41  ;;  %v910_v2 = vld [vmem:[%s8590_s3 + $0x60] sm:$0xff]  ;;  %v324_v45 = vadd.f32 %v5659_v5, %v5103_v30 }
 0x17c   :  { %v549_v63 = vpop.f32.mrf.mxu2  ;;  %v662_v22 = vpop.f32.mrf.mxu3  ;;  %1587 = vmatpush.msra.mxu2 %v937_v6  ;;  %1652 = vmatpush.msra.mxu3 %v1081_v32  ;;  %v1054_v58 = vld [vmem:[%s8590_s3 + $0x4e0] sm:$0xff]  ;;  %v437_v8 = vadd.f32 %v5661_v62, %v5106_v33 }
 0x17d   :  { %v5697_v4 = vpop.f32.mrf.mxu0  ;;  %v5699_v61 = vpop.f32.mrf.mxu1  ;;  %8682 = vst [vmem:[#allocation11_spill] sm:$0xff] %v5701_v24  ;;  %1525 = vmatpush.msra.mxu1 %v1053_v9  ;;  %1461 = vmatpush.msra.mxu0 %v900_v14  ;;  %v550_v39 = vadd.f32 %v549_v63, %v4933_v34  ;;  %v663_v13 = vadd.f32 %v662_v22, %v4936_v35 }
 0x17e   :  { %8683 = vst [vmem:[#allocation12_spill] sm:$0xff] %v5703_v11  ;;  %1588 = vmatpush.msra.mxu2 %v928_v23  ;;  %1653 = vmatpush.msra.mxu3 %v1072_v60  ;;  %v786_v60 = vmax.f32 %v324_v45, 0.0  ;;  %v787_v62 = vmax.f32 %v437_v8, 0.0 }
 0x17f   :  { %1526 = vmatpush.msra.mxu1 %v1044_v17  ;;  %v788_v14 = vmax.f32 %v550_v39, 0.0  ;;  %v789_v17 = vmax.f32 %v663_v13, 0.0 }
 0x180   :  { %1241 = vmatmul.f32.gmra.mxu0 %v5701_v24  ;;  %1306 = vmatmul.f32.gmra.mxu1 %v5703_v11 }
 0x181   :  { %1371 = vmatmul.f32.gmra.mxu2 %v5701_v24  ;;  %1436 = vmatmul.f32.gmra.mxu3 %v5703_v11 }
 0x182   :  { %1589 = vmatpush.msra.mxu2 %v919_v47  ;;  %1654 = vmatpush.msra.mxu3 %v1063_v3 }
 0x184   :  { %v552_v49 = vpop.f32.mrf.mxu2  ;;  %v665_v57 = vpop.f32.mrf.mxu3  ;;  %1590 = vmatpush.msra.mxu2 %v910_v2  ;;  %1655 = vmatpush.msra.mxu3 %v1054_v58 }
 0x185   :  { %v329_v12 = vpop.f32.mrf.mxu0  ;;  %v442_v25 = vpop.f32.mrf.mxu1 }
 0x186   :  { %v330_v44 = vadd.f32 %v329_v12, %v5103_v30  ;;  %v443_v7 = vadd.f32 %v442_v25, %v5106_v33  ;;  %1591 = vmatpush.msra.mxu2 %v901_v15  ;;  %1656 = vmatpush.msra.mxu3 %v1045_v18  ;;  %v553_v15 = vadd.f32 %v552_v49, %v4933_v34 }
 0x187   :  { %v666_v18 = vadd.f32 %v665_v57, %v4936_v35 }
 0x188   :  { %v794_v10 = vmax.f32 %v330_v44, 0.0  ;;  %v795_v53 = vmax.f32 %v443_v7, 0.0  ;;  %v327_v44 = vadd.f32 %v5697_v4, %v5103_v30  ;;  %v440_v7 = vadd.f32 %v5699_v61, %v5106_v33 }
 0x189   :  { %v792_v49 = vmax.f32 %v553_v15, 0.0  ;;  %v793_v57 = vmax.f32 %v666_v18, 0.0  ;;  %v1019_v15 = vld [vmem:[%s8590_s3 + $0x3c8] sm:$0xff] }
 0x18a   :  { %v858_v25 = vmax.f32 %v786_v60, %v794_v10  ;;  %v859_v22 = vmax.f32 %v787_v62, %v795_v53  ;;  %v790_v4 = vmax.f32 %v327_v44, 0.0  ;;  %v791_v61 = vmax.f32 %v440_v7, 0.0  ;;  %v1163_v18 = vld [vmem:[%s8590_s3 + $0x848] sm:$0xff] }
 0x18c   :  { %v555_v41 = vpop.f32.mrf.mxu2  ;;  %v668_v6 = vpop.f32.mrf.mxu3 }
 0x18d   :  { %v556_v32 = vadd.f32 %v555_v41, %v4933_v34  ;;  %v669_v9 = vadd.f32 %v668_v6, %v4936_v35  ;;  %v332_v5 = vpop.f32.mrf.mxu0  ;;  %v445_v23 = vpop.f32.mrf.mxu1 }
 0x18e   :  { %v333_v2 = vadd.f32 %v332_v5, %v5103_v30  ;;  %v446_v58 = vadd.f32 %v445_v23, %v5106_v33 }
 0x18f   :  { %v796_v12 = vmax.f32 %v556_v32, 0.0  ;;  %v797_v63 = vmax.f32 %v669_v9, 0.0 }
 0x190   :  { %v798_v10 = vmax.f32 %v333_v2, 0.0  ;;  %v799_v53 = vmax.f32 %v446_v58, 0.0 }
 0x191   :  { %v860_v47 = vmax.f32 %v788_v14, %v796_v12  ;;  %v861_v3 = vmax.f32 %v789_v17, %v797_v63 }
 0x192   :  { %v862_v5 = vmax.f32 %v790_v4, %v798_v10  ;;  %v863_v23 = vmax.f32 %v791_v61, %v799_v53 }
 0x193   :  { %v5781_v45 = vmax.f32 %v858_v25, %v860_v47  ;;  %v5783_v8 = vmax.f32 %v859_v22, %v861_v3  ;;  %v1028_v47 = vld [vmem:[%s8590_s3 + $0x410] sm:$0xff] }
 0x194   :  { %v558_v39 = vpop.f32.mrf.mxu2  ;;  %v671_v13 = vpop.f32.mrf.mxu3  ;;  %v1172_v3 = vld [vmem:[%s8590_s3 + $0x890] sm:$0xff] }
 0x195   :  { %8684 = vst [vmem:[#allocation13_spill] sm:$0xff] %v5781_v45  ;;  %v559_v41 = vadd.f32 %v558_v39, %v4933_v34  ;;  %v672_v6 = vadd.f32 %v671_v13, %v4936_v35  ;;  %1244 = vmatmul.f32.gmra.mxu0 %v5781_v45  ;;  %1309 = vmatmul.f32.gmra.mxu1 %v5783_v8  ;;  %v5789_v30 = vpop.f32.mrf.mxu0  ;;  %v5791_v33 = vpop.f32.mrf.mxu1  ;;  %v1037_v34 = vld [vmem:[%s8590_s3 + $0x458] sm:$0xff] }
 0x196   :  { %8685 = vst [vmem:[#allocation14_spill] sm:$0xff] %v5783_v8  ;;  %1374 = vmatmul.f32.gmra.mxu2 %v5781_v45  ;;  %1439 = vmatmul.f32.gmra.mxu3 %v5783_v8  ;;  %v1181_v35 = vld [vmem:[%s8590_s3 + $0x8d8] sm:$0xff] }
 0x197   :  { %v800_v32 = vmax.f32 %v559_v41, 0.0  ;;  %v801_v9 = vmax.f32 %v672_v6, 0.0  ;;  %1706 = vmatpush.msrb.mxu0 %v1037_v34  ;;  %1771 = vmatpush.msrb.mxu1 %v1181_v35  ;;  %v1010_v41 = vld [vmem:[%s8590_s3 + $0x380] sm:$0xff] }
 0x198   :  { %v1154_v6 = vld [vmem:[%s8590_s3 + $0x800] sm:$0xff] }
 0x199   :  { %v864_v60 = vmax.f32 %v792_v49, %v800_v32  ;;  %v865_v62 = vmax.f32 %v793_v57, %v801_v9  ;;  %1707 = vmatpush.msrb.mxu0 %v1028_v47  ;;  %1772 = vmatpush.msrb.mxu1 %v1172_v3  ;;  %v1001_v49 = vld [vmem:[%s8590_s3 + $0x338] sm:$0xff] }
 0x19a   :  { %v1145_v57 = vld [vmem:[%s8590_s3 + $0x7b8] sm:$0xff] }
 0x19b   :  { %v5801_v14 = vmax.f32 %v862_v5, %v864_v60  ;;  %v5803_v17 = vmax.f32 %v863_v23, %v865_v62  ;;  %1708 = vmatpush.msrb.mxu0 %v1019_v15  ;;  %1773 = vmatpush.msrb.mxu1 %v1163_v18  ;;  %v992_v60 = vld [vmem:[%s8590_s3 + $0x2f0] sm:$0xff] }
 0x19c   :  { %v5805_v12 = vpop.f32.mrf.mxu2  ;;  %v5807_v63 = vpop.f32.mrf.mxu3  ;;  %v1136_v62 = vld [vmem:[%s8590_s3 + $0x770] sm:$0xff] }
 0x19d   :  { %1247 = vmatmul.f32.gmra.mxu0 %v5801_v14  ;;  %1312 = vmatmul.f32.gmra.mxu1 %v5803_v17  ;;  %v5811_v25 = vpop.f32.mrf.mxu0  ;;  %v5813_v22 = vpop.f32.mrf.mxu1 }
 0x19e   :  { %1377 = vmatmul.f32.gmra.mxu2 %v5801_v14  ;;  %1442 = vmatmul.f32.gmra.mxu3 %v5803_v17 }
 0x19f   :  { %1709 = vmatpush.msrb.mxu0 %v1010_v41  ;;  %1774 = vmatpush.msrb.mxu1 %v1154_v6  ;;  %v983_v41 = vld [vmem:[%s8590_s3 + $0x2a8] sm:$0xff] }
 0x1a0   :  { %v1127_v6 = vld [vmem:[%s8590_s3 + $0x728] sm:$0xff] }
 0x1a1   :  { %1710 = vmatpush.msrb.mxu0 %v1001_v49  ;;  %1775 = vmatpush.msrb.mxu1 %v1145_v57 }
 0x1a3   :  { %1711 = vmatpush.msrb.mxu0 %v992_v60  ;;  %1776 = vmatpush.msrb.mxu1 %v1136_v62 }
 0x1a4   :  { %v5823_v2 = vpop.f32.mrf.mxu2  ;;  %v5825_v58 = vpop.f32.mrf.mxu3 }
 0x1a5   :  { %1462 = vmatmul.f32.vlgmr.msra.gmra.mxu0 %v5294_v40  ;;  %1527 = vmatmul.f32.vlgmr.msra.gmra.mxu1 %v5297_v36  ;;  %v5829_v44 = vpop.f32.mrf.mxu0  ;;  %v5831_v7 = vpop.f32.mrf.mxu1 }
 0x1a6   :  { %1592 = vmatmul.f32.vlgmr.msra.gmra.mxu2 %v5294_v40  ;;  %1657 = vmatmul.f32.vlgmr.msra.gmra.mxu3 %v5297_v36 }
 0x1a7   :  { %1712 = vmatpush.msrb.mxu0 %v983_v41  ;;  %1777 = vmatpush.msrb.mxu1 %v1127_v6  ;;  %v974_v41 = vld [vmem:[%s8590_s3 + $0x260] sm:$0xff] }
 0x1a8   :  { %v1118_v6 = vld [vmem:[%s8590_s3 + $0x6e0] sm:$0xff] }
 0x1a9   :  { %1713 = vmatpush.msrb.mxu0 %v974_v41  ;;  %1778 = vmatpush.msrb.mxu1 %v1118_v6  ;;  %v1109_v41 = vld [vmem:[%s8590_s3 + $0x698] sm:$0xff] }
 0x1ab   :  { %1779 = vmatpush.msrb.mxu1 %v1109_v41 }
 0x1ac   :  { %v5841_v39 = vpop.f32.mrf.mxu2  ;;  %v5843_v13 = vpop.f32.mrf.mxu3 }
 0x1ad   :  { %8686 = vst [vmem:[#allocation15_spill] sm:$0xff] %v5841_v39  ;;  %1465 = vmatmul.f32.gmra.mxu0 %v5326_v16  ;;  %1530 = vmatmul.f32.gmra.mxu1 %v5329_v27  ;;  %v5847_v10 = vpop.f32.mrf.mxu0  ;;  %v5849_v53 = vpop.f32.mrf.mxu1  ;;  %v986_v39 = vld [vmem:[%s8590_s3 + $0x2c0] sm:$0xff] }
 0x1ae   :  { %8687 = vst [vmem:[#allocation16_spill] sm:$0xff] %v5843_v13  ;;  %1595 = vmatmul.f32.gmra.mxu2 %v5326_v16  ;;  %1660 = vmatmul.f32.gmra.mxu3 %v5329_v27 }
 0x1b4   :  { %v5859_v4 = vpop.f32.mrf.mxu2  ;;  %v5861_v61 = vpop.f32.mrf.mxu3 }
 0x1b5   :  { %8688 = vst [vmem:[#allocation17_spill] sm:$0xff] %v5859_v4  ;;  %1468 = vmatmul.f32.gmra.mxu0 %v5362_v42  ;;  %1533 = vmatmul.f32.gmra.mxu1 %v5365_v37  ;;  %v5865_v34 = vpop.f32.mrf.mxu0  ;;  %v5867_v35 = vpop.f32.mrf.mxu1 }
 0x1b6   :  { %8689 = vst [vmem:[#allocation18_spill] sm:$0xff] %v5861_v61  ;;  %1598 = vmatmul.f32.gmra.mxu2 %v5362_v42  ;;  %1663 = vmatmul.f32.gmra.mxu3 %v5365_v37  ;;  %v1057_v61 = vld [vmem:[%s8590_s3 + $0x4f8] sm:$0xff] }
 0x1b7   :  { %8690 = vst [vmem:[#allocation19_spill] sm:$0xff] %v5865_v34  ;;  %v1129_v34 = vld [vmem:[%s8590_s3 + $0x738] sm:$0xff] }
 0x1b8   :  { %8691 = vst [vmem:[#allocation20_spill] sm:$0xff] %v5867_v35 }
 0x1bc   :  { %v5877_v32 = vpop.f32.mrf.mxu2  ;;  %v5879_v9 = vpop.f32.mrf.mxu3 }
 0x1bd   :  { %8692 = vst [vmem:[#allocation21_spill] sm:$0xff] %v5877_v32  ;;  %1471 = vmatmul.f32.gmra.mxu0 %v5382_v51  ;;  %1536 = vmatmul.f32.gmra.mxu1 %v5385_v52  ;;  %v5883_v5 = vpop.f32.mrf.mxu0  ;;  %v5885_v23 = vpop.f32.mrf.mxu1 }
 0x1be   :  { %8693 = vst [vmem:[#allocation22_spill] sm:$0xff] %v5879_v9  ;;  %1601 = vmatmul.f32.gmra.mxu2 %v5382_v51  ;;  %1666 = vmatmul.f32.gmra.mxu3 %v5385_v52 }
 0x1bf   :  { %8694 = vst [vmem:[#allocation23_spill] sm:$0xff] %v5883_v5 }
 0x1c0   :  { %8695 = vst [vmem:[#allocation24_spill] sm:$0xff] %v5885_v23 }
 0x1c4   :  { %v5895_v47 = vpop.f32.mrf.mxu2  ;;  %v5897_v3 = vpop.f32.mrf.mxu3 }
 0x1c5   :  { %8696 = vst [vmem:[#allocation25_spill] sm:$0xff] %v5895_v47  ;;  %1474 = vmatmul.f32.gmra.mxu0 %v5173_v54  ;;  %1539 = vmatmul.f32.gmra.mxu1 %v5175_v55  ;;  %v5901_v15 = vpop.f32.mrf.mxu0  ;;  %v5903_v18 = vpop.f32.mrf.mxu1 }
 0x1c6   :  { %8697 = vst [vmem:[#allocation26_spill] sm:$0xff] %v5897_v3  ;;  %1604 = vmatmul.f32.gmra.mxu2 %v5173_v54  ;;  %1669 = vmatmul.f32.gmra.mxu3 %v5175_v55  ;;  %v1011_v3 = vld [vmem:[%s8590_s3 + $0x388] sm:$0xff] }
 0x1c7   :  { %8698 = vst [vmem:[#allocation27_spill] sm:$0xff] %v5901_v15 }
 0x1c8   :  { %8699 = vst [vmem:[#allocation28_spill] sm:$0xff] %v5903_v18  ;;  %v965_v18 = vld [vmem:[%s8590_s3 + $0x218] sm:$0xff] }
 0x1c9   :  { %1714 = vmatpush.msrb.mxu0 %v965_v18  ;;  %v1100_v18 = vld [vmem:[%s8590_s3 + $0x650] sm:$0xff] }
 0x1ca   :  { %1780 = vmatpush.msrb.mxu1 %v1100_v18  ;;  %v1029_v18 = vld [vmem:[%s8590_s3 + $0x418] sm:$0xff] }
 0x1cc   :  { %v5913_v49 = vpop.f32.mrf.mxu2  ;;  %v5915_v57 = vpop.f32.mrf.mxu3 }
 0x1cd   :  { %8700 = vst [vmem:[#allocation29_spill] sm:$0xff] %v5913_v49  ;;  %1477 = vmatmul.f32.gmra.mxu0 %v5220_v43  ;;  %1542 = vmatmul.f32.gmra.mxu1 %v5222_v48  ;;  %v5921_v60 = vpop.f32.mrf.mxu0  ;;  %v5923_v62 = vpop.f32.mrf.mxu1 }
 0x1ce   :  { %8701 = vst [vmem:[#allocation30_spill] sm:$0xff] %v5915_v57  ;;  %1607 = vmatmul.f32.gmra.mxu2 %v5220_v43  ;;  %1672 = vmatmul.f32.gmra.mxu3 %v5222_v48 }
 0x1cf   :  { %8702 = vst [vmem:[#allocation31_spill] sm:$0xff] %v5921_v60 }
 0x1d0   :  { %8703 = vst [vmem:[#allocation32_spill] sm:$0xff] %v5923_v62  ;;  %v947_v62 = vld [vmem:[%s8590_s3 + $0x188] sm:$0xff] }
 0x1d4   :  { %v5931_v57 = vpop.f32.mrf.mxu2  ;;  %v5933_v49 = vpop.f32.mrf.mxu3 }
 0x1d5   :  { %8704 = vst [vmem:[#allocation33_spill] sm:$0xff] %v5931_v57  ;;  %1480 = vmatmul.f32.gmra.mxu0 %v5281_v21  ;;  %1545 = vmatmul.f32.gmra.mxu1 %v5283_v26  ;;  %v5945_v6 = vpop.f32.mrf.mxu0  ;;  %v956_v57 = vld [vmem:[%s8590_s3 + $0x1d0] sm:$0xff] }
 0x1d6   :  { %8705 = vst [vmem:[#allocation34_spill] sm:$0xff] %v5933_v49  ;;  %1610 = vmatmul.f32.gmra.mxu2 %v5281_v21  ;;  %1675 = vmatmul.f32.gmra.mxu3 %v5283_v26  ;;  %v5947_v49 = vpop.f32.mrf.mxu1 }
 0x1d7   :  { %8706 = vst [vmem:[#allocation35_spill] sm:$0xff] %v5945_v6  ;;  %1715 = vmatpush.msrb.mxu0 %v956_v57  ;;  %v1182_v57 = vld [vmem:[%s8590_s3 + $0x8e0] sm:$0xff] }
 0x1d8   :  { %8707 = vst [vmem:[#allocation36_spill] sm:$0xff] %v5947_v49  ;;  %1901 = vmatpush.msrb.mxu3 %v1182_v57 }
 0x1d9   :  { %1716 = vmatpush.msrb.mxu0 %v947_v62  ;;  %v993_v62 = vld [vmem:[%s8590_s3 + $0x2f8] sm:$0xff] }
 0x1dc   :  { %v5959_v41 = vpop.f32.mrf.mxu2  ;;  %v5961_v6 = vpop.f32.mrf.mxu3 }
 0x1dd   :  { %1483 = vmatmul.f32.gmra.mxu0 %v5303_v59  ;;  %1548 = vmatmul.f32.gmra.mxu1 %v5305_v0  ;;  %8708 = vst [vmem:[#allocation37_spill] sm:$0xff] %v5959_v41  ;;  %v5963_v49 = vpop.f32.mrf.mxu0  ;;  %v1038_v41 = vld [vmem:[%s8590_s3 + $0x460] sm:$0xff] }
 0x1de   :  { %1613 = vmatmul.f32.gmra.mxu2 %v5303_v59  ;;  %1678 = vmatmul.f32.gmra.mxu3 %v5305_v0  ;;  %8709 = vst [vmem:[#allocation38_spill] sm:$0xff] %v5961_v6  ;;  %v5965_v15 = vpop.f32.mrf.mxu1  ;;  %v1173_v6 = vld [vmem:[%s8590_s3 + $0x898] sm:$0xff] }
 0x1df   :  { %8710 = vst [vmem:[#allocation39_spill] sm:$0xff] %v5963_v49  ;;  %1836 = vmatpush.msrb.mxu2 %v1038_v41  ;;  %v1164_v49 = vld [vmem:[%s8590_s3 + $0x850] sm:$0xff]  ;;  %v1091_v41 = vld [vmem:[%s8590_s3 + $0x608] sm:$0xff]  ;;  %1902 = vmatpush.msrb.mxu3 %v1173_v6  ;;  %v1137_v6 = vld [vmem:[%s8590_s3 + $0x778] sm:$0xff] }
 0x1e0   :  { %8711 = vst [vmem:[#allocation40_spill] sm:$0xff] %v5965_v15  ;;  %v1020_v15 = vld [vmem:[%s8590_s3 + $0x3d0] sm:$0xff]  ;;  %1781 = vmatpush.msrb.mxu1 %v1091_v41 }
 0x1e1   :  { %1837 = vmatpush.msrb.mxu2 %v1029_v18  ;;  %1903 = vmatpush.msrb.mxu3 %v1164_v49  ;;  %v1146_v49 = vld [vmem:[%s8590_s3 + $0x7c0] sm:$0xff] }
 0x1e3   :  { %1838 = vmatpush.msrb.mxu2 %v1020_v15  ;;  %v1002_v15 = vld [vmem:[%s8590_s3 + $0x340] sm:$0xff] }
 0x1e4   :  { %v5995_v57 = vpop.f32.mrf.mxu2  ;;  %v5997_v60 = vpop.f32.mrf.mxu3 }
 0x1e5   :  { %1486 = vmatmul.f32.gmra.mxu0 %v5499_v50  ;;  %1551 = vmatmul.f32.gmra.mxu1 %v5501_v56  ;;  %8712 = vst [vmem:[#allocation41_spill] sm:$0xff] %v5995_v57  ;;  %v5999_v9 = vpop.f32.mrf.mxu0  ;;  %v1155_v57 = vld [vmem:[%s8590_s3 + $0x808] sm:$0xff] }
 0x1e6   :  { %1616 = vmatmul.f32.gmra.mxu2 %v5499_v50  ;;  %1681 = vmatmul.f32.gmra.mxu3 %v5501_v56  ;;  %8713 = vst [vmem:[#allocation42_spill] sm:$0xff] %v5997_v60  ;;  %v6001_v32 = vpop.f32.mrf.mxu1 }
 0x1e7   :  { %8714 = vst [vmem:[#allocation43_spill] sm:$0xff] %v5999_v9  ;;  %1839 = vmatpush.msrb.mxu2 %v1011_v3  ;;  %1904 = vmatpush.msrb.mxu3 %v1155_v57  ;;  %v938_v3 = vld [vmem:[%s8590_s3 + $0x140] sm:$0xff]  ;;  %v1101_v9 = vld [vmem:[%s8590_s3 + $0x658] sm:$0xff] }
 0x1e8   :  { %8715 = vst [vmem:[#allocation44_spill] sm:$0xff] %v6001_v32  ;;  %v1082_v57 = vld [vmem:[%s8590_s3 + $0x5c0] sm:$0xff]  ;;  %v984_v32 = vld [vmem:[%s8590_s3 + $0x2b0] sm:$0xff]  ;;  %1717 = vmatpush.msrb.mxu0 %v938_v3  ;;  %v1119_v3 = vld [vmem:[%s8590_s3 + $0x6e8] sm:$0xff] }
 0x1e9   :  { %1840 = vmatpush.msrb.mxu2 %v1002_v15  ;;  %1905 = vmatpush.msrb.mxu3 %v1146_v49  ;;  %v1128_v15 = vld [vmem:[%s8590_s3 + $0x730] sm:$0xff] }
 0x1ea   :  { %1782 = vmatpush.msrb.mxu1 %v1082_v57  ;;  %v966_v57 = vld [vmem:[%s8590_s3 + $0x220] sm:$0xff] }
 0x1eb   :  { %1841 = vmatpush.msrb.mxu2 %v993_v62  ;;  %1906 = vmatpush.msrb.mxu3 %v1137_v6  ;;  %v975_v6 = vld [vmem:[%s8590_s3 + $0x268] sm:$0xff] }
 0x1ec   :  { %v6025_v18 = vpop.f32.mrf.mxu2  ;;  %v6027_v41 = vpop.f32.mrf.mxu3 }
 0x1ed   :  { %1489 = vmatmul.f32.gmra.mxu0 %v5533_v20  ;;  %1554 = vmatmul.f32.gmra.mxu1 %v5535_v31  ;;  %8716 = vst [vmem:[#allocation45_spill] sm:$0xff] %v6025_v18  ;;  %v6043_v49 = vpop.f32.mrf.mxu0  ;;  %v929_v18 = vld [vmem:[%s8590_s3 + $0xf8] sm:$0xff] }
 0x1ee   :  { %1619 = vmatmul.f32.gmra.mxu2 %v5533_v20  ;;  %1684 = vmatmul.f32.gmra.mxu3 %v5535_v31  ;;  %8717 = vst [vmem:[#allocation46_spill] sm:$0xff] %v6027_v41  ;;  %v6045_v62 = vpop.f32.mrf.mxu1  ;;  %v1110_v41 = vld [vmem:[%s8590_s3 + $0x6a0] sm:$0xff] }
 0x1ef   :  { %8718 = vst [vmem:[#allocation47_spill] sm:$0xff] %v6043_v49  ;;  %1842 = vmatpush.msrb.mxu2 %v984_v32  ;;  %1907 = vmatpush.msrb.mxu3 %v1128_v15  ;;  %v1073_v32 = vld [vmem:[%s8590_s3 + $0x578] sm:$0xff]  ;;  %v1056_v49 = vld [vmem:[%s8590_s3 + $0x4f0] sm:$0xff] }
 0x1f0   :  { %8719 = vst [vmem:[#allocation48_spill] sm:$0xff] %v6045_v62  ;;  %v957_v15 = vld [vmem:[%s8590_s3 + $0x1d8] sm:$0xff]  ;;  %1718 = vmatpush.msrb.mxu0 %v929_v18  ;;  %1783 = vmatpush.msrb.mxu1 %v1073_v32  ;;  %v1092_v18 = vld [vmem:[%s8590_s3 + $0x610] sm:$0xff] }
 0x1f1   :  { %1843 = vmatpush.msrb.mxu2 %v975_v6  ;;  %1908 = vmatpush.msrb.mxu3 %v1119_v3  ;;  %v948_v3 = vld [vmem:[%s8590_s3 + $0x190] sm:$0xff] }
 0x1f2   :  { %v920_v62 = vld [vmem:[%s8590_s3 + $0xb0] sm:$0xff] }
 0x1f3   :  { %1844 = vmatpush.msrb.mxu2 %v966_v57  ;;  %1909 = vmatpush.msrb.mxu3 %v1110_v41  ;;  %v939_v57 = vld [vmem:[%s8590_s3 + $0x148] sm:$0xff] }
 0x1f4   :  { %v6073_v6 = vpop.f32.mrf.mxu2  ;;  %v6075_v41 = vpop.f32.mrf.mxu3  ;;  %1719 = vmatpush.msrb.mxu0 %v920_v62  ;;  %v902_v62 = vld [vmem:[%s8590_s3 + $0x20] sm:$0xff] }
 0x1f5   :  { %1492 = vmatmul.f32.gmra.mxu0 %v5573_v28  ;;  %1557 = vmatmul.f32.gmra.mxu1 %v5575_v46  ;;  %8720 = vst [vmem:[#allocation49_spill] sm:$0xff] %v6073_v6  ;;  %v6090_v32 = vpop.f32.mrf.mxu0  ;;  %v1083_v6 = vld [vmem:[%s8590_s3 + $0x5c8] sm:$0xff] }
 0x1f6   :  { %1622 = vmatmul.f32.gmra.mxu2 %v5573_v28  ;;  %1687 = vmatmul.f32.gmra.mxu3 %v5575_v46  ;;  %8721 = vst [vmem:[#allocation50_spill] sm:$0xff] %v6075_v41  ;;  %v6092_v41 = vpop.f32.mrf.mxu1 }
 0x1f7   :  { %1845 = vmatpush.msrb.mxu2 %v957_v15  ;;  %1910 = vmatpush.msrb.mxu3 %v1101_v9  ;;  %8722 = vst [vmem:[#allocation51_spill] sm:$0xff] %v6090_v32  ;;  %v1064_v9 = vld [vmem:[%s8590_s3 + $0x530] sm:$0xff]  ;;  %v911_v15 = vld [vmem:[%s8590_s3 + $0x68] sm:$0xff]  ;;  %v930_v32 = vld [vmem:[%s8590_s3 + $0x100] sm:$0xff] }
 0x1f8   :  { %8723 = vst [vmem:[#allocation52_spill] sm:$0xff] %v6092_v41  ;;  %1784 = vmatpush.msrb.mxu1 %v1064_v9  ;;  %v1055_v41 = vld [vmem:[%s8590_s3 + $0x4e8] sm:$0xff]  ;;  %1720 = vmatpush.msrb.mxu0 %v911_v15  ;;  %v912_v15 = vld [vmem:[%s8590_s3 + $0x70] sm:$0xff] }
 0x1f9   :  { %1846 = vmatpush.msrb.mxu2 %v948_v3  ;;  %1911 = vmatpush.msrb.mxu3 %v1092_v18  ;;  %v1074_v3 = vld [vmem:[%s8590_s3 + $0x580] sm:$0xff]  ;;  %v1065_v18 = vld [vmem:[%s8590_s3 + $0x538] sm:$0xff] }
 0x1fa   :  { %1785 = vmatpush.msrb.mxu1 %v1055_v41  ;;  %v921_v41 = vld [vmem:[%s8590_s3 + $0xb8] sm:$0xff]  ;;  %1721 = vmatpush.msrb.mxu0 %v902_v62 }
 0x1fb   :  { %1847 = vmatpush.msrb.mxu2 %v939_v57  ;;  %1912 = vmatpush.msrb.mxu3 %v1083_v6  ;;  %v1046_v6 = vld [vmem:[%s8590_s3 + $0x4a0] sm:$0xff] }
 0x1fc   :  { %v6131_v57 = vpop.f32.mrf.mxu2  ;;  %v6133_v9 = vpop.f32.mrf.mxu3  ;;  %1786 = vmatpush.msrb.mxu1 %v1046_v6 }
 0x1fd   :  { %1495 = vmatmul.f32.gmra.mxu0 %v5615_v29  ;;  %1560 = vmatmul.f32.gmra.mxu1 %v5617_v1  ;;  %8724 = vst [vmem:[#allocation53_spill] sm:$0xff] %v6131_v57  ;;  %v6141_v60 = vpop.f32.mrf.mxu0 }
 0x1fe   :  { %1625 = vmatmul.f32.gmra.mxu2 %v5615_v29  ;;  %1690 = vmatmul.f32.gmra.mxu3 %v5617_v1  ;;  %8725 = vst [vmem:[#allocation54_spill] sm:$0xff] %v6133_v9  ;;  %v6143_v47 = vpop.f32.mrf.mxu1 }
 0x1ff   :  { %1848 = vmatpush.msrb.mxu2 %v930_v32  ;;  %1913 = vmatpush.msrb.mxu3 %v1074_v3  ;;  %8726 = vst [vmem:[#allocation55_spill] sm:$0xff] %v6141_v60  ;;  %v903_v32 = vld [vmem:[%s8590_s3 + $0x28] sm:$0xff] }
 0x200   :  { %8727 = vst [vmem:[#allocation56_spill] sm:$0xff] %v6143_v47  ;;  %v1047_v3 = vld [vmem:[%s8590_s3 + $0x4a8] sm:$0xff] }
 0x201   :  { %1849 = vmatpush.msrb.mxu2 %v921_v41  ;;  %1914 = vmatpush.msrb.mxu3 %v1065_v18  ;;  %v1147_v60 = vld [vmem:[%s8590_s3 + $0x7c8] sm:$0xff] }
 0x203   :  { %1850 = vmatpush.msrb.mxu2 %v912_v15  ;;  %1915 = vmatpush.msrb.mxu3 %v1056_v49 }
 0x204   :  { %v6155_v62 = vpop.f32.mrf.mxu2  ;;  %v6157_v49 = vpop.f32.mrf.mxu3 }
 0x205   :  { %1498 = vmatmul.f32.gmra.mxu0 %v5665_v38  ;;  %1563 = vmatmul.f32.gmra.mxu1 %v5667_v19  ;;  %8728 = vst [vmem:[#allocation57_spill] sm:$0xff] %v6155_v62  ;;  %v1165_v62 = vld [vmem:[%s8590_s3 + $0x858] sm:$0xff] }
 0x206   :  { %1628 = vmatmul.f32.gmra.mxu2 %v5665_v38  ;;  %1693 = vmatmul.f32.gmra.mxu3 %v5667_v19  ;;  %8729 = vst [vmem:[#allocation58_spill] sm:$0xff] %v6157_v49  ;;  %v1021_v49 = vld [vmem:[%s8590_s3 + $0x3d8] sm:$0xff] }
 0x207   :  { %1851 = vmatpush.msrb.mxu2 %v903_v32  ;;  %1916 = vmatpush.msrb.mxu3 %v1047_v3 }
 0x20d   :  { %1501 = vmatmul.f32.gmra.mxu0 %v5701_v24  ;;  %1566 = vmatmul.f32.gmra.mxu1 %v5703_v11 }
 0x20e   :  { %1631 = vmatmul.f32.gmra.mxu2 %v5701_v24  ;;  %1696 = vmatmul.f32.gmra.mxu3 %v5703_v11 }
 0x212   :  { %v6159_v6 = vpop.f32.mrf.mxu0  ;;  %v6161_v41 = vpop.f32.mrf.mxu1 }
 0x213   :  { %8730 = vst [vmem:[#allocation59_spill] sm:$0xff] %v6159_v6  ;;  %v1183_v6 = vld [vmem:[%s8590_s3 + $0x8e8] sm:$0xff] }
 0x214   :  { %8731 = vst [vmem:[#allocation60_spill] sm:$0xff] %v6161_v41  ;;  %v1039_v41 = vld [vmem:[%s8590_s3 + $0x468] sm:$0xff]  ;;  %2031 = vmatpush.msra.mxu1 %v1183_v6  ;;  %v1030_v6 = vld [vmem:[%s8590_s3 + $0x420] sm:$0xff] }
 0x215   :  { %1504 = vmatmul.f32.gmra.mxu0 %v5781_v45  ;;  %1569 = vmatmul.f32.gmra.mxu1 %v5783_v8 }
 0x216   :  { %1634 = vmatmul.f32.gmra.mxu2 %v5781_v45  ;;  %1699 = vmatmul.f32.gmra.mxu3 %v5783_v8 }
 0x217   :  { %1966 = vmatpush.msra.mxu0 %v1039_v41  ;;  %v1174_v41 = vld [vmem:[%s8590_s3 + $0x8a0] sm:$0xff] }
 0x218   :  { %2032 = vmatpush.msra.mxu1 %v1174_v41 }
 0x219   :  { %v1375_v18 = vpop.f32.mrf.mxu2  ;;  %v1440_v15 = vpop.f32.mrf.mxu3  ;;  %1967 = vmatpush.msra.mxu0 %v1030_v6 }
 0x21a   :  { %v6167_v32 = vadd.f32 %v1440_v15, %v1375_v18  ;;  %v6169_v3 = vpop.f32.mrf.mxu0  ;;  %v6171_v9 = vpop.f32.mrf.mxu1  ;;  %2033 = vmatpush.msra.mxu1 %v1165_v62 }
 0x21b   :  { %8733 = vst [vmem:[#allocation62_spill] sm:$0xff] %v6169_v3  ;;  %1968 = vmatpush.msra.mxu0 %v1021_v49  ;;  %v1012_v49 = vld [vmem:[%s8590_s3 + $0x390] sm:$0xff] }
 0x21c   :  { %8732 = vst [vmem:[#allocation61_spill] sm:$0xff] %v6167_v32 }
 0x21d   :  { %8734 = vst [vmem:[#allocation63_spill] sm:$0xff] %v6171_v9  ;;  %1507 = vmatmul.f32.gmra.mxu0 %v5801_v14  ;;  %1572 = vmatmul.f32.gmra.mxu1 %v5803_v17 }
 0x21e   :  { %1637 = vmatmul.f32.gmra.mxu2 %v5801_v14  ;;  %1702 = vmatmul.f32.gmra.mxu3 %v5803_v17 }
 0x21f   :  { %1969 = vmatpush.msra.mxu0 %v1012_v49 }
 0x221   :  { %v1378_v18 = vpop.f32.mrf.mxu2  ;;  %v1443_v15 = vpop.f32.mrf.mxu3 }
 0x222   :  { %v6183_v32 = vadd.f32 %v1443_v15, %v1378_v18  ;;  %v6185_v9 = vpop.f32.mrf.mxu0  ;;  %v6187_v3 = vpop.f32.mrf.mxu1 }
 0x223   :  { %8735 = vst [vmem:[#allocation64_spill] sm:$0xff] %v6185_v9 }
 0x224   :  { %8736 = vst [vmem:[#allocation65_spill] sm:$0xff] %v6187_v3 }
 0x225   :  { %1722 = vmatmul.f32.vlgmr.msrb.gmra.mxu0 %v5294_v40  ;;  %1787 = vmatmul.f32.vlgmr.msrb.gmra.mxu1 %v5297_v36 }
 0x226   :  { %1852 = vmatmul.f32.vlgmr.msrb.gmra.mxu2 %v5294_v40  ;;  %1917 = vmatmul.f32.vlgmr.msrb.gmra.mxu3 %v5297_v36 }
 0x229   :  { %v1593_v18 = vpop.f32.mrf.mxu2  ;;  %v1658_v15 = vpop.f32.mrf.mxu3 }
 0x22a   :  { %v1659_v3 = vadd.f32 %v1658_v15, %v1593_v18  ;;  %v6199_v9 = vpop.f32.mrf.mxu0  ;;  %v6201_v57 = vpop.f32.mrf.mxu1 }
 0x22b   :  { %8737 = vst [vmem:[#allocation66_spill] sm:$0xff] %v6199_v9 }
 0x22c   :  { %8738 = vst [vmem:[#allocation67_spill] sm:$0xff] %v6201_v57  ;;  %v2405_v9 = vrot.slane %v1659_v3, 1  ;;  %v1156_v3 = vld [vmem:[%s8590_s3 + $0x810] sm:$0xff] }
 0x22d   :  { %1725 = vmatmul.f32.gmra.mxu0 %v5326_v16  ;;  %1790 = vmatmul.f32.gmra.mxu1 %v5329_v27 }
 0x22e   :  { %1855 = vmatmul.f32.gmra.mxu2 %v5326_v16  ;;  %1920 = vmatmul.f32.gmra.mxu3 %v5329_v27 }
 0x22f   :  { %2034 = vmatpush.msra.mxu1 %v1156_v3 }
 0x231   :  { %v1596_v6 = vpop.f32.mrf.mxu2  ;;  %v1661_v41 = vpop.f32.mrf.mxu3  ;;  %2035 = vmatpush.msra.mxu1 %v1147_v60  ;;  %v994_v60 = vld [vmem:[%s8590_s3 + $0x300] sm:$0xff] }
 0x232   :  { %v6213_v18 = vadd.f32 %v1661_v41, %v1596_v6  ;;  %v6215_v15 = vpop.f32.mrf.mxu0  ;;  %v6217_v57 = vpop.f32.mrf.mxu1 }
 0x233   :  { %8739 = vst [vmem:[#allocation68_spill] sm:$0xff] %v6215_v15 }
 0x234   :  { %8740 = vst [vmem:[#allocation69_spill] sm:$0xff] %v6217_v57  ;;  %v8596_v47 = vrot.slane %v6213_v18, 1 }
 0x235   :  { %1728 = vmatmul.f32.gmra.mxu0 %v5362_v42  ;;  %1793 = vmatmul.f32.gmra.mxu1 %v5365_v37 }
 0x236   :  { %v6225_v62 = vsel %vm2404_vm2, %v2405_v9, %v8596_v47  ;;  %1858 = vmatmul.f32.gmra.mxu2 %v5362_v42  ;;  %1923 = vmatmul.f32.gmra.mxu3 %v5365_v37  ;;  %v1003_v47 = vld [vmem:[%s8590_s3 + $0x348] sm:$0xff] }
 0x237   :  { %1970 = vmatpush.msra.mxu0 %v1003_v47 }
 0x239   :  { %v1599_v6 = vpop.f32.mrf.mxu2  ;;  %v1664_v41 = vpop.f32.mrf.mxu3  ;;  %1971 = vmatpush.msra.mxu0 %v994_v60 }
 0x23a   :  { %v1665_v57 = vadd.f32 %v1664_v41, %v1599_v6  ;;  %v6235_v15 = vpop.f32.mrf.mxu0  ;;  %v6237_v9 = vpop.f32.mrf.mxu1 }
 0x23b   :  { %8741 = vst [vmem:[#allocation70_spill] sm:$0xff] %v6235_v15 }
 0x23c   :  { %8742 = vst [vmem:[#allocation71_spill] sm:$0xff] %v6237_v9  ;;  %v2414_v15 = vrot.slane %v1665_v57, 1  ;;  %v1138_v57 = vld [vmem:[%s8590_s3 + $0x780] sm:$0xff] }
 0x23d   :  { %1731 = vmatmul.f32.gmra.mxu0 %v5382_v51  ;;  %1796 = vmatmul.f32.gmra.mxu1 %v5385_v52 }
 0x23e   :  { %1861 = vmatmul.f32.gmra.mxu2 %v5382_v51  ;;  %1926 = vmatmul.f32.gmra.mxu3 %v5385_v52 }
 0x23f   :  { %2036 = vmatpush.msra.mxu1 %v1138_v57 }
 0x241   :  { %v1602_v49 = vpop.f32.mrf.mxu2  ;;  %v1667_v3 = vpop.f32.mrf.mxu3  ;;  %2037 = vmatpush.msra.mxu1 %v1129_v34  ;;  %v976_v34 = vld [vmem:[%s8590_s3 + $0x270] sm:$0xff] }
 0x242   :  { %v6249_v6 = vadd.f32 %v1667_v3, %v1602_v49  ;;  %v6251_v41 = vpop.f32.mrf.mxu0  ;;  %v6253_v9 = vpop.f32.mrf.mxu1 }
 0x243   :  { %8744 = vst [vmem:[#allocation73_spill] sm:$0xff] %v6251_v41 }
 0x244   :  { %8743 = vst [vmem:[#allocation72_spill] sm:$0xff] %v6249_v6  ;;  %v8597_v35 = vrot.slane %v6249_v6, 1 }
 0x245   :  { %8745 = vst [vmem:[#allocation74_spill] sm:$0xff] %v6253_v9  ;;  %1734 = vmatmul.f32.gmra.mxu0 %v5173_v54  ;;  %1799 = vmatmul.f32.gmra.mxu1 %v5175_v55 }
 0x246   :  { %v6261_v47 = vsel %vm2404_vm2, %v2414_v15, %v8597_v35  ;;  %1864 = vmatmul.f32.gmra.mxu2 %v5173_v54  ;;  %1929 = vmatmul.f32.gmra.mxu3 %v5175_v55  ;;  %v985_v35 = vld [vmem:[%s8590_s3 + $0x2b8] sm:$0xff] }
 0x247   :  { %8746 = vst [vmem:[#allocation75_spill] sm:$0xff] %v6261_v47  ;;  %1972 = vmatpush.msra.mxu0 %v985_v35 }
 0x249   :  { %v1605_v49 = vpop.f32.mrf.mxu2  ;;  %v1670_v3 = vpop.f32.mrf.mxu3  ;;  %1973 = vmatpush.msra.mxu0 %v976_v34 }
 0x24a   :  { %v1671_v9 = vadd.f32 %v1670_v3, %v1605_v49  ;;  %v6271_v41 = vpop.f32.mrf.mxu0  ;;  %v6273_v15 = vpop.f32.mrf.mxu1 }
 0x24b   :  { %8747 = vst [vmem:[#allocation76_spill] sm:$0xff] %v6271_v41 }
 0x24c   :  { %8748 = vst [vmem:[#allocation77_spill] sm:$0xff] %v6273_v15  ;;  %v2423_v41 = vrot.slane %v1671_v9, 1  ;;  %v1120_v9 = vld [vmem:[%s8590_s3 + $0x6f0] sm:$0xff] }
 0x24d   :  { %1737 = vmatmul.f32.gmra.mxu0 %v5220_v43  ;;  %1802 = vmatmul.f32.gmra.mxu1 %v5222_v48 }
 0x24e   :  { %1867 = vmatmul.f32.gmra.mxu2 %v5220_v43  ;;  %1932 = vmatmul.f32.gmra.mxu3 %v5222_v48 }
 0x24f   :  { %2038 = vmatpush.msra.mxu1 %v1120_v9 }
 0x251   :  { %v1608_v60 = vpop.f32.mrf.mxu2  ;;  %v1673_v57 = vpop.f32.mrf.mxu3 }
 0x252   :  { %v6285_v49 = vadd.f32 %v1673_v57, %v1608_v60  ;;  %v6287_v3 = vpop.f32.mrf.mxu0  ;;  %v6289_v15 = vpop.f32.mrf.mxu1 }
 0x253   :  { %8750 = vst [vmem:[#allocation79_spill] sm:$0xff] %v6287_v3 }
 0x254   :  { %8749 = vst [vmem:[#allocation78_spill] sm:$0xff] %v6285_v49  ;;  %v8598_v23 = vrot.slane %v6285_v49, 1 }
 0x255   :  { %8751 = vst [vmem:[#allocation80_spill] sm:$0xff] %v6289_v15  ;;  %1740 = vmatmul.f32.gmra.mxu0 %v5281_v21  ;;  %1805 = vmatmul.f32.gmra.mxu1 %v5283_v26 }
 0x256   :  { %v6297_v35 = vsel %vm2404_vm2, %v2423_v41, %v8598_v23  ;;  %1870 = vmatmul.f32.gmra.mxu2 %v5281_v21  ;;  %1935 = vmatmul.f32.gmra.mxu3 %v5283_v26  ;;  %v967_v23 = vld [vmem:[%s8590_s3 + $0x228] sm:$0xff] }
 0x257   :  { %8752 = vst [vmem:[#allocation81_spill] sm:$0xff] %v6297_v35  ;;  %v1111_v35 = vld [vmem:[%s8590_s3 + $0x6a8] sm:$0xff]  ;;  %1974 = vmatpush.msra.mxu0 %v967_v23 }
 0x258   :  { %2039 = vmatpush.msra.mxu1 %v1111_v35  ;;  %v1040_v35 = vld [vmem:[%s8590_s3 + $0x470] sm:$0xff] }
 0x259   :  { %v1611_v60 = vpop.f32.mrf.mxu2  ;;  %v1676_v57 = vpop.f32.mrf.mxu3  ;;  %2096 = vmatpush.msra.mxu2 %v1040_v35  ;;  %v1022_v35 = vld [vmem:[%s8590_s3 + $0x3e0] sm:$0xff] }
 0x25a   :  { %v1677_v15 = vadd.f32 %v1676_v57, %v1611_v60  ;;  %v6307_v3 = vpop.f32.mrf.mxu0  ;;  %v6309_v41 = vpop.f32.mrf.mxu1 }
 0x25b   :  { %8753 = vst [vmem:[#allocation82_spill] sm:$0xff] %v6307_v3 }
 0x25c   :  { %8754 = vst [vmem:[#allocation83_spill] sm:$0xff] %v6309_v41  ;;  %v2432_v3 = vrot.slane %v1677_v15, 1  ;;  %v1184_v15 = vld [vmem:[%s8590_s3 + $0x8f0] sm:$0xff] }
 0x25d   :  { %1743 = vmatmul.f32.gmra.mxu0 %v5303_v59  ;;  %1808 = vmatmul.f32.gmra.mxu1 %v5305_v0 }
 0x25e   :  { %1873 = vmatmul.f32.gmra.mxu2 %v5303_v59  ;;  %1938 = vmatmul.f32.gmra.mxu3 %v5305_v0 }
 0x25f   :  { %2161 = vmatpush.msra.mxu3 %v1184_v15  ;;  %v1166_v15 = vld [vmem:[%s8590_s3 + $0x860] sm:$0xff] }
 0x261   :  { %v1614_v34 = vpop.f32.mrf.mxu2  ;;  %v1679_v9 = vpop.f32.mrf.mxu3 }
 0x262   :  { %v6321_v60 = vadd.f32 %v1679_v9, %v1614_v34  ;;  %v6323_v57 = vpop.f32.mrf.mxu0  ;;  %v6325_v41 = vpop.f32.mrf.mxu1  ;;  %v958_v34 = vld [vmem:[%s8590_s3 + $0x1e0] sm:$0xff]  ;;  %v1031_v9 = vld [vmem:[%s8590_s3 + $0x428] sm:$0xff] }
 0x263   :  { %8756 = vst [vmem:[#allocation85_spill] sm:$0xff] %v6323_v57  ;;  %1975 = vmatpush.msra.mxu0 %v958_v34  ;;  %2097 = vmatpush.msra.mxu2 %v1031_v9  ;;  %v949_v34 = vld [vmem:[%s8590_s3 + $0x198] sm:$0xff]  ;;  %v1148_v9 = vld [vmem:[%s8590_s3 + $0x7d0] sm:$0xff] }
 0x264   :  { %8755 = vst [vmem:[#allocation84_spill] sm:$0xff] %v6321_v60  ;;  %v8600_v49 = vrot.slane %v6321_v60, 1 }
 0x265   :  { %8757 = vst [vmem:[#allocation86_spill] sm:$0xff] %v6325_v41  ;;  %1746 = vmatmul.f32.gmra.mxu0 %v5499_v50  ;;  %1811 = vmatmul.f32.gmra.mxu1 %v5501_v56 }
 0x266   :  { %v6333_v23 = vsel %vm2404_vm2, %v2432_v3, %v8600_v49  ;;  %1876 = vmatmul.f32.gmra.mxu2 %v5499_v50  ;;  %1941 = vmatmul.f32.gmra.mxu3 %v5501_v56  ;;  %v1102_v3 = vld [vmem:[%s8590_s3 + $0x660] sm:$0xff]  ;;  %v1175_v49 = vld [vmem:[%s8590_s3 + $0x8a8] sm:$0xff] }
 0x267   :  { %8758 = vst [vmem:[#allocation87_spill] sm:$0xff] %v6333_v23  ;;  %2040 = vmatpush.msra.mxu1 %v1102_v3  ;;  %2162 = vmatpush.msra.mxu3 %v1175_v49  ;;  %v1093_v49 = vld [vmem:[%s8590_s3 + $0x618] sm:$0xff]  ;;  %v1004_v3 = vld [vmem:[%s8590_s3 + $0x350] sm:$0xff] }
 0x268   :  { %2098 = vmatpush.msra.mxu2 %v1022_v35  ;;  %1976 = vmatpush.msra.mxu0 %v949_v34  ;;  %v1139_v34 = vld [vmem:[%s8590_s3 + $0x788] sm:$0xff] }
 0x269   :  { %v1617_v41 = vpop.f32.mrf.mxu2  ;;  %v1682_v57 = vpop.f32.mrf.mxu3  ;;  %2163 = vmatpush.msra.mxu3 %v1166_v15  ;;  %2041 = vmatpush.msra.mxu1 %v1093_v49 }
 0x26a   :  { %v1683_v23 = vadd.f32 %v1682_v57, %v1617_v41  ;;  %v6355_v60 = vpop.f32.mrf.mxu0  ;;  %v6357_v5 = vpop.f32.mrf.mxu1  ;;  %v1013_v41 = vld [vmem:[%s8590_s3 + $0x398] sm:$0xff] }
 0x26b   :  { %8759 = vst [vmem:[#allocation88_spill] sm:$0xff] %v6355_v60  ;;  %v1157_v57 = vld [vmem:[%s8590_s3 + $0x818] sm:$0xff]  ;;  %2099 = vmatpush.msra.mxu2 %v1013_v41 }
 0x26c   :  { %8760 = vst [vmem:[#allocation89_spill] sm:$0xff] %v6357_v5  ;;  %2164 = vmatpush.msra.mxu3 %v1157_v57  ;;  %v995_v5 = vld [vmem:[%s8590_s3 + $0x308] sm:$0xff]  ;;  %v2441_v41 = vrot.slane %v1683_v23, 1 }
 0x26d   :  { %1749 = vmatmul.f32.gmra.mxu0 %v5533_v20  ;;  %1814 = vmatmul.f32.gmra.mxu1 %v5535_v31 }
 0x26e   :  { %1879 = vmatmul.f32.gmra.mxu2 %v5533_v20  ;;  %1944 = vmatmul.f32.gmra.mxu3 %v5535_v31 }
 0x26f   :  { %2100 = vmatpush.msra.mxu2 %v1004_v3  ;;  %2165 = vmatpush.msra.mxu3 %v1148_v9  ;;  %v1121_v3 = vld [vmem:[%s8590_s3 + $0x6f8] sm:$0xff]  ;;  %v940_v9 = vld [vmem:[%s8590_s3 + $0x150] sm:$0xff] }
 0x270   :  { %1977 = vmatpush.msra.mxu0 %v940_v9  ;;  %v959_v9 = vld [vmem:[%s8590_s3 + $0x1e8] sm:$0xff] }
 0x271   :  { %v1620_v35 = vpop.f32.mrf.mxu2  ;;  %v1685_v15 = vpop.f32.mrf.mxu3  ;;  %2101 = vmatpush.msra.mxu2 %v995_v5  ;;  %2166 = vmatpush.msra.mxu3 %v1139_v34  ;;  %v977_v5 = vld [vmem:[%s8590_s3 + $0x278] sm:$0xff]  ;;  %v968_v34 = vld [vmem:[%s8590_s3 + $0x230] sm:$0xff] }
 0x272   :  { %v6393_v49 = vadd.f32 %v1685_v15, %v1620_v35  ;;  %v6395_v60 = vpop.f32.mrf.mxu0  ;;  %v6397_v13 = vpop.f32.mrf.mxu1  ;;  %v1130_v35 = vld [vmem:[%s8590_s3 + $0x740] sm:$0xff]  ;;  %v1084_v15 = vld [vmem:[%s8590_s3 + $0x5d0] sm:$0xff] }
 0x273   :  { %8762 = vst [vmem:[#allocation91_spill] sm:$0xff] %v6395_v60  ;;  %2102 = vmatpush.msra.mxu2 %v986_v39  ;;  %2167 = vmatpush.msra.mxu3 %v1130_v35 }
 0x274   :  { %8761 = vst [vmem:[#allocation90_spill] sm:$0xff] %v6393_v49  ;;  %v8602_v57 = vrot.slane %v6393_v49, 1  ;;  %2042 = vmatpush.msra.mxu1 %v1084_v15  ;;  %v1103_v15 = vld [vmem:[%s8590_s3 + $0x668] sm:$0xff]  ;;  %v913_v49 = vld [vmem:[%s8590_s3 + $0x78] sm:$0xff] }
 0x275   :  { %8763 = vst [vmem:[#allocation92_spill] sm:$0xff] %v6397_v13  ;;  %1752 = vmatmul.f32.gmra.mxu0 %v5573_v28  ;;  %1817 = vmatmul.f32.gmra.mxu1 %v5575_v46 }
 0x276   :  { %v6411_v23 = vsel %vm2404_vm2, %v2441_v41, %v8602_v57  ;;  %1882 = vmatmul.f32.gmra.mxu2 %v5573_v28  ;;  %1947 = vmatmul.f32.gmra.mxu3 %v5575_v46  ;;  %v1112_v41 = vld [vmem:[%s8590_s3 + $0x6b0] sm:$0xff] }
 0x277   :  { %8764 = vst [vmem:[#allocation93_spill] sm:$0xff] %v6411_v23  ;;  %2103 = vmatpush.msra.mxu2 %v977_v5  ;;  %2168 = vmatpush.msra.mxu3 %v1121_v3  ;;  %v931_v5 = vld [vmem:[%s8590_s3 + $0x108] sm:$0xff] }
 0x278   :  { %v1075_v3 = vld [vmem:[%s8590_s3 + $0x588] sm:$0xff]  ;;  %1978 = vmatpush.msra.mxu0 %v931_v5 }
 0x279   :  { %v1623_v39 = vpop.f32.mrf.mxu2  ;;  %v1688_v35 = vpop.f32.mrf.mxu3  ;;  %2104 = vmatpush.msra.mxu2 %v968_v34  ;;  %2169 = vmatpush.msra.mxu3 %v1112_v41  ;;  %v950_v34 = vld [vmem:[%s8590_s3 + $0x1a0] sm:$0xff] }
 0x27a   :  { %v1689_v57 = vadd.f32 %v1688_v35, %v1623_v39  ;;  %v6433_v13 = vpop.f32.mrf.mxu0  ;;  %v6435_v60 = vpop.f32.mrf.mxu1  ;;  %v1094_v41 = vld [vmem:[%s8590_s3 + $0x620] sm:$0xff]  ;;  %v941_v39 = vld [vmem:[%s8590_s3 + $0x158] sm:$0xff]  ;;  %2043 = vmatpush.msra.mxu1 %v1075_v3 }
 0x27b   :  { %8765 = vst [vmem:[#allocation94_spill] sm:$0xff] %v6433_v13  ;;  %2105 = vmatpush.msra.mxu2 %v959_v9  ;;  %2170 = vmatpush.msra.mxu3 %v1103_v15  ;;  %v1085_v35 = vld [vmem:[%s8590_s3 + $0x5d8] sm:$0xff]  ;;  %v1066_v13 = vld [vmem:[%s8590_s3 + $0x540] sm:$0xff] }
 0x27c   :  { %8766 = vst [vmem:[#allocation95_spill] sm:$0xff] %v6435_v60  ;;  %v922_v60 = vld [vmem:[%s8590_s3 + $0xc0] sm:$0xff]  ;;  %2044 = vmatpush.msra.mxu1 %v1066_v13  ;;  %v1076_v13 = vld [vmem:[%s8590_s3 + $0x590] sm:$0xff] }
 0x27d   :  { %1755 = vmatmul.f32.gmra.mxu0 %v5615_v29  ;;  %1820 = vmatmul.f32.gmra.mxu1 %v5617_v1 }
 0x27e   :  { %1885 = vmatmul.f32.gmra.mxu2 %v5615_v29  ;;  %1950 = vmatmul.f32.gmra.mxu3 %v5617_v1 }
 0x27f   :  { %2106 = vmatpush.msra.mxu2 %v950_v34  ;;  %2171 = vmatpush.msra.mxu3 %v1094_v41  ;;  %v2450_v34 = vrot.slane %v1689_v57, 1  ;;  %v1048_v57 = vld [vmem:[%s8590_s3 + $0x4b0] sm:$0xff] }
 0x280   :  { %1979 = vmatpush.msra.mxu0 %v922_v60  ;;  %2045 = vmatpush.msra.mxu1 %v1057_v61  ;;  %v904_v60 = vld [vmem:[%s8590_s3 + $0x30] sm:$0xff]  ;;  %v923_v61 = vld [vmem:[%s8590_s3 + $0xc8] sm:$0xff] }
 0x281   :  { %v1626_v9 = vpop.f32.mrf.mxu2  ;;  %v1691_v15 = vpop.f32.mrf.mxu3  ;;  %2107 = vmatpush.msra.mxu2 %v941_v39  ;;  %2172 = vmatpush.msra.mxu3 %v1085_v35  ;;  %v914_v35 = vld [vmem:[%s8590_s3 + $0x80] sm:$0xff] }
 0x282   :  { %v6471_v23 = vadd.f32 %v1691_v15, %v1626_v9  ;;  %v6473_v5 = vpop.f32.mrf.mxu0  ;;  %v6475_v3 = vpop.f32.mrf.mxu1  ;;  %v932_v9 = vld [vmem:[%s8590_s3 + $0x110] sm:$0xff]  ;;  %1980 = vmatpush.msra.mxu0 %v913_v49  ;;  %v1067_v49 = vld [vmem:[%s8590_s3 + $0x548] sm:$0xff]  ;;  %v1058_v15 = vld [vmem:[%s8590_s3 + $0x500] sm:$0xff]  ;;  %2046 = vmatpush.msra.mxu1 %v1048_v57 }
 0x283   :  { %8768 = vst [vmem:[#allocation97_spill] sm:$0xff] %v6473_v5  ;;  %2108 = vmatpush.msra.mxu2 %v932_v9  ;;  %2173 = vmatpush.msra.mxu3 %v1076_v13  ;;  %v905_v9 = vld [vmem:[%s8590_s3 + $0x38] sm:$0xff] }
 0x284   :  { %8767 = vst [vmem:[#allocation96_spill] sm:$0xff] %v6471_v23  ;;  %v8604_v41 = vrot.slane %v6471_v23, 1  ;;  %1981 = vmatpush.msra.mxu0 %v904_v60  ;;  %v1049_v13 = vld [vmem:[%s8590_s3 + $0x4b8] sm:$0xff] }
 0x285   :  { %8769 = vst [vmem:[#allocation98_spill] sm:$0xff] %v6475_v3  ;;  %1758 = vmatmul.f32.gmra.mxu0 %v5665_v38  ;;  %1823 = vmatmul.f32.gmra.mxu1 %v5667_v19 }
 0x286   :  { %v6501_v39 = vsel %vm2404_vm2, %v2450_v34, %v8604_v41  ;;  %1888 = vmatmul.f32.gmra.mxu2 %v5665_v38  ;;  %1953 = vmatmul.f32.gmra.mxu3 %v5667_v19 }
 0x287   :  { %8770 = vst [vmem:[#allocation99_spill] sm:$0xff] %v6501_v39  ;;  %2109 = vmatpush.msra.mxu2 %v923_v61  ;;  %2174 = vmatpush.msra.mxu3 %v1067_v49 }
 0x289   :  { %v1629_v34 = vpop.f32.mrf.mxu2  ;;  %v1694_v41 = vpop.f32.mrf.mxu3  ;;  %2110 = vmatpush.msra.mxu2 %v914_v35  ;;  %2175 = vmatpush.msra.mxu3 %v1058_v15 }
 0x28a   :  { %v1695_v3 = vadd.f32 %v1694_v41, %v1629_v34  ;;  %v6517_v5 = vpop.f32.mrf.mxu0  ;;  %v6519_v39 = vpop.f32.mrf.mxu1 }
 0x28b   :  { %8771 = vst [vmem:[#allocation100_spill] sm:$0xff] %v6517_v5  ;;  %2111 = vmatpush.msra.mxu2 %v905_v9  ;;  %2176 = vmatpush.msra.mxu3 %v1049_v13 }
 0x28c   :  { %8772 = vst [vmem:[#allocation101_spill] sm:$0xff] %v6519_v39  ;;  %v2459_v35 = vrot.slane %v1695_v3, 1 }
 0x28d   :  { %1761 = vmatmul.f32.gmra.mxu0 %v5701_v24  ;;  %1826 = vmatmul.f32.gmra.mxu1 %v5703_v11 }
 0x28e   :  { %1891 = vmatmul.f32.gmra.mxu2 %v5701_v24  ;;  %1956 = vmatmul.f32.gmra.mxu3 %v5703_v11 }
 0x291   :  { %v1632_v41 = vpop.f32.mrf.mxu2  ;;  %v1697_v60 = vpop.f32.mrf.mxu3 }
 0x292   :  { %v6531_v57 = vadd.f32 %v1697_v60, %v1632_v41  ;;  %v6533_v61 = vpop.f32.mrf.mxu0  ;;  %v6535_v49 = vpop.f32.mrf.mxu1 }
 0x293   :  { %8774 = vst [vmem:[#allocation103_spill] sm:$0xff] %v6533_v61 }
 0x294   :  { %8773 = vst [vmem:[#allocation102_spill] sm:$0xff] %v6531_v57  ;;  %v8605_v15 = vrot.slane %v6531_v57, 1 }
 0x295   :  { %8775 = vst [vmem:[#allocation104_spill] sm:$0xff] %v6535_v49  ;;  %1764 = vmatmul.f32.gmra.mxu0 %v5781_v45  ;;  %1829 = vmatmul.f32.gmra.mxu1 %v5783_v8 }
 0x296   :  { %v6543_v34 = vsel %vm2404_vm2, %v2459_v35, %v8605_v15  ;;  %1894 = vmatmul.f32.gmra.mxu2 %v5781_v45  ;;  %1959 = vmatmul.f32.gmra.mxu3 %v5783_v8  ;;  %v1041_v35 = vld [vmem:[%s8590_s3 + $0x478] sm:$0xff] }
 0x297   :  { %8776 = vst [vmem:[#allocation105_spill] sm:$0xff] %v6543_v34  ;;  %2226 = vmatpush.msrb.mxu0 %v1041_v35 }
 0x299   :  { %v1635_v9 = vpop.f32.mrf.mxu2  ;;  %v1700_v13 = vpop.f32.mrf.mxu3 }
 0x29a   :  { %v1701_v41 = vadd.f32 %v1700_v13, %v1635_v9  ;;  %v6547_v60 = vpop.f32.mrf.mxu0  ;;  %v6549_v3 = vpop.f32.mrf.mxu1  ;;  %v1185_v9 = vld [vmem:[%s8590_s3 + $0x8f8] sm:$0xff] }
 0x29b   :  { %8777 = vst [vmem:[#allocation106_spill] sm:$0xff] %v6547_v60  ;;  %2291 = vmatpush.msrb.mxu1 %v1185_v9 }
 0x29c   :  { %8778 = vst [vmem:[#allocation107_spill] sm:$0xff] %v6549_v3  ;;  %v2468_v61 = vrot.slane %v1701_v41, 1  ;;  %v1176_v41 = vld [vmem:[%s8590_s3 + $0x8b0] sm:$0xff] }
 0x29d   :  { %1767 = vmatmul.f32.gmra.mxu0 %v5801_v14  ;;  %1832 = vmatmul.f32.gmra.mxu1 %v5803_v17 }
 0x29e   :  { %1897 = vmatmul.f32.gmra.mxu2 %v5801_v14  ;;  %1962 = vmatmul.f32.gmra.mxu3 %v5803_v17 }
 0x29f   :  { %2292 = vmatpush.msrb.mxu1 %v1176_v41  ;;  %v1167_v41 = vld [vmem:[%s8590_s3 + $0x868] sm:$0xff] }
 0x2a1   :  { %v1638_v13 = vpop.f32.mrf.mxu2  ;;  %v1703_v15 = vpop.f32.mrf.mxu3  ;;  %2293 = vmatpush.msrb.mxu1 %v1167_v41 }
 0x2a2   :  { %v6561_v3 = vadd.f32 %v1703_v15, %v1638_v13  ;;  %v6563_v60 = vpop.f32.mrf.mxu0  ;;  %v6565_v49 = vpop.f32.mrf.mxu1  ;;  %v1032_v15 = vld [vmem:[%s8590_s3 + $0x430] sm:$0xff] }
 0x2a3   :  { %2227 = vmatpush.msrb.mxu0 %v1032_v15  ;;  %v1023_v15 = vld [vmem:[%s8590_s3 + $0x3e8] sm:$0xff] }
 0x2a4   :  { %8779 = vst [vmem:[#allocation108_spill] sm:$0xff] %v6561_v3  ;;  %v8607_v39 = vrot.slane %v6561_v3, 1 }
 0x2a5   :  { %1982 = vmatmul.f32.vlgmr.msra.gmra.mxu0 %v5294_v40  ;;  %2047 = vmatmul.f32.vlgmr.msra.gmra.mxu1 %v5297_v36 }
 0x2a6   :  { %v6573_v5 = vsel %vm2404_vm2, %v2468_v61, %v8607_v39  ;;  %2112 = vmatmul.f32.vlgmr.msra.gmra.mxu2 %v5294_v40  ;;  %2177 = vmatmul.f32.vlgmr.msra.gmra.mxu3 %v5297_v36 }
 0x2a7   :  { %8780 = vst [vmem:[#allocation109_spill] sm:$0xff] %v6573_v5  ;;  %2228 = vmatpush.msrb.mxu0 %v1023_v15  ;;  %v1014_v15 = vld [vmem:[%s8590_s3 + $0x3a0] sm:$0xff] }
 0x2a9   :  { %v1853_v35 = vpop.f32.mrf.mxu2  ;;  %v1918_v9 = vpop.f32.mrf.mxu3  ;;  %2229 = vmatpush.msrb.mxu0 %v1014_v15  ;;  %v1005_v15 = vld [vmem:[%s8590_s3 + $0x358] sm:$0xff] }
 0x2aa   :  { %v1919_v13 = vadd.f32 %v1918_v9, %v1853_v35  ;;  %v6583_v3 = vpop.f32.mrf.mxu0  ;;  %v6585_v61 = vpop.f32.mrf.mxu1 }
 0x2ab   :  { %2230 = vmatpush.msrb.mxu0 %v1005_v15  ;;  %v996_v15 = vld [vmem:[%s8590_s3 + $0x310] sm:$0xff] }
 0x2ac   :  { %v2411_v57 = vrot.slane %v1919_v13, 1  ;;  %v1158_v13 = vld [vmem:[%s8590_s3 + $0x820] sm:$0xff] }
 0x2ad   :  { %1985 = vmatmul.f32.gmra.mxu0 %v5326_v16  ;;  %2050 = vmatmul.f32.gmra.mxu1 %v5329_v27 }
 0x2ae   :  { %2115 = vmatmul.f32.gmra.mxu2 %v5326_v16  ;;  %2180 = vmatmul.f32.gmra.mxu3 %v5329_v27 }
 0x2af   :  { %2294 = vmatpush.msrb.mxu1 %v1158_v13  ;;  %v1149_v13 = vld [vmem:[%s8590_s3 + $0x7d8] sm:$0xff]  ;;  %2231 = vmatpush.msrb.mxu0 %v996_v15  ;;  %v987_v15 = vld [vmem:[%s8590_s3 + $0x2c8] sm:$0xff] }
 0x2b1   :  { %v1856_v35 = vpop.f32.mrf.mxu2  ;;  %v1921_v9 = vpop.f32.mrf.mxu3  ;;  %2295 = vmatpush.msrb.mxu1 %v1149_v13  ;;  %2232 = vmatpush.msrb.mxu0 %v987_v15  ;;  %v978_v15 = vld [vmem:[%s8590_s3 + $0x280] sm:$0xff] }
 0x2b2   :  { %v6597_v39 = vadd.f32 %v1921_v9, %v1856_v35  ;;  %v6599_v5 = vpop.f32.mrf.mxu0  ;;  %v6601_v34 = vpop.f32.mrf.mxu1 }
 0x2b3   :  { %2233 = vmatpush.msrb.mxu0 %v978_v15  ;;  %v969_v15 = vld [vmem:[%s8590_s3 + $0x238] sm:$0xff] }
 0x2b4   :  { %8781 = vst [vmem:[#allocation110_spill] sm:$0xff] %v6597_v39  ;;  %v8611_v23 = vrot.slane %v6597_v39, 1 }
 0x2b5   :  { %1988 = vmatmul.f32.gmra.mxu0 %v5362_v42  ;;  %2053 = vmatmul.f32.gmra.mxu1 %v5365_v37 }
 0x2b6   :  { %v6609_v4 = vsel %vm2404_vm2, %v2411_v57, %v8611_v23  ;;  %2118 = vmatmul.f32.gmra.mxu2 %v5362_v42  ;;  %2183 = vmatmul.f32.gmra.mxu3 %v5365_v37 }
 0x2b7   :  { %8782 = vst [vmem:[#allocation111_spill] sm:$0xff] %v6609_v4  ;;  %2234 = vmatpush.msrb.mxu0 %v969_v15  ;;  %v960_v15 = vld [vmem:[%s8590_s3 + $0x1f0] sm:$0xff] }
 0x2b9   :  { %v1859_v41 = vpop.f32.mrf.mxu2  ;;  %v1924_v35 = vpop.f32.mrf.mxu3  ;;  %2235 = vmatpush.msrb.mxu0 %v960_v15  ;;  %v951_v15 = vld [vmem:[%s8590_s3 + $0x1a8] sm:$0xff] }
 0x2ba   :  { %v1925_v9 = vadd.f32 %v1924_v35, %v1859_v41  ;;  %v6619_v39 = vpop.f32.mrf.mxu0  ;;  %v6621_v57 = vpop.f32.mrf.mxu1 }
 0x2bb   :  { %2236 = vmatpush.msrb.mxu0 %v951_v15  ;;  %v1086_v15 = vld [vmem:[%s8590_s3 + $0x5e0] sm:$0xff] }
 0x2bd   :  { %1991 = vmatmul.f32.gmra.mxu0 %v5382_v51  ;;  %2056 = vmatmul.f32.gmra.mxu1 %v5385_v52 }
 0x2be   :  { %2121 = vmatmul.f32.gmra.mxu2 %v5382_v51  ;;  %2186 = vmatmul.f32.gmra.mxu3 %v5385_v52  ;;  %v2420_v51 = vrot.slane %v1925_v9, 1  ;;  %v1140_v9 = vld [vmem:[%s8590_s3 + $0x790] sm:$0xff] }
 0x2bf   :  { %2296 = vmatpush.msrb.mxu1 %v1140_v9  ;;  %v1131_v9 = vld [vmem:[%s8590_s3 + $0x748] sm:$0xff] }
 0x2c1   :  { %v1862_v41 = vpop.f32.mrf.mxu2  ;;  %v1927_v35 = vpop.f32.mrf.mxu3  ;;  %2297 = vmatpush.msrb.mxu1 %v1131_v9 }
 0x2c2   :  { %v6633_v23 = vadd.f32 %v1927_v35, %v1862_v41  ;;  %v6635_v4 = vpop.f32.mrf.mxu0  ;;  %v6637_v47 = vpop.f32.mrf.mxu1 }
 0x2c3   :  { %8784 = vst [vmem:[#allocation113_spill] sm:$0xff] %v6635_v4 }
 0x2c4   :  { %8783 = vst [vmem:[#allocation112_spill] sm:$0xff] %v6633_v23  ;;  %v8616_v52 = vrot.slane %v6633_v23, 1 }
 0x2c5   :  { %8785 = vst [vmem:[#allocation114_spill] sm:$0xff] %v6637_v47  ;;  %1994 = vmatmul.f32.gmra.mxu0 %v5173_v54  ;;  %2059 = vmatmul.f32.gmra.mxu1 %v5175_v55 }
 0x2c6   :  { %v6645_v6 = vsel %vm2404_vm2, %v2420_v51, %v8616_v52  ;;  %2124 = vmatmul.f32.gmra.mxu2 %v5173_v54  ;;  %2189 = vmatmul.f32.gmra.mxu3 %v5175_v55 }
 0x2c7   :  { %8786 = vst [vmem:[#allocation115_spill] sm:$0xff] %v6645_v6 }
 0x2c9   :  { %v1865_v13 = vpop.f32.mrf.mxu2  ;;  %v1930_v41 = vpop.f32.mrf.mxu3 }
 0x2ca   :  { %v1931_v35 = vadd.f32 %v1930_v41, %v1865_v13  ;;  %v6655_v23 = vpop.f32.mrf.mxu0  ;;  %v6657_v51 = vpop.f32.mrf.mxu1 }
 0x2cd   :  { %1997 = vmatmul.f32.gmra.mxu0 %v5220_v43  ;;  %2062 = vmatmul.f32.gmra.mxu1 %v5222_v48 }
 0x2ce   :  { %2127 = vmatmul.f32.gmra.mxu2 %v5220_v43  ;;  %2192 = vmatmul.f32.gmra.mxu3 %v5222_v48  ;;  %v2429_v43 = vrot.slane %v1931_v35, 1  ;;  %v1122_v35 = vld [vmem:[%s8590_s3 + $0x700] sm:$0xff] }
 0x2cf   :  { %2298 = vmatpush.msrb.mxu1 %v1122_v35  ;;  %v1113_v35 = vld [vmem:[%s8590_s3 + $0x6b8] sm:$0xff] }
 0x2d1   :  { %v1868_v13 = vpop.f32.mrf.mxu2  ;;  %v1933_v41 = vpop.f32.mrf.mxu3  ;;  %2299 = vmatpush.msrb.mxu1 %v1113_v35 }
 0x2d2   :  { %v6669_v52 = vadd.f32 %v1933_v41, %v1868_v13  ;;  %v6671_v6 = vpop.f32.mrf.mxu0  ;;  %v6673_v47 = vpop.f32.mrf.mxu1 }
 0x2d3   :  { %8788 = vst [vmem:[#allocation117_spill] sm:$0xff] %v6671_v6 }
 0x2d4   :  { %8787 = vst [vmem:[#allocation116_spill] sm:$0xff] %v6669_v52  ;;  %v8620_v48 = vrot.slane %v6669_v52, 1 }
 0x2d5   :  { %8789 = vst [vmem:[#allocation118_spill] sm:$0xff] %v6673_v47  ;;  %2000 = vmatmul.f32.gmra.mxu0 %v5281_v21  ;;  %2065 = vmatmul.f32.gmra.mxu1 %v5283_v26 }
 0x2d6   :  { %v6681_v4 = vsel %vm2404_vm2, %v2429_v43, %v8620_v48  ;;  %2130 = vmatmul.f32.gmra.mxu2 %v5281_v21  ;;  %2195 = vmatmul.f32.gmra.mxu3 %v5283_v26 }
 0x2d7   :  { %8790 = vst [vmem:[#allocation119_spill] sm:$0xff] %v6681_v4 }
 0x2d9   :  { %v1871_v9 = vpop.f32.mrf.mxu2  ;;  %v1936_v13 = vpop.f32.mrf.mxu3 }
 0x2da   :  { %v1937_v41 = vadd.f32 %v1936_v13, %v1871_v9  ;;  %v6691_v52 = vpop.f32.mrf.mxu0  ;;  %v6693_v43 = vpop.f32.mrf.mxu1 }
 0x2dd   :  { %2003 = vmatmul.f32.gmra.mxu0 %v5303_v59  ;;  %2068 = vmatmul.f32.gmra.mxu1 %v5305_v0 }
 0x2de   :  { %2133 = vmatmul.f32.gmra.mxu2 %v5303_v59  ;;  %2198 = vmatmul.f32.gmra.mxu3 %v5305_v0  ;;  %v2438_v59 = vrot.slane %v1937_v41, 1  ;;  %v1104_v41 = vld [vmem:[%s8590_s3 + $0x670] sm:$0xff] }
 0x2df   :  { %2300 = vmatpush.msrb.mxu1 %v1104_v41  ;;  %v1095_v41 = vld [vmem:[%s8590_s3 + $0x628] sm:$0xff] }
 0x2e1   :  { %v1874_v9 = vpop.f32.mrf.mxu2  ;;  %v1939_v13 = vpop.f32.mrf.mxu3  ;;  %2301 = vmatpush.msrb.mxu1 %v1095_v41 }
 0x2e2   :  { %v6705_v48 = vadd.f32 %v1939_v13, %v1874_v9  ;;  %v6707_v4 = vpop.f32.mrf.mxu0  ;;  %v6709_v47 = vpop.f32.mrf.mxu1 }
 0x2e3   :  { %2302 = vmatpush.msrb.mxu1 %v1086_v15  ;;  %v1077_v15 = vld [vmem:[%s8590_s3 + $0x598] sm:$0xff] }
 0x2e4   :  { %8791 = vst [vmem:[#allocation120_spill] sm:$0xff] %v6705_v48  ;;  %v8623_v0 = vrot.slane %v6705_v48, 1 }
 0x2e5   :  { %2006 = vmatmul.f32.gmra.mxu0 %v5499_v50  ;;  %2071 = vmatmul.f32.gmra.mxu1 %v5501_v56 }
 0x2e6   :  { %v6717_v6 = vsel %vm2404_vm2, %v2438_v59, %v8623_v0  ;;  %2136 = vmatmul.f32.gmra.mxu2 %v5499_v50  ;;  %2201 = vmatmul.f32.gmra.mxu3 %v5501_v56 }
 0x2e7   :  { %8792 = vst [vmem:[#allocation121_spill] sm:$0xff] %v6717_v6  ;;  %2303 = vmatpush.msrb.mxu1 %v1077_v15  ;;  %v1059_v15 = vld [vmem:[%s8590_s3 + $0x508] sm:$0xff] }
 0x2e9   :  { %v6727_v35 = vpop.f32.mrf.mxu2  ;;  %v6729_v9 = vpop.f32.mrf.mxu3 }
 0x2ea   :  { %8793 = vst [vmem:[#allocation122_spill] sm:$0xff] %v6727_v35  ;;  %v6731_v59 = vpop.f32.mrf.mxu0  ;;  %v6733_v13 = vpop.f32.mrf.mxu1 }
 0x2eb   :  { %8794 = vst [vmem:[#allocation123_spill] sm:$0xff] %v6729_v9 }
 0x2ed   :  { %2009 = vmatmul.f32.gmra.mxu0 %v5533_v20  ;;  %2074 = vmatmul.f32.gmra.mxu1 %v5535_v31 }
 0x2ee   :  { %2139 = vmatmul.f32.gmra.mxu2 %v5533_v20  ;;  %2204 = vmatmul.f32.gmra.mxu3 %v5535_v31 }
 0x2f1   :  { %v6745_v0 = vpop.f32.mrf.mxu2  ;;  %v6747_v9 = vpop.f32.mrf.mxu3 }
 0x2f2   :  { %8795 = vst [vmem:[#allocation124_spill] sm:$0xff] %v6745_v0  ;;  %v6749_v35 = vpop.f32.mrf.mxu0  ;;  %v6751_v6 = vpop.f32.mrf.mxu1  ;;  %v942_v0 = vld [vmem:[%s8590_s3 + $0x160] sm:$0xff] }
 0x2f3   :  { %8796 = vst [vmem:[#allocation125_spill] sm:$0xff] %v6747_v9  ;;  %2237 = vmatpush.msrb.mxu0 %v942_v0  ;;  %v933_v0 = vld [vmem:[%s8590_s3 + $0x118] sm:$0xff] }
 0x2f4   :  { %8797 = vst [vmem:[#allocation126_spill] sm:$0xff] %v6749_v35 }
 0x2f5   :  { %8798 = vst [vmem:[#allocation127_spill] sm:$0xff] %v6751_v6  ;;  %2012 = vmatmul.f32.gmra.mxu0 %v5573_v28  ;;  %2077 = vmatmul.f32.gmra.mxu1 %v5575_v46 }
 0x2f6   :  { %2142 = vmatmul.f32.gmra.mxu2 %v5573_v28  ;;  %2207 = vmatmul.f32.gmra.mxu3 %v5575_v46 }
 0x2f7   :  { %2238 = vmatpush.msrb.mxu0 %v933_v0  ;;  %v915_v0 = vld [vmem:[%s8590_s3 + $0x88] sm:$0xff] }
 0x2f9   :  { %v6763_v41 = vpop.f32.mrf.mxu2  ;;  %v6765_v9 = vpop.f32.mrf.mxu3 }
 0x2fa   :  { %8799 = vst [vmem:[#allocation128_spill] sm:$0xff] %v6763_v41  ;;  %v6767_v48 = vpop.f32.mrf.mxu0  ;;  %v6769_v6 = vpop.f32.mrf.mxu1  ;;  %v1068_v41 = vld [vmem:[%s8590_s3 + $0x550] sm:$0xff] }
 0x2fb   :  { %8800 = vst [vmem:[#allocation129_spill] sm:$0xff] %v6765_v9  ;;  %v924_v9 = vld [vmem:[%s8590_s3 + $0xd0] sm:$0xff]  ;;  %2304 = vmatpush.msrb.mxu1 %v1068_v41 }
 0x2fc   :  { %8801 = vst [vmem:[#allocation130_spill] sm:$0xff] %v6769_v6  ;;  %2239 = vmatpush.msrb.mxu0 %v924_v9  ;;  %v1050_v9 = vld [vmem:[%s8590_s3 + $0x4c0] sm:$0xff] }
 0x2fd   :  { %2015 = vmatmul.f32.gmra.mxu0 %v5615_v29  ;;  %2080 = vmatmul.f32.gmra.mxu1 %v5617_v1 }
 0x2fe   :  { %2145 = vmatmul.f32.gmra.mxu2 %v5615_v29  ;;  %2210 = vmatmul.f32.gmra.mxu3 %v5617_v1 }
 0x2ff   :  { %2240 = vmatpush.msrb.mxu0 %v915_v0  ;;  %2305 = vmatpush.msrb.mxu1 %v1059_v15 }
 0x301   :  { %v6787_v29 = vpop.f32.mrf.mxu2  ;;  %v6789_v1 = vpop.f32.mrf.mxu3  ;;  %2306 = vmatpush.msrb.mxu1 %v1050_v9 }
 0x302   :  { %8802 = vst [vmem:[#allocation131_spill] sm:$0xff] %v6787_v29  ;;  %v6791_v35 = vpop.f32.mrf.mxu0  ;;  %v6793_v6 = vpop.f32.mrf.mxu1 }
 0x303   :  { %8803 = vst [vmem:[#allocation132_spill] sm:$0xff] %v6789_v1  ;;  %v906_v1 = vld [vmem:[%s8590_s3 + $0x40] sm:$0xff] }
 0x304   :  { %8804 = vst [vmem:[#allocation133_spill] sm:$0xff] %v6791_v35  ;;  %2241 = vmatpush.msrb.mxu0 %v906_v1 }
 0x305   :  { %8805 = vst [vmem:[#allocation134_spill] sm:$0xff] %v6793_v6  ;;  %2018 = vmatmul.f32.gmra.mxu0 %v5665_v38  ;;  %2083 = vmatmul.f32.gmra.mxu1 %v5667_v19 }
 0x306   :  { %2148 = vmatmul.f32.gmra.mxu2 %v5665_v38  ;;  %2213 = vmatmul.f32.gmra.mxu3 %v5667_v19 }
 0x309   :  { %v6811_v41 = vpop.f32.mrf.mxu2  ;;  %v6813_v0 = vpop.f32.mrf.mxu3 }
 0x30a   :  { %8806 = vst [vmem:[#allocation135_spill] sm:$0xff] %v6811_v41  ;;  %v6815_v15 = vpop.f32.mrf.mxu0  ;;  %v6817_v29 = vpop.f32.mrf.mxu1 }
 0x30b   :  { %8807 = vst [vmem:[#allocation136_spill] sm:$0xff] %v6813_v0 }
 0x30c   :  { %8808 = vst [vmem:[#allocation137_spill] sm:$0xff] %v6815_v15 }
 0x30d   :  { %8809 = vst [vmem:[#allocation138_spill] sm:$0xff] %v6817_v29  ;;  %2021 = vmatmul.f32.gmra.mxu0 %v5701_v24  ;;  %2086 = vmatmul.f32.gmra.mxu1 %v5703_v11 }
 0x30e   :  { %2151 = vmatmul.f32.gmra.mxu2 %v5701_v24  ;;  %2216 = vmatmul.f32.gmra.mxu3 %v5703_v11 }
 0x311   :  { %v6823_v6 = vpop.f32.mrf.mxu2  ;;  %v6825_v1 = vpop.f32.mrf.mxu3 }
 0x312   :  { %8810 = vst [vmem:[#allocation139_spill] sm:$0xff] %v6823_v6  ;;  %v6827_v9 = vpop.f32.mrf.mxu0  ;;  %v6829_v41 = vpop.f32.mrf.mxu1 }
 0x313   :  { %8811 = vst [vmem:[#allocation140_spill] sm:$0xff] %v6825_v1 }
 0x314   :  { %8812 = vst [vmem:[#allocation141_spill] sm:$0xff] %v6827_v9 }
 0x315   :  { %8813 = vst [vmem:[#allocation142_spill] sm:$0xff] %v6829_v41  ;;  %2024 = vmatmul.f32.gmra.mxu0 %v5781_v45  ;;  %2089 = vmatmul.f32.gmra.mxu1 %v5783_v8 }
 0x316   :  { %2154 = vmatmul.f32.gmra.mxu2 %v5781_v45  ;;  %2219 = vmatmul.f32.gmra.mxu3 %v5783_v8 }
 0x319   :  { %v1895_v0 = vpop.f32.mrf.mxu2  ;;  %v1960_v24 = vpop.f32.mrf.mxu3 }
 0x31a   :  { %v1768_v35 = vpop.f32.mrf.mxu0  ;;  %v1833_v11 = vpop.f32.mrf.mxu1  ;;  %v1961_v41 = vadd.f32 %v1960_v24, %v1895_v0 }
 0x31b   :  { %v6835_v29 = vadd.f32 %v1833_v11, %v1768_v35 }
 0x31c   :  { %v2474_v15 = vrot.slane %v1961_v41, 1  ;;  %v1272_v41 = vadd.f32 %v5813_v22, %v5811_v25 }
 0x31d   :  { %8814 = vst [vmem:[#allocation143_spill] sm:$0xff] %v6835_v29  ;;  %v8633_v1 = vrot.slane %v6835_v29, 1  ;;  %2027 = vmatmul.f32.gmra.mxu0 %v5801_v14  ;;  %2092 = vmatmul.f32.gmra.mxu1 %v5803_v17 }
 0x31e   :  { %2157 = vmatmul.f32.gmra.mxu2 %v5801_v14  ;;  %2222 = vmatmul.f32.gmra.mxu3 %v5803_v17 }
 0x31f   :  { %v6845_v6 = vadd.f32 %v8633_v1, %v6183_v32 }
 0x321   :  { %8815 = vst [vmem:[#allocation144_spill] sm:$0xff] %v6845_v6  ;;  %v1898_v9 = vpop.f32.mrf.mxu2  ;;  %v1963_v8 = vpop.f32.mrf.mxu3 }
 0x322   :  { %v6847_v11 = vadd.f32 %v1963_v8, %v1898_v9  ;;  %v1983_v35 = vpop.f32.mrf.mxu0  ;;  %v2048_v45 = vpop.f32.mrf.mxu1  ;;  %v1792_v8 = vadd.f32 %v6585_v61, %v6583_v3  ;;  %v8816_v3 = vrot.slane %v6213_v18, 1 }
 0x323   :  { %v2049_v32 = vadd.f32 %v2048_v45, %v1983_v35  ;;  %v6868_v45 = vld [vmem:[%s8592_s4] sm:$0x7]  ;;  %s4541_s4 = smov 96  }
 0x324   :  { %v8636_v19 = vrot.slane %v6847_v11, 1  ;;  %v2528_v61 = vadd.f32 %v8816_v3, %v1272_v41  ;;  %v1399_v41 = vadd.f32 %v5807_v63, %v5805_v12 }
 0x325   :  { %2242 = vmatmul.f32.vlgmr.msrb.gmra.mxu0 %v5294_v40  ;;  %2307 = vmatmul.f32.vlgmr.msrb.gmra.mxu1 %v5297_v36  ;;  %v1269_v40 = vadd.f32 %v5791_v33, %v5789_v30  ;;  %v1789_v36 = vadd.f32 %v6565_v49, %v6563_v60  ;;  %v2409_v33 = vrot.slane %v1792_v8, 1  ;;  %v6879_v49 = vperm.slane %v6868_v45, 0 }
 0x326   :  { %v6855_v29 = vsel %vm2404_vm2, %v2474_v15, %v8636_v19  ;;  %v2622_v15 = vrot.slane %v2049_v32, 2 }
 0x327   :  { %v2525_v30 = vadd.f32 %v6225_v62, %v1269_v40  ;;  %v2408_v60 = vrot.slane %v1789_v36, 1 }
 0x329   :  { %v2113_v24 = vpop.f32.mrf.mxu2  ;;  %v2178_v0 = vpop.f32.mrf.mxu3 }
 0x32a   :  { %v1986_v9 = vpop.f32.mrf.mxu0  ;;  %v2051_v1 = vpop.f32.mrf.mxu1 }
 0x32b   :  { %v2052_v6 = vadd.f32 %v2051_v1, %v1986_v9  ;;  %v2179_v1 = vadd.f32 %v2178_v0, %v2113_v24  ;;  %v6888_v0 = vperm.slane %v6868_v45, 1 }
 0x32d   :  { %v2623_v35 = vrot.slane %v2052_v6, 2  ;;  %2245 = vmatmul.f32.gmra.mxu0 %v5326_v16  ;;  %2310 = vmatmul.f32.gmra.mxu1 %v5329_v27  ;;  %v1402_v16 = vadd.f32 %v5825_v58, %v5823_v2  ;;  %v2410_v27 = vsel %vm2404_vm2, %v2408_v60, %v2409_v33 }
 0x32e   :  { %v2526_v24 = vadd.f32 %v2410_v27, %v1399_v41  ;;  %v8817_v27 = vld [vmem:[#allocation72_spill] sm:$0xff] }
 0x32f   :  { %v2624_v25 = vsel %vm2621_vm3, %v2622_v15, %v2623_v35  ;;  %v6876_v22 = vadd.f32 %v2623_v35, %v2528_v61  ;;  %v2529_v3 = vadd.f32 %v2409_v33, %v1402_v16  ;;  %v2625_v61 = vrot.slane %v2179_v1, 2 }
 0x330   :  { %v2742_v18 = vadd.f32 %v2624_v25, %v2525_v30  ;;  %v1798_v25 = vadd.f32 %v6621_v57, %v6619_v39  ;;  %v1795_v16 = vadd.f32 %v6601_v34, %v6599_v5  ;;  %v8819_v39 = vld [vmem:[#allocation6_spill] sm:$0xff]  ;;  %v8820_v57 = vld [vmem:[#allocation7_spill] sm:$0xff] }
 0x331   :  { %v2116_v9 = vpop.f32.mrf.mxu2  ;;  %v2181_v32 = vpop.f32.mrf.mxu3 }
 0x332   :  { %v2182_v6 = vadd.f32 %v2181_v32, %v2116_v9  ;;  %v1989_v62 = vpop.f32.mrf.mxu0  ;;  %v2054_v8 = vpop.f32.mrf.mxu1  ;;  %v2798_v40 = vadd.f32 %v6879_v49, %v2742_v18  ;;  %v1275_v32 = vadd.f32 %v5831_v7, %v5829_v44  ;;  %v2417_v5 = vrot.slane %v1795_v16, 1 }
 0x333   :  { %v2055_v12 = vadd.f32 %v2054_v8, %v1989_v62 }
 0x334   :  { %v2626_v36 = vrot.slane %v2182_v6, 2  ;;  %v2846_v35 = vmax.f32 %v2798_v40, 0.0  ;;  %v8818_v6 = vrot.slane %v8817_v27, 1 }
 0x335   :  { %2248 = vmatmul.f32.gmra.mxu0 %v5362_v42  ;;  %2313 = vmatmul.f32.gmra.mxu1 %v5365_v37  ;;  %v1278_v42 = vadd.f32 %v5849_v53, %v5847_v10  ;;  %v2631_v8 = vrot.slane %v2055_v12, 2  ;;  %v8821_v10 = vld [vmem:[#allocation75_spill] sm:$0xff] }
 0x336   :  { %v2627_v2 = vsel %vm2621_vm3, %v2625_v61, %v2626_v36  ;;  %v6893_v58 = vadd.f32 %v2626_v36, %v2529_v3  ;;  %v2918_v9 = vrot.slane %v2846_v35, 1  ;;  %v2531_v53 = vadd.f32 %v8821_v10, %v1275_v32 }
 0x337   :  { %v2743_v15 = vadd.f32 %v2627_v2, %v2526_v24  ;;  %v2534_v62 = vadd.f32 %v8818_v6, %v1278_v42  ;;  %v2418_v3 = vrot.slane %v1798_v25, 1 }
 0x338   :  { %v6912_v44 = vmax.f32 %v2846_v35, %v2918_v9  ;;  %v8825_v35 = vld [vmem:[#allocation15_spill] sm:$0xff]  ;;  %v8826_v9 = vld [vmem:[#allocation16_spill] sm:$0xff] }
 0x339   :  { %v2119_v63 = vpop.f32.mrf.mxu2  ;;  %v2184_v30 = vpop.f32.mrf.mxu3  ;;  %v2799_v33 = vadd.f32 %v6888_v0, %v2743_v15  ;;  %v2419_v25 = vsel %vm2404_vm2, %v2417_v5, %v2418_v3 }
 0x33a   :  { %v1992_v60 = vpop.f32.mrf.mxu0  ;;  %v2057_v1 = vpop.f32.mrf.mxu1  ;;  %v2185_v34 = vadd.f32 %v2184_v30, %v2119_v63 }
 0x33b   :  { %v2058_v37 = vadd.f32 %v2057_v1, %v1992_v60  ;;  %v2847_v18 = vmax.f32 %v2799_v33, 0.0  ;;  %v8823_v33 = vld [vmem:[#allocation17_spill] sm:$0xff]  ;;  %v8824_v60 = vld [vmem:[#allocation18_spill] sm:$0xff] }
 0x33c   :  { %v1408_v1 = vadd.f32 %v8824_v60, %v8823_v33  ;;  %v2634_v16 = vrot.slane %v2185_v34, 2  ;;  %v8827_v34 = vld [vmem:[#allocation23_spill] sm:$0xff]  ;;  %v8830_v33 = vld [vmem:[#allocation20_spill] sm:$0xff] }
 0x33d   :  { %v2632_v41 = vrot.slane %v2058_v37, 2  ;;  %2251 = vmatmul.f32.gmra.mxu0 %v8819_v39  ;;  %2316 = vmatmul.f32.gmra.mxu1 %v8820_v57  ;;  %v2919_v40 = vrot.slane %v2847_v18, 1 }
 0x33e   :  { %v2535_v30 = vadd.f32 %v2418_v3, %v1408_v1  ;;  %v1804_v3 = vadd.f32 %v6657_v51, %v6655_v23  ;;  %v8831_v1 = vld [vmem:[#allocation113_spill] sm:$0xff]  ;;  %v8835_v23 = vld [vmem:[#allocation2_spill] sm:$0xff]  ;;  %v8836_v51 = vld [vmem:[#allocation3_spill] sm:$0xff] }
 0x33f   :  { %v2633_v61 = vsel %vm2621_vm3, %v2631_v8, %v2632_v41  ;;  %v6910_v36 = vadd.f32 %v2632_v41, %v2534_v62  ;;  %v6914_v7 = vmax.f32 %v2847_v18, %v2919_v40  ;;  %v1405_v18 = vadd.f32 %v8826_v9, %v8825_v35 }
 0x340   :  { %v2748_v24 = vadd.f32 %v2633_v61, %v2531_v53 }
 0x341   :  { %8822 = vst [vmem:[#allocation72_spill] sm:$0xff] %v6914_v7  ;;  %v2122_v2 = vpop.f32.mrf.mxu2  ;;  %v2187_v15 = vpop.f32.mrf.mxu3  ;;  %v4460_v12 = vpack.i.bf16 %v6914_v7, %v6912_v44  ;;  %v2532_v6 = vadd.f32 %v2419_v25, %v1405_v18  ;;  %v8832_v25 = vld [vmem:[#allocation114_spill] sm:$0xff] }
 0x342   :  { %v2188_v42 = vadd.f32 %v2187_v15, %v2122_v2  ;;  %v2060_v37 = vpop.f32.mrf.mxu1  ;;  %v1995_v32 = vpop.f32.mrf.mxu0  ;;  %v2804_v63 = vadd.f32 %v6879_v49, %v2748_v24 }
 0x343   :  { %4461 = vrot.lane.b32.xlu0 %v4460_v12, %s4541_s4  ;;  %v2061_v57 = vadd.f32 %v2060_v37, %v1995_v32  ;;  %v8829_v12 = vld [vmem:[#allocation19_spill] sm:$0xff]  ;;  %v8833_v37 = vld [vmem:[#allocation78_spill] sm:$0xff] }
 0x344   :  { %v2635_v27 = vrot.slane %v2188_v42, 2  ;;  %v2852_v39 = vmax.f32 %v2804_v63, 0.0  ;;  %v1281_v60 = vadd.f32 %v8830_v33, %v8829_v12  ;;  %v1801_v42 = vadd.f32 %v8832_v25, %v8831_v1  ;;  %v8840_v12 = vld [vmem:[#allocation26_spill] sm:$0xff] }
 0x345   :  { %2254 = vmatmul.f32.gmra.mxu0 %v5173_v54  ;;  %2319 = vmatmul.f32.gmra.mxu1 %v5175_v55  ;;  %v8828_v54 = vld [vmem:[#allocation24_spill] sm:$0xff]  ;;  %v8834_v32 = vrot.slane %v8833_v37, 1  ;;  %v2640_v9 = vrot.slane %v2061_v57, 2 }
 0x346   :  { %v2636_v62 = vsel %vm2621_vm3, %v2634_v16, %v2635_v27  ;;  %v6928_v8 = vadd.f32 %v2635_v27, %v2535_v30  ;;  %v1284_v24 = vadd.f32 %v8828_v54, %v8827_v34  ;;  %v2921_v15 = vrot.slane %v2852_v39, 1  ;;  %v8837_v30 = vld [vmem:[#allocation81_spill] sm:$0xff] }
 0x347   :  { %v2749_v41 = vadd.f32 %v2636_v62, %v2532_v6  ;;  %v2537_v16 = vadd.f32 %v8837_v30, %v1281_v60  ;;  %v2427_v27 = vrot.slane %v1804_v3, 1 }
 0x348   :  { %v2540_v35 = vadd.f32 %v8834_v32, %v1284_v24 }
 0x349   :  { %v2125_v40 = vpop.f32.mrf.mxu2  ;;  %v2190_v10 = vpop.f32.mrf.mxu3  ;;  %v2805_v53 = vadd.f32 %v6888_v0, %v2749_v41  ;;  %v6947_v41 = vmax.f32 %v2852_v39, %v2921_v15  ;;  %v8841_v39 = vld [vmem:[#allocation21_spill] sm:$0xff]  ;;  %v8842_v15 = vld [vmem:[#allocation22_spill] sm:$0xff] }
 0x34a   :  { %v1998_v61 = vpop.f32.mrf.mxu0  ;;  %v2063_v5 = vpop.f32.mrf.mxu1 }
 0x34b   :  { %v2064_v55 = vadd.f32 %v2063_v5, %v1998_v61  ;;  %v2853_v2 = vmax.f32 %v2805_v53, 0.0  ;;  %v2426_v61 = vrot.slane %v1801_v42, 1  ;;  %v2191_v5 = vadd.f32 %v2190_v10, %v2125_v40 }
 0x34d   :  { %v2641_v18 = vrot.slane %v2064_v55, 2  ;;  %2257 = vmatmul.f32.gmra.mxu0 %v8835_v23  ;;  %2322 = vmatmul.f32.gmra.mxu1 %v8836_v51  ;;  %v2922_v63 = vrot.slane %v2853_v2, 1  ;;  %v8839_v55 = vld [vmem:[#allocation25_spill] sm:$0xff]  ;;  %v2428_v3 = vsel %vm2404_vm2, %v2426_v61, %v2427_v27  ;;  %v2643_v42 = vrot.slane %v2191_v5, 2  ;;  %v8843_v5 = vld [vmem:[#allocation31_spill] sm:$0xff] }
 0x34e   :  { %v1414_v33 = vadd.f32 %v8840_v12, %v8839_v55  ;;  %v8846_v55 = vld [vmem:[#allocation28_spill] sm:$0xff] }
 0x34f   :  { %v2642_v6 = vsel %vm2621_vm3, %v2640_v9, %v2641_v18  ;;  %v6945_v62 = vadd.f32 %v2641_v18, %v2540_v35  ;;  %v6949_v53 = vmax.f32 %v2853_v2, %v2922_v63  ;;  %v1411_v2 = vadd.f32 %v8842_v15, %v8841_v39 }
 0x350   :  { %v2754_v57 = vadd.f32 %v2642_v6, %v2537_v16  ;;  %v2541_v10 = vadd.f32 %v2427_v27, %v1414_v33  ;;  %v1810_v27 = vadd.f32 %v6693_v43, %v6691_v52  ;;  %v8847_v33 = vld [vmem:[#allocation117_spill] sm:$0xff]  ;;  %v8851_v52 = vld [vmem:[#allocation4_spill] sm:$0xff] }
 0x351   :  { %8838 = vst [vmem:[#allocation6_spill] sm:$0xff] %v6949_v53  ;;  %v2128_v34 = vpop.f32.mrf.mxu2  ;;  %v2193_v54 = vpop.f32.mrf.mxu3  ;;  %v4465_v24 = vpack.i.bf16 %v6949_v53, %v6947_v41  ;;  %v2538_v32 = vadd.f32 %v2428_v3, %v1411_v2  ;;  %v8848_v3 = vld [vmem:[#allocation118_spill] sm:$0xff]  ;;  %v8852_v43 = vld [vmem:[#allocation5_spill] sm:$0xff] }
 0x352   :  { %v2194_v60 = vadd.f32 %v2193_v54, %v2128_v34  ;;  %v2066_v1 = vpop.f32.mrf.mxu1  ;;  %v2001_v25 = vpop.f32.mrf.mxu0  ;;  %v2810_v40 = vadd.f32 %v6879_v49, %v2754_v57  ;;  %v8956_v53 = vld [vmem:[#allocation121_spill] sm:$0xff] }
 0x353   :  { %4466 = vrot.lane.b32.xlu0 %v4465_v24, %s4541_s4  ;;  %v2067_v51 = vadd.f32 %v2066_v1, %v2001_v25  ;;  %v8845_v24 = vld [vmem:[#allocation27_spill] sm:$0xff]  ;;  %v8849_v1 = vld [vmem:[#allocation84_spill] sm:$0xff] }
 0x354   :  { %v2644_v37 = vrot.slane %v2194_v60, 2  ;;  %v2858_v23 = vmax.f32 %v2810_v40, 0.0  ;;  %v1287_v12 = vadd.f32 %v8846_v55, %v8845_v24  ;;  %v1807_v60 = vadd.f32 %v8848_v3, %v8847_v33  ;;  %v8856_v24 = vld [vmem:[#allocation34_spill] sm:$0xff] }
 0x355   :  { %2260 = vmatmul.f32.gmra.mxu0 %v5281_v21  ;;  %2325 = vmatmul.f32.gmra.mxu1 %v5283_v26  ;;  %v8844_v21 = vld [vmem:[#allocation32_spill] sm:$0xff]  ;;  %v8850_v25 = vrot.slane %v8849_v1, 1  ;;  %v2649_v15 = vrot.slane %v2067_v51, 2 }
 0x356   :  { %v2645_v35 = vsel %vm2621_vm3, %v2643_v42, %v2644_v37  ;;  %v6963_v9 = vadd.f32 %v2644_v37, %v2541_v10  ;;  %v1290_v57 = vadd.f32 %v8844_v21, %v8843_v5  ;;  %v2924_v54 = vrot.slane %v2858_v23, 1  ;;  %v8853_v10 = vld [vmem:[#allocation87_spill] sm:$0xff] }
 0x357   :  { %v2755_v18 = vadd.f32 %v2645_v35, %v2538_v32  ;;  %v2543_v42 = vadd.f32 %v8853_v10, %v1287_v12  ;;  %v2436_v37 = vrot.slane %v1810_v27, 1 }
 0x358   :  { %v2546_v39 = vadd.f32 %v8850_v25, %v1290_v57 }
 0x359   :  { %v2131_v63 = vpop.f32.mrf.mxu2  ;;  %v2196_v30 = vpop.f32.mrf.mxu3  ;;  %v2811_v16 = vadd.f32 %v6888_v0, %v2755_v18  ;;  %v6982_v18 = vmax.f32 %v2858_v23, %v2924_v54  ;;  %v8857_v23 = vld [vmem:[#allocation29_spill] sm:$0xff]  ;;  %v8858_v54 = vld [vmem:[#allocation30_spill] sm:$0xff] }
 0x35a   :  { %v2004_v6 = vpop.f32.mrf.mxu0  ;;  %v2069_v61 = vpop.f32.mrf.mxu1 }
 0x35b   :  { %v2070_v26 = vadd.f32 %v2069_v61, %v2004_v6  ;;  %v2859_v34 = vmax.f32 %v2811_v16, 0.0  ;;  %v2435_v6 = vrot.slane %v1807_v60, 1  ;;  %v2197_v61 = vadd.f32 %v2196_v30, %v2131_v63 }
 0x35d   :  { %v2650_v2 = vrot.slane %v2070_v26, 2  ;;  %2263 = vmatmul.f32.gmra.mxu0 %v8851_v52  ;;  %2328 = vmatmul.f32.gmra.mxu1 %v8852_v43  ;;  %v2925_v40 = vrot.slane %v2859_v34, 1  ;;  %v8855_v26 = vld [vmem:[#allocation33_spill] sm:$0xff]  ;;  %v2437_v27 = vsel %vm2404_vm2, %v2435_v6, %v2436_v37  ;;  %v2652_v60 = vrot.slane %v2197_v61, 2  ;;  %v8859_v61 = vld [vmem:[#allocation39_spill] sm:$0xff] }
 0x35e   :  { %v1420_v55 = vadd.f32 %v8856_v24, %v8855_v26  ;;  %v8862_v26 = vld [vmem:[#allocation36_spill] sm:$0xff] }
 0x35f   :  { %v2651_v32 = vsel %vm2621_vm3, %v2649_v15, %v2650_v2  ;;  %v6980_v35 = vadd.f32 %v2650_v2, %v2546_v39  ;;  %v6984_v16 = vmax.f32 %v2859_v34, %v2925_v40  ;;  %v1417_v34 = vadd.f32 %v8858_v54, %v8857_v23 }
 0x360   :  { %v2760_v51 = vadd.f32 %v2651_v32, %v2543_v42  ;;  %v2547_v30 = vadd.f32 %v2436_v37, %v1420_v55  ;;  %v1816_v37 = vadd.f32 %v6733_v13, %v6731_v59  ;;  %v1813_v55 = vadd.f32 %v6709_v47, %v6707_v4  ;;  %v8865_v13 = vld [vmem:[#allocation93_spill] sm:$0xff] }
 0x361   :  { %8854 = vst [vmem:[#allocation7_spill] sm:$0xff] %v6984_v16  ;;  %v2134_v5 = vpop.f32.mrf.mxu2  ;;  %v2199_v21 = vpop.f32.mrf.mxu3  ;;  %v4470_v57 = vpack.i.bf16 %v6984_v16, %v6982_v18  ;;  %v2544_v25 = vadd.f32 %v2437_v27, %v1417_v34  ;;  %v8863_v27 = vld [vmem:[#allocation90_spill] sm:$0xff] }
 0x362   :  { %v2200_v12 = vadd.f32 %v2199_v21, %v2134_v5  ;;  %v2072_v33 = vpop.f32.mrf.mxu1  ;;  %v2007_v3 = vpop.f32.mrf.mxu0  ;;  %v2816_v63 = vadd.f32 %v6879_v49, %v2760_v51  ;;  %v2445_v34 = vrot.slane %v1816_v37, 1  ;;  %v2444_v47 = vrot.slane %v1813_v55, 1 }
 0x363   :  { %4471 = vrot.lane.b32.xlu1 %v4470_v57, %s4541_s4  ;;  %v2073_v43 = vadd.f32 %v2072_v33, %v2007_v3  ;;  %v8861_v57 = vld [vmem:[#allocation35_spill] sm:$0xff] }
 0x364   :  { %v2653_v1 = vrot.slane %v2200_v12, 2  ;;  %v2864_v52 = vmax.f32 %v2816_v63, 0.0  ;;  %v1293_v24 = vadd.f32 %v8862_v26, %v8861_v57  ;;  %v8864_v12 = vrot.slane %v8863_v27, 1 }
 0x365   :  { %2266 = vmatmul.f32.gmra.mxu0 %v5499_v50  ;;  %2331 = vmatmul.f32.gmra.mxu1 %v5501_v56  ;;  %v8860_v50 = vld [vmem:[#allocation40_spill] sm:$0xff]  ;;  %v2658_v3 = vrot.slane %v2073_v43, 2  ;;  %v8868_v43 = vld [vmem:[#allocation42_spill] sm:$0xff]  ;;  %v2446_v37 = vsel %vm2404_vm2, %v2444_v47, %v2445_v34 }
 0x366   :  { %v2654_v39 = vsel %vm2621_vm3, %v2652_v60, %v2653_v1  ;;  %v6998_v15 = vadd.f32 %v2653_v1, %v2547_v30  ;;  %v1296_v51 = vadd.f32 %v8860_v50, %v8859_v61  ;;  %v2927_v21 = vrot.slane %v2864_v52, 1  ;;  %v8870_v50 = vld [vmem:[#allocation38_spill] sm:$0xff] }
 0x367   :  { %v2761_v2 = vadd.f32 %v2654_v39, %v2544_v25  ;;  %v2549_v54 = vadd.f32 %v8865_v13, %v1293_v24 }
 0x368   :  { %v2552_v33 = vadd.f32 %v8864_v12, %v1296_v51  ;;  %v7017_v60 = vmax.f32 %v2864_v52, %v2927_v21  ;;  %v8869_v52 = vld [vmem:[#allocation37_spill] sm:$0xff] }
 0x369   :  { %v2137_v40 = vpop.f32.mrf.mxu2  ;;  %v2202_v10 = vpop.f32.mrf.mxu3  ;;  %v2817_v42 = vadd.f32 %v6888_v0, %v2761_v2  ;;  %v1423_v51 = vadd.f32 %v8870_v50, %v8869_v52  ;;  %v8881_v52 = vld [vmem:[#allocation9_spill] sm:$0xff] }
 0x36a   :  { %v2010_v32 = vpop.f32.mrf.mxu0  ;;  %v2075_v6 = vpop.f32.mrf.mxu1  ;;  %v2203_v1 = vadd.f32 %v2202_v10, %v2137_v40 }
 0x36b   :  { %v2076_v56 = vadd.f32 %v2075_v6, %v2010_v32  ;;  %v2865_v5 = vmax.f32 %v2817_v42, 0.0  ;;  %v2550_v21 = vadd.f32 %v2446_v37, %v1423_v51  ;;  %v8882_v51 = vld [vmem:[#allocation99_spill] sm:$0xff] }
 0x36d   :  { %v2659_v23 = vrot.slane %v2076_v56, 2  ;;  %2269 = vmatmul.f32.gmra.mxu0 %v5533_v20  ;;  %2334 = vmatmul.f32.gmra.mxu1 %v5535_v31  ;;  %v2928_v59 = vrot.slane %v2865_v5, 1  ;;  %v8867_v31 = vld [vmem:[#allocation41_spill] sm:$0xff]  ;;  %v2661_v56 = vrot.slane %v2203_v1, 2 }
 0x36e   :  { %v1426_v42 = vadd.f32 %v8868_v43, %v8867_v31  ;;  %v8877_v31 = vld [vmem:[#allocation127_spill] sm:$0xff] }
 0x36f   :  { %v2660_v63 = vsel %vm2621_vm3, %v2658_v3, %v2659_v23  ;;  %v7015_v30 = vadd.f32 %v2659_v23, %v2552_v33  ;;  %v7019_v4 = vmax.f32 %v2865_v5, %v2928_v59  ;;  %v8871_v23 = vld [vmem:[#allocation130_spill] sm:$0xff] }
 0x370   :  { %v2766_v25 = vadd.f32 %v2660_v63, %v2549_v54  ;;  %v2553_v10 = vadd.f32 %v2445_v34, %v1426_v42  ;;  %v1822_v59 = vadd.f32 %v8871_v23, %v6767_v48  ;;  %v8872_v34 = vld [vmem:[#allocation47_spill] sm:$0xff]  ;;  %v8878_v42 = vld [vmem:[#allocation96_spill] sm:$0xff] }
 0x371   :  { %8866 = vst [vmem:[#allocation75_spill] sm:$0xff] %v7019_v4  ;;  %v2140_v39 = vpop.f32.mrf.mxu2  ;;  %v2205_v2 = vpop.f32.mrf.mxu3  ;;  %v4475_v20 = vpack.i.bf16 %v7019_v4, %v7017_v60  ;;  %v8879_v37 = vrot.slane %v8878_v42, 1  ;;  %v8880_v48 = vld [vmem:[#allocation8_spill] sm:$0xff] }
 0x372   :  { %v2206_v32 = vadd.f32 %v2205_v2, %v2140_v39  ;;  %v2078_v6 = vpop.f32.mrf.mxu1  ;;  %v2013_v61 = vpop.f32.mrf.mxu0  ;;  %v2822_v40 = vadd.f32 %v6879_v49, %v2766_v25  ;;  %v8874_v25 = vld [vmem:[#allocation43_spill] sm:$0xff]  ;;  %v8875_v39 = vld [vmem:[#allocation44_spill] sm:$0xff] }
 0x373   :  { %4476 = vrot.lane.b32.xlu1 %v4475_v20, %s4541_s4  ;;  %v2079_v27 = vadd.f32 %v2078_v6, %v2013_v61  ;;  %v1299_v2 = vadd.f32 %v8875_v39, %v8874_v25  ;;  %v8876_v20 = vld [vmem:[#allocation126_spill] sm:$0xff] }
 0x374   :  { %v2662_v5 = vrot.slane %v2206_v32, 2  ;;  %v2870_v55 = vmax.f32 %v2822_v40, 0.0  ;;  %v1819_v43 = vadd.f32 %v8877_v31, %v8876_v20 }
 0x375   :  { %2272 = vmatmul.f32.gmra.mxu0 %v5573_v28  ;;  %2337 = vmatmul.f32.gmra.mxu1 %v5575_v46  ;;  %v8873_v28 = vld [vmem:[#allocation48_spill] sm:$0xff]  ;;  %v2667_v6 = vrot.slane %v2079_v27, 2  ;;  %v2555_v40 = vadd.f32 %v8882_v51, %v1299_v2  ;;  %v8889_v51 = vld [vmem:[#allocation137_spill] sm:$0xff] }
 0x376   :  { %v2663_v57 = vsel %vm2621_vm3, %v2661_v56, %v2662_v5  ;;  %v7033_v26 = vadd.f32 %v2662_v5, %v2553_v10  ;;  %v1302_v63 = vadd.f32 %v8873_v28, %v8872_v34  ;;  %v2930_v1 = vrot.slane %v2870_v55, 1  ;;  %v8884_v34 = vld [vmem:[#allocation49_spill] sm:$0xff]  ;;  %v8885_v28 = vld [vmem:[#allocation50_spill] sm:$0xff] }
 0x377   :  { %v2767_v24 = vadd.f32 %v2663_v57, %v2550_v21  ;;  %v2454_v10 = vrot.slane %v1822_v59, 1 }
 0x378   :  { %v2558_v32 = vadd.f32 %v8879_v37, %v1302_v63  ;;  %v7052_v21 = vmax.f32 %v2870_v55, %v2930_v1  ;;  %v1432_v63 = vadd.f32 %v8885_v28, %v8884_v34  ;;  %v8886_v55 = vld [vmem:[#allocation45_spill] sm:$0xff]  ;;  %v8887_v1 = vld [vmem:[#allocation46_spill] sm:$0xff]  ;;  %v8893_v34 = vld [vmem:[#allocation51_spill] sm:$0xff] }
 0x379   :  { %v2143_v12 = vpop.f32.mrf.mxu2  ;;  %v2208_v33 = vpop.f32.mrf.mxu3  ;;  %v2823_v3 = vadd.f32 %v6888_v0, %v2767_v24  ;;  %v2453_v24 = vrot.slane %v1819_v43, 1  ;;  %v8888_v43 = vld [vmem:[#allocation10_spill] sm:$0xff]  ;;  %v8894_v28 = vld [vmem:[#allocation52_spill] sm:$0xff] }
 0x37a   :  { %v2016_v13 = vpop.f32.mrf.mxu0  ;;  %v2081_v54 = vpop.f32.mrf.mxu1 }
 0x37b   :  { %v2082_v46 = vadd.f32 %v2081_v54, %v2016_v13  ;;  %v2871_v47 = vmax.f32 %v2823_v3, 0.0  ;;  %v2209_v3 = vadd.f32 %v2208_v33, %v2143_v12  ;;  %v2455_v59 = vsel %vm2404_vm2, %v2453_v24, %v2454_v10 }
 0x37c   :  { %v2559_v33 = vadd.f32 %v2454_v10, %v1432_v63  ;;  %v1305_v63 = vadd.f32 %v8894_v28, %v8893_v34  ;;  %v8904_v34 = vld [vmem:[#allocation58_spill] sm:$0xff] }
 0x37d   :  { %v2668_v61 = vrot.slane %v2082_v46, 2  ;;  %2275 = vmatmul.f32.gmra.mxu0 %v8880_v48  ;;  %2340 = vmatmul.f32.gmra.mxu1 %v8881_v52  ;;  %v2931_v50 = vrot.slane %v2871_v47, 1  ;;  %v2670_v2 = vrot.slane %v2209_v3, 2  ;;  %v8891_v3 = vld [vmem:[#allocation55_spill] sm:$0xff] }
 0x37f   :  { %v2669_v56 = vsel %vm2621_vm3, %v2667_v6, %v2668_v61  ;;  %v7050_v5 = vadd.f32 %v2668_v61, %v2558_v32  ;;  %v7054_v57 = vmax.f32 %v2871_v47, %v2931_v50  ;;  %v1429_v47 = vadd.f32 %v8887_v1, %v8886_v55 }
 0x380   :  { %v2772_v27 = vadd.f32 %v2669_v56, %v2555_v40  ;;  %v8890_v40 = vld [vmem:[#allocation138_spill] sm:$0xff] }
 0x381   :  { %8883 = vst [vmem:[#allocation17_spill] sm:$0xff] %v7054_v57  ;;  %v2146_v23 = vpop.f32.mrf.mxu2  ;;  %v2211_v13 = vpop.f32.mrf.mxu3  ;;  %v4480_v54 = vpack.i.bf16 %v7054_v57, %v7052_v21  ;;  %v2556_v31 = vadd.f32 %v2455_v59, %v1429_v47  ;;  %v1828_v10 = vadd.f32 %v8890_v40, %v8889_v51  ;;  %v8895_v59 = vld [vmem:[#allocation133_spill] sm:$0xff] }
 0x382   :  { %v2212_v46 = vadd.f32 %v2211_v13, %v2146_v23  ;;  %v2084_v25 = vpop.f32.mrf.mxu1  ;;  %v2019_v39 = vpop.f32.mrf.mxu0  ;;  %v2828_v12 = vadd.f32 %v6879_v49, %v2772_v27 }
 0x383   :  { %4481 = vrot.lane.b32.xlu2 %v4480_v54, %s4541_s4  ;;  %v2085_v61 = vadd.f32 %v2084_v25, %v2019_v39  ;;  %v8897_v39 = vld [vmem:[#allocation102_spill] sm:$0xff] }
 0x384   :  { %v2671_v20 = vrot.slane %v2212_v46, 2  ;;  %v2876_v6 = vmax.f32 %v2828_v12, 0.0  ;;  %v8896_v46 = vld [vmem:[#allocation134_spill] sm:$0xff]  ;;  %v8898_v55 = vrot.slane %v8897_v39, 1 }
 0x385   :  { %2278 = vmatmul.f32.gmra.mxu0 %v5665_v38  ;;  %2343 = vmatmul.f32.gmra.mxu1 %v8888_v43  ;;  %v8892_v38 = vld [vmem:[#allocation56_spill] sm:$0xff]  ;;  %v1825_v25 = vadd.f32 %v8896_v46, %v8895_v59  ;;  %v2676_v47 = vrot.slane %v2085_v61, 2 }
 0x386   :  { %v2672_v42 = vsel %vm2621_vm3, %v2670_v2, %v2671_v20  ;;  %v7068_v37 = vadd.f32 %v2671_v20, %v2559_v33  ;;  %v1308_v27 = vadd.f32 %v8892_v38, %v8891_v3  ;;  %v2933_v54 = vrot.slane %v2876_v6, 1  ;;  %v8899_v33 = vld [vmem:[#allocation11_spill] sm:$0xff]  ;;  %v8900_v2 = vld [vmem:[#allocation12_spill] sm:$0xff] }
 0x387   :  { %v2773_v32 = vadd.f32 %v2672_v42, %v2556_v31  ;;  %v8901_v31 = vld [vmem:[#allocation105_spill] sm:$0xff]  ;;  %v2463_v42 = vrot.slane %v1828_v10, 1 }
 0x388   :  { %v2564_v1 = vadd.f32 %v8898_v55, %v1308_v27  ;;  %v2561_v43 = vadd.f32 %v8901_v31, %v1305_v63  ;;  %v7087_v51 = vmax.f32 %v2876_v6, %v2933_v54  ;;  %v8905_v6 = vld [vmem:[#allocation53_spill] sm:$0xff]  ;;  %v8906_v54 = vld [vmem:[#allocation54_spill] sm:$0xff] }
 0x389   :  { %v2149_v48 = vpop.f32.mrf.mxu2  ;;  %v2214_v52 = vpop.f32.mrf.mxu3  ;;  %v2829_v50 = vadd.f32 %v6888_v0, %v2773_v32 }
 0x38a   :  { %v2022_v56 = vpop.f32.mrf.mxu0  ;;  %v2087_v24 = vpop.f32.mrf.mxu1 }
 0x38b   :  { %v2088_v23 = vadd.f32 %v2087_v24, %v2022_v56  ;;  %v2877_v13 = vmax.f32 %v2829_v50, 0.0  ;;  %v2462_v56 = vrot.slane %v1825_v25, 1  ;;  %v2215_v24 = vadd.f32 %v2214_v52, %v2149_v48 }
 0x38d   :  { %v2677_v12 = vrot.slane %v2088_v23, 2  ;;  %2281 = vmatmul.f32.gmra.mxu0 %v8899_v33  ;;  %2346 = vmatmul.f32.gmra.mxu1 %v8900_v2  ;;  %v2934_v20 = vrot.slane %v2877_v13, 1  ;;  %v8903_v23 = vld [vmem:[#allocation57_spill] sm:$0xff]  ;;  %v2464_v10 = vsel %vm2404_vm2, %v2462_v56, %v2463_v42  ;;  %v2679_v25 = vrot.slane %v2215_v24, 2  ;;  %v8909_v24 = vld [vmem:[#allocation62_spill] sm:$0xff] }
 0x38e   :  { %v1438_v28 = vadd.f32 %v8904_v34, %v8903_v23 }
 0x38f   :  { %v2678_v32 = vsel %vm2621_vm3, %v2676_v47, %v2677_v12  ;;  %v7085_v50 = vadd.f32 %v2677_v12, %v2564_v1  ;;  %v7089_v40 = vmax.f32 %v2877_v13, %v2934_v20  ;;  %v1435_v13 = vadd.f32 %v8906_v54, %v8905_v6  ;;  %v8907_v1 = vld [vmem:[#allocation13_spill] sm:$0xff]  ;;  %v8908_v47 = vld [vmem:[#allocation14_spill] sm:$0xff] }
 0x390   :  { %v2778_v61 = vadd.f32 %v2678_v32, %v2561_v43  ;;  %v2565_v52 = vadd.f32 %v2463_v42, %v1438_v28  ;;  %v8911_v28 = vld [vmem:[#allocation59_spill] sm:$0xff]  ;;  %v8913_v6 = vld [vmem:[#allocation141_spill] sm:$0xff]  ;;  %v8914_v54 = vld [vmem:[#allocation142_spill] sm:$0xff] }
 0x391   :  { %8902 = vst [vmem:[#allocation18_spill] sm:$0xff] %v7089_v40  ;;  %v2152_v3 = vpop.f32.mrf.mxu2  ;;  %v2217_v38 = vpop.f32.mrf.mxu3  ;;  %v4485_v27 = vpack.i.bf16 %v7089_v40, %v7087_v51  ;;  %v2562_v55 = vadd.f32 %v2464_v10, %v1435_v13  ;;  %v8912_v10 = vld [vmem:[#allocation60_spill] sm:$0xff]  ;;  %v1831_v13 = vadd.f32 %v8914_v54, %v8913_v6  ;;  %v8946_v40 = vld [vmem:[#allocation119_spill] sm:$0xff] }
 0x392   :  { %v2218_v63 = vadd.f32 %v2217_v38, %v2152_v3  ;;  %v2090_v59 = vpop.f32.mrf.mxu1  ;;  %v2025_v46 = vpop.f32.mrf.mxu0  ;;  %v2834_v48 = vadd.f32 %v6879_v49, %v2778_v61  ;;  %v8910_v3 = vld [vmem:[#allocation63_spill] sm:$0xff]  ;;  %v8922_v54 = vld [vmem:[#allocation144_spill] sm:$0xff] }
 0x393   :  { %4486 = vrot.lane.b32.xlu2 %v4485_v27, %s4541_s4  ;;  %v2091_v31 = vadd.f32 %v2090_v59, %v2025_v46  ;;  %v1314_v38 = vadd.f32 %v8910_v3, %v8909_v24 }
 0x394   :  { %v2680_v39 = vrot.slane %v2218_v63, 2  ;;  %v2882_v20 = vmax.f32 %v2834_v48, 0.0  ;;  %v1311_v63 = vadd.f32 %v8912_v10, %v8911_v28  ;;  %v8915_v48 = vld [vmem:[#allocation108_spill] sm:$0xff] }
 0x395   :  { %2284 = vmatmul.f32.gmra.mxu0 %v8907_v1  ;;  %2349 = vmatmul.f32.gmra.mxu1 %v8908_v47  ;;  %v8916_v59 = vrot.slane %v8915_v48, 1 }
 0x396   :  { %v2681_v12 = vsel %vm2621_vm3, %v2679_v25, %v2680_v39  ;;  %v7103_v33 = vadd.f32 %v2680_v39, %v2565_v52  ;;  %v2936_v34 = vrot.slane %v2882_v20, 1  ;;  %v2685_v52 = vrot.slane %v2091_v31, 2 }
 0x397   :  { %v2779_v2 = vadd.f32 %v2681_v12, %v2562_v55  ;;  %v2570_v46 = vadd.f32 %v8916_v59, %v1314_v38  ;;  %v8917_v55 = vld [vmem:[#allocation109_spill] sm:$0xff] }
 0x398   :  { %v2567_v1 = vadd.f32 %v8917_v55, %v1311_v63  ;;  %v8923_v55 = vld [vmem:[#allocation66_spill] sm:$0xff] }
 0x399   :  { %v2155_v43 = vpop.f32.mrf.mxu2  ;;  %v2220_v32 = vpop.f32.mrf.mxu3  ;;  %v2835_v56 = vadd.f32 %v6888_v0, %v2779_v2  ;;  %v7120_v2 = vmax.f32 %v2882_v20, %v2936_v34 }
 0x39a   :  { %v2028_v61 = vpop.f32.mrf.mxu0  ;;  %v2093_v42 = vpop.f32.mrf.mxu1 }
 0x39b   :  { %v2094_v27 = vadd.f32 %v2093_v42, %v2028_v61  ;;  %v2883_v23 = vmax.f32 %v2835_v56, 0.0  ;;  %v2471_v61 = vrot.slane %v1831_v13, 1  ;;  %v2221_v42 = vadd.f32 %v2220_v32, %v2155_v43  ;;  %v8921_v43 = vld [vmem:[#allocation61_spill] sm:$0xff] }
 0x39d   :  { %v2686_v25 = vrot.slane %v2094_v27, 2  ;;  %2287 = vmatmul.f32.gmra.mxu0 %v5801_v14  ;;  %2352 = vmatmul.f32.gmra.mxu1 %v5803_v17  ;;  %v2937_v39 = vrot.slane %v2883_v23, 1  ;;  %v8919_v17 = vld [vmem:[#allocation143_spill] sm:$0xff] }
 0x39e   :  { %v8920_v38 = vrot.slane %v8919_v17, 1  ;;  %v8927_v17 = vld [vmem:[#allocation110_spill] sm:$0xff] }
 0x39f   :  { %v2687_v47 = vsel %vm2621_vm3, %v2685_v52, %v2686_v25  ;;  %v7118_v12 = vadd.f32 %v2686_v25, %v2570_v46  ;;  %v7122_v56 = vmax.f32 %v2883_v23, %v2937_v39  ;;  %v2688_v23 = vrot.slane %v2221_v42, 2 }
 0x3a0   :  { %v2784_v24 = vadd.f32 %v2687_v47, %v2567_v1  ;;  %v2473_v27 = vsel %vm2404_vm2, %v2471_v61, %v8920_v38  ;;  %v8924_v1 = vld [vmem:[#allocation67_spill] sm:$0xff]  ;;  %v8928_v38 = vrot.slane %v8927_v17, 1  ;;  %v8934_v17 = vld [vmem:[#allocation69_spill] sm:$0xff] }
 0x3a1   :  { %8918 = vst [vmem:[#allocation15_spill] sm:$0xff] %v7122_v56  ;;  %v2158_v31 = vpop.f32.mrf.mxu2  ;;  %v2223_v3 = vpop.f32.mrf.mxu3  ;;  %v4490_v14 = vpack.i.bf16 %v7122_v56, %v7120_v2  ;;  %v2568_v32 = vadd.f32 %v2473_v27, %v8921_v43  ;;  %v1532_v47 = vadd.f32 %v8924_v1, %v8923_v55 }
 0x3a2   :  { %v2224_v28 = vadd.f32 %v2223_v3, %v2158_v31  ;;  %v2308_v10 = vpop.f32.mrf.mxu1  ;;  %v2243_v63 = vpop.f32.mrf.mxu0  ;;  %v2840_v20 = vadd.f32 %v6879_v49, %v2784_v24  ;;  %v8925_v31 = vld [vmem:[#allocation64_spill] sm:$0xff]  ;;  %v8926_v3 = vld [vmem:[#allocation65_spill] sm:$0xff] }
 0x3a3   :  { %4491 = vrot.lane.b32.xlu0 %v4490_v14, %s4541_s4  ;;  %v2309_v46 = vadd.f32 %v2308_v10, %v2243_v63  ;;  %v1529_v14 = vadd.f32 %v8926_v3, %v8925_v31  ;;  %v2530_v27 = vadd.f32 %v8928_v38, %v1532_v47  ;;  %v8929_v10 = vld [vmem:[#allocation111_spill] sm:$0xff] }
 0x3a4   :  { %v2689_v34 = vrot.slane %v2224_v28, 2  ;;  %v2888_v59 = vmax.f32 %v2840_v20, 0.0 }
 0x3a5   :  { %v2628_v28 = vrot.slane %v2309_v46, 2  ;;  %v2527_v63 = vadd.f32 %v8929_v10, %v1529_v14  ;;  %v8933_v14 = vld [vmem:[#allocation68_spill] sm:$0xff] }
 0x3a6   :  { %v2690_v6 = vsel %vm2621_vm3, %v2688_v23, %v2689_v34  ;;  %v7134_v13 = vadd.f32 %v2689_v34, %v8922_v54  ;;  %v2939_v24 = vrot.slane %v2888_v59, 1  ;;  %v7145_v34 = vperm.slane %v6868_v45, 2 }
 0x3a7   :  { %v2785_v48 = vadd.f32 %v2690_v6, %v2568_v32  ;;  %v1535_v38 = vadd.f32 %v8934_v17, %v8933_v14 }
 0x3a8   :  { %v7150_v6 = vmax.f32 %v2888_v59, %v2939_v24  ;;  %v8932_v24 = vld [vmem:[#allocation71_spill] sm:$0xff] }
 0x3a9   :  { %v2841_v52 = vadd.f32 %v6888_v0, %v2785_v48 }
 0x3aa   :  { %v2246_v25 = vpop.f32.mrf.mxu0  ;;  %v2311_v39 = vpop.f32.mrf.mxu1 }
 0x3ab   :  { %v2312_v61 = vadd.f32 %v2311_v39, %v2246_v25  ;;  %v2889_v42 = vmax.f32 %v2841_v52, 0.0 }
 0x3ad   :  { %v2629_v23 = vrot.slane %v2312_v61, 2  ;;  %v2940_v20 = vrot.slane %v2889_v42, 1 }
 0x3af   :  { %v2630_v43 = vsel %vm2621_vm3, %v2628_v28, %v2629_v23  ;;  %v7148_v32 = vadd.f32 %v2629_v23, %v2530_v27  ;;  %v7152_v54 = vmax.f32 %v2889_v42, %v2940_v20  ;;  %v8931_v42 = vld [vmem:[#allocation70_spill] sm:$0xff]  ;;  %v8935_v27 = vld [vmem:[#allocation112_spill] sm:$0xff] }
 0x3b0   :  { %v2744_v48 = vadd.f32 %v2630_v43, %v2527_v63  ;;  %v1538_v31 = vadd.f32 %v8932_v24, %v8931_v42  ;;  %v8936_v28 = vrot.slane %v8935_v27, 1  ;;  %v8938_v43 = vld [vmem:[#allocation115_spill] sm:$0xff] }
 0x3b1   :  { %8930 = vst [vmem:[#allocation16_spill] sm:$0xff] %v7152_v54  ;;  %v4495_v52 = vpack.i.bf16 %v7152_v54, %v7150_v6 }
 0x3b2   :  { %v2249_v46 = vpop.f32.mrf.mxu0  ;;  %v2314_v25 = vpop.f32.mrf.mxu1  ;;  %v2800_v39 = vadd.f32 %v7145_v34, %v2744_v48  ;;  %v2536_v23 = vadd.f32 %v8936_v28, %v1538_v31  ;;  %v2533_v48 = vadd.f32 %v8938_v43, %v1535_v38 }
 0x3b3   :  { %4496 = vrot.lane.b32.xlu1 %v4495_v52, %s4541_s4  ;;  %v2315_v47 = vadd.f32 %v2314_v25, %v2249_v46 }
 0x3b4   :  { %v2848_v45 = vmax.f32 %v2800_v39, 0.0 }
 0x3b5   :  { %v2637_v20 = vrot.slane %v2315_v47, 2  ;;  %v7168_v10 = vpop.permute.xlu0 %4461 }
 0x3b6   :  { %v2920_v55 = vrot.slane %v2848_v45, 1  ;;  %8937 = vst [vmem:[#allocation23_spill] sm:$0xff] %v7168_v10  ;;  %v8634_v25 = vunpack.i.h.bf16 %v7168_v10  ;;  %v4463_v39 = vunpack.i.l.bf16 %v7168_v10 }
 0x3b8   :  { %v7158_v1 = vmax.f32 %v2848_v45, %v2920_v55  ;;  %v3063_v47 = vsel %vm3062_vm4, %v4463_v39, %v8634_v25  ;;  %v8940_v39 = vld [vmem:[#allocation76_spill] sm:$0xff] }
 0x3b9   :  { %v7185_v17 = vmax.f32 %v6912_v44, %v3063_v47  ;;  %v8943_v47 = vld [vmem:[#allocation74_spill] sm:$0xff] }
 0x3ba   :  { %v2317_v61 = vpop.f32.mrf.mxu1  ;;  %3018 = vrot.lane.b32.xlu2 %v7158_v1, %s4541_s4  ;;  %v2252_v59 = vpop.f32.mrf.mxu0 }
 0x3bb   :  { %v2318_v3 = vadd.f32 %v2317_v61, %v2252_v59  ;;  %v3493_v43 = vrot.slane %v7185_v17, 4 }
 0x3bd   :  { %v2638_v63 = vrot.slane %v2318_v3, 2 }
 0x3bf   :  { %v2639_v52 = vsel %vm2621_vm3, %v2637_v20, %v2638_v63  ;;  %v7172_v46 = vadd.f32 %v2638_v63, %v2536_v23 }
 0x3c0   :  { %v2750_v45 = vadd.f32 %v2639_v52, %v2533_v48 }
 0x3c2   :  { %v2255_v55 = vpop.f32.mrf.mxu0  ;;  %v2320_v61 = vpop.f32.mrf.mxu1  ;;  %v2806_v59 = vadd.f32 %v7145_v34, %v2750_v45  ;;  %v8941_v45 = vld [vmem:[#allocation77_spill] sm:$0xff] }
 0x3c3   :  { %v2321_v23 = vadd.f32 %v2320_v61, %v2255_v55  ;;  %v8942_v61 = vld [vmem:[#allocation73_spill] sm:$0xff] }
 0x3c4   :  { %v2854_v42 = vmax.f32 %v2806_v59, 0.0  ;;  %v1544_v59 = vadd.f32 %v8941_v45, %v8940_v39 }
 0x3c5   :  { %v7180_v24 = vpop.permute.xlu0 %4466  ;;  %v2646_v19 = vrot.slane %v2321_v23, 2 }
 0x3c6   :  { %8939 = vst [vmem:[#allocation24_spill] sm:$0xff] %v7180_v24  ;;  %v8635_v31 = vunpack.i.h.bf16 %v7180_v24  ;;  %v4468_v3 = vunpack.i.l.bf16 %v7180_v24  ;;  %v2923_v14 = vrot.slane %v2854_v42, 1 }
 0x3c8   :  { %v3065_v38 = vsel %vm3062_vm4, %v4468_v3, %v8635_v31  ;;  %v7190_v27 = vmax.f32 %v2854_v42, %v2923_v14  ;;  %v1541_v42 = vadd.f32 %v8943_v47, %v8942_v61 }
 0x3c9   :  { %v7193_v28 = vmax.f32 %v6947_v41, %v3065_v38  ;;  %v3641_v41 = vrot.slane %v7185_v17, 6  ;;  %v8944_v38 = vld [vmem:[#allocation116_spill] sm:$0xff] }
 0x3ca   :  { %v2323_v20 = vpop.f32.mrf.mxu1  ;;  %3024 = vrot.lane.b32.xlu0 %v7190_v27, %s4541_s4  ;;  %v2258_v63 = vpop.f32.mrf.mxu0  ;;  %v8945_v25 = vrot.slane %v8944_v38, 1  ;;  %v2539_v39 = vadd.f32 %v8946_v40, %v1541_v42  ;;  %v8949_v38 = vld [vmem:[#allocation82_spill] sm:$0xff] }
 0x3cb   :  { %v3346_v44 = vrot.slane %v7193_v28, 7  ;;  %v3494_v48 = vrot.slane %v7193_v28, 3  ;;  %v3642_v52 = vrot.slane %v7193_v28, 5  ;;  %v2324_v55 = vadd.f32 %v2323_v20, %v2258_v63 }
 0x3cc   :  { %v2542_v31 = vadd.f32 %v8945_v25, %v1544_v59 }
 0x3cd   :  { %v3347_v3 = vsel %vm3234_vm5, %v3346_v44, %v7185_v17  ;;  %v3495_v14 = vsel %vm3234_vm5, %v3494_v48, %v3493_v43  ;;  %v2647_v54 = vrot.slane %v2324_v55, 2  ;;  %v3643_v56 = vsel %vm3234_vm5, %v3642_v52, %v3641_v41 }
 0x3cf   :  { %v2648_v45 = vsel %vm2621_vm3, %v2646_v19, %v2647_v54  ;;  %v7214_v20 = vadd.f32 %v2647_v54, %v2542_v31 }
 0x3d0   :  { %v2756_v63 = vadd.f32 %v2648_v45, %v2539_v39  ;;  %v8950_v39 = vld [vmem:[#allocation83_spill] sm:$0xff] }
 0x3d1   :  { %v1550_v45 = vadd.f32 %v8950_v39, %v8949_v38 }
 0x3d2   :  { %v2261_v61 = vpop.f32.mrf.mxu0  ;;  %v2326_v47 = vpop.f32.mrf.mxu1  ;;  %v2812_v44 = vadd.f32 %v7145_v34, %v2756_v63  ;;  %v8951_v63 = vld [vmem:[#allocation79_spill] sm:$0xff] }
 0x3d3   :  { %v2327_v31 = vadd.f32 %v2326_v47, %v2261_v61 }
 0x3d4   :  { %v2860_v43 = vmax.f32 %v2812_v44, 0.0  ;;  %v8952_v44 = vld [vmem:[#allocation80_spill] sm:$0xff] }
 0x3d5   :  { %v7217_v57 = vpop.permute.xlu1 %4471  ;;  %v2655_v4 = vrot.slane %v2327_v31, 2 }
 0x3d6   :  { %8947 = vst [vmem:[#allocation19_spill] sm:$0xff] %v7217_v57  ;;  %v8641_v25 = vunpack.i.h.bf16 %v7217_v57  ;;  %v4473_v23 = vunpack.i.l.bf16 %v7217_v57  ;;  %v2926_v48 = vrot.slane %v2860_v43, 1  ;;  %v2820_v57 = vadd.f32 %v6888_v0, %v6998_v15 }
 0x3d8   :  { %v3067_v40 = vsel %vm3062_vm4, %v4473_v23, %v8641_v25  ;;  %v7227_v54 = vmax.f32 %v2860_v43, %v2926_v48  ;;  %v1547_v43 = vadd.f32 %v8952_v44, %v8951_v63  ;;  %v8953_v48 = vld [vmem:[#allocation120_spill] sm:$0xff] }
 0x3d9   :  { %v7225_v19 = vmax.f32 %v6982_v18, %v3067_v40  ;;  %v8954_v40 = vrot.slane %v8953_v48, 1 }
 0x3da   :  { %8948 = vst [vmem:[#allocation20_spill] sm:$0xff] %v7227_v54  ;;  %v2329_v52 = vpop.f32.mrf.mxu1  ;;  %v2264_v59 = vpop.f32.mrf.mxu0  ;;  %3030 = vrot.lane.b32.xlu2 %v7227_v54, %s4541_s4  ;;  %v2545_v38 = vadd.f32 %v8956_v53, %v1547_v43 }
 0x3db   :  { %v3348_v41 = vrot.slane %v7225_v19, 6  ;;  %v3496_v55 = vrot.slane %v7225_v19, 2  ;;  %v3644_v42 = vrot.slane %v7225_v19, 4  ;;  %v2330_v18 = vadd.f32 %v2329_v52, %v2264_v59 }
 0x3dc   :  { %v2548_v25 = vadd.f32 %v8954_v40, %v1550_v45 }
 0x3dd   :  { %v3349_v61 = vsel %vm3236_vm6, %v3348_v41, %v3347_v3  ;;  %v3497_v47 = vsel %vm3236_vm6, %v3496_v55, %v3495_v14  ;;  %v3645_v23 = vsel %vm3236_vm6, %v3644_v42, %v3643_v56  ;;  %v2656_v16 = vrot.slane %v2330_v18, 2  ;;  %v7243_v7 = vpop.permute.xlu2 %4481  ;;  %v8957_v55 = vld [vmem:[#allocation124_spill] sm:$0xff]  ;;  %v8958_v42 = vld [vmem:[#allocation125_spill] sm:$0xff] }
 0x3de   :  { %8955 = vst [vmem:[#allocation113_spill] sm:$0xff] %v7243_v7  ;;  %v8646_v3 = vunpack.i.h.bf16 %v7243_v7  ;;  %v4483_v14 = vunpack.i.l.bf16 %v7243_v7  ;;  %v7253_v45 = vadd.f32 %v8958_v42, %v8957_v55  ;;  %v4309_v7 = vld [vmem:[%s8593_s5 + $0x1b8] sm:$0xff] }
 0x3df   :  { %v2657_v52 = vsel %vm2621_vm3, %v2655_v4, %v2656_v16  ;;  %v7247_v59 = vadd.f32 %v2656_v16, %v2548_v25  ;;  %v8960_v16 = vld [vmem:[#allocation122_spill] sm:$0xff]  ;;  %v8961_v25 = vld [vmem:[#allocation123_spill] sm:$0xff]  ;;  %3286 = vmatpush.msrb.mxu2 %v4309_v7 }
 0x3e0   :  { %v2762_v39 = vadd.f32 %v2657_v52, %v2545_v38  ;;  %v3071_v53 = vsel %vm3062_vm4, %v4483_v14, %v8646_v3  ;;  %v1943_v18 = vadd.f32 %v8961_v25, %v8960_v16  ;;  %v8964_v3 = vld [vmem:[#allocation86_spill] sm:$0xff]  ;;  %v4307_v7 = vld [vmem:[%s8593_s5 + $0x1a8] sm:$0xff] }
 0x3e1   :  { %v7267_v40 = vmax.f32 %v7052_v21, %v3071_v53 }
 0x3e2   :  { %v2267_v41 = vpop.f32.mrf.mxu0  ;;  %v2332_v56 = vpop.f32.mrf.mxu1  ;;  %v2818_v31 = vadd.f32 %v7145_v34, %v2762_v39  ;;  %v2447_v14 = vrot.slane %v1943_v18, 1 }
 0x3e3   :  { %v2333_v55 = vadd.f32 %v2332_v56, %v2267_v41  ;;  %v3352_v41 = vrot.slane %v7267_v40, 4 }
 0x3e4   :  { %v2866_v43 = vmax.f32 %v2818_v31, 0.0  ;;  %v8963_v31 = vld [vmem:[#allocation85_spill] sm:$0xff] }
 0x3e5   :  { %v7259_v4 = vpop.permute.xlu1 %4476  ;;  %v1553_v48 = vadd.f32 %v8964_v3, %v8963_v31  ;;  %v3648_v3 = vrot.slane %v7267_v40, 2  ;;  %v2664_v31 = vrot.slane %v2333_v55, 2 }
 0x3e6   :  { %8959 = vst [vmem:[#allocation114_spill] sm:$0xff] %v7259_v4  ;;  %v8647_v63 = vunpack.i.h.bf16 %v7259_v4  ;;  %v4478_v44 = vunpack.i.l.bf16 %v7259_v4  ;;  %v2929_v52 = vrot.slane %v2866_v43, 1 }
 0x3e8   :  { %v3069_v38 = vsel %vm3062_vm4, %v4478_v44, %v8647_v63  ;;  %v7275_v25 = vmax.f32 %v2866_v43, %v2929_v52  ;;  %v8965_v63 = vrot.slane %v7253_v45, 1 }
 0x3e9   :  { %v7273_v39 = vmax.f32 %v7017_v60, %v3069_v38 }
 0x3ea   :  { %v2270_v42 = vpop.f32.mrf.mxu0  ;;  %v2335_v16 = vpop.f32.mrf.mxu1  ;;  %8962 = vst [vmem:[#allocation78_spill] sm:$0xff] %v7275_v25  ;;  %v2449_v60 = vsel %vm2404_vm2, %v2447_v14, %v8965_v63  ;;  %3036 = vrot.lane.b32.xlu1 %v7275_v25, %s4541_s4 }
 0x3eb   :  { %v3350_v21 = vrot.slane %v7273_v39, 5  ;;  %v3498_v53 = vrot.slane %v7273_v39, 1  ;;  %v3646_v44 = vrot.slane %v7273_v39, 3  ;;  %v7286_v56 = vadd.f32 %v2335_v16, %v2270_v42 }
 0x3ec   :  { %v2551_v16 = vadd.f32 %v2449_v60, %v1553_v48 }
 0x3ed   :  { %v7291_v18 = vpop.permute.xlu2 %4486  ;;  %v3351_v43 = vsel %vm3239_vm7, %v3350_v21, %v3349_v61  ;;  %v3499_v38 = vsel %vm3239_vm7, %v3498_v53, %v3497_v47  ;;  %v3647_v52 = vsel %vm3239_vm7, %v3646_v44, %v3645_v23  ;;  %v8651_v63 = vrot.slane %v7286_v56, 2  ;;  %v4308_v53 = vld [vmem:[%s8593_s5 + $0x1b0] sm:$0xff] }
 0x3ee   :  { %8966 = vst [vmem:[#allocation2_spill] sm:$0xff] %v7291_v18  ;;  %v8650_v14 = vunpack.i.h.bf16 %v7291_v18  ;;  %v4488_v42 = vunpack.i.l.bf16 %v7291_v18  ;;  %v3353_v4 = vsel %vm3242_vm8, %v3352_v41, %v3351_v43  ;;  %v3500_v61 = vsel %vm3242_vm8, %v7267_v40, %v3499_v38  ;;  %3287 = vmatpush.msrb.mxu2 %v4308_v53  ;;  %v8967_v41 = vld [vmem:[#allocation131_spill] sm:$0xff]  ;;  %v4306_v53 = vld [vmem:[%s8593_s5 + $0x1a0] sm:$0xff] }
 0x3ef   :  { %v3649_v47 = vsel %vm3242_vm8, %v3648_v3, %v3647_v52  ;;  %v2666_v23 = vsel %vm2621_vm3, %v2664_v31, %v8651_v63  ;;  %v8968_v3 = vld [vmem:[#allocation132_spill] sm:$0xff] }
 0x3f0   :  { %v3073_v55 = vsel %vm3062_vm4, %v4488_v42, %v8650_v14  ;;  %v2768_v48 = vadd.f32 %v2666_v23, %v2551_v16  ;;  %v7320_v43 = vadd.f32 %v8968_v3, %v8967_v41  ;;  %3288 = vmatpush.msrb.mxu2 %v4307_v7  ;;  %v8969_v42 = vld [vmem:[#allocation128_spill] sm:$0xff]  ;;  %v8970_v16 = vld [vmem:[#allocation129_spill] sm:$0xff] }
 0x3f1   :  { %v7313_v21 = vmax.f32 %v7087_v51, %v3073_v55  ;;  %v1949_v23 = vadd.f32 %v8970_v16, %v8969_v42 }
 0x3f2   :  { %v2273_v44 = vpop.f32.mrf.mxu0  ;;  %v2338_v60 = vpop.f32.mrf.mxu1  ;;  %v2824_v38 = vadd.f32 %v7145_v34, %v2768_v48  ;;  %3289 = vmatpush.msrb.mxu2 %v4306_v53  ;;  %v8653_v7 = vrot.slane %v7320_v43, 1  ;;  %v4302_v53 = vld [vmem:[%s8593_s5 + $0x180] sm:$0xff] }
 0x3f3   :  { %v3354_v51 = vrot.slane %v7313_v21, 3  ;;  %v3501_v52 = vrot.slane %v7313_v21, 7  ;;  %v3650_v31 = vrot.slane %v7313_v21, 1  ;;  %v2456_v42 = vrot.slane %v1949_v23, 1 }
 0x3f4   :  { %v2872_v55 = vmax.f32 %v2824_v38, 0.0  ;;  %v4305_v38 = vld [vmem:[%s8593_s5 + $0x198] sm:$0xff]  ;;  %v2339_v16 = vadd.f32 %v2338_v60, %v2273_v44  ;;  %v8972_v44 = vld [vmem:[#allocation91_spill] sm:$0xff]  ;;  %v8973_v60 = vld [vmem:[#allocation92_spill] sm:$0xff] }
 0x3f5   :  { %v7335_v48 = vsel %vm3245_vm9, %v3354_v51, %v3353_v4  ;;  %v7338_v41 = vsel %vm3245_vm9, %v3501_v52, %v3500_v61  ;;  %v7341_v3 = vsel %vm3245_vm9, %v3650_v31, %v3649_v47  ;;  %3290 = vmatpush.msrb.mxu2 %v4305_v38  ;;  %v4304_v4 = vld [vmem:[%s8593_s5 + $0x190] sm:$0xff]  ;;  %v4303_v47 = vld [vmem:[%s8593_s5 + $0x188] sm:$0xff]  ;;  %v2458_v52 = vsel %vm2404_vm2, %v2456_v42, %v8653_v7 }
 0x3f6   :  { %v2932_v14 = vrot.slane %v2872_v55, 1  ;;  %v1559_v31 = vadd.f32 %v8973_v60, %v8972_v44  ;;  %v2673_v23 = vrot.slane %v2339_v16, 2 }
 0x3f7   :  { %3291 = vmatpush.msrb.mxu2 %v4304_v4  ;;  %v4301_v4 = vld [vmem:[%s8593_s5 + $0x178] sm:$0xff] }
 0x3f8   :  { %v7347_v63 = vmax.f32 %v2872_v55, %v2932_v14  ;;  %v2557_v38 = vadd.f32 %v2458_v52, %v1559_v31  ;;  %v8974_v31 = vld [vmem:[#allocation139_spill] sm:$0xff] }
 0x3f9   :  { %3292 = vmatpush.msrb.mxu2 %v4303_v47  ;;  %v2808_v47 = vadd.f32 %v6888_v0, %v6928_v8  ;;  %v8976_v8 = vld [vmem:[#allocation135_spill] sm:$0xff] }
 0x3fa   :  { %8971 = vst [vmem:[#allocation3_spill] sm:$0xff] %v7347_v63  ;;  %v2341_v61 = vpop.f32.mrf.mxu1  ;;  %v2276_v51 = vpop.f32.mrf.mxu0  ;;  %3042 = vrot.lane.b32.xlu0 %v7347_v63, %s4541_s4 }
 0x3fb   :  { %v7360_v14 = vadd.f32 %v2341_v61, %v2276_v51  ;;  %3293 = vmatpush.msrb.mxu2 %v4302_v53  ;;  %v2814_v61 = vadd.f32 %v6888_v0, %v6963_v9  ;;  %v4300_v51 = vld [vmem:[%s8593_s5 + $0x170] sm:$0xff]  ;;  %v4299_v9 = vld [vmem:[%s8593_s5 + $0x168] sm:$0xff] }
 0x3fd   :  { %v8652_v55 = vrot.slane %v7360_v14, 2  ;;  %3294 = vmatpush.msrb.mxu2 %v4301_v4 }
 0x3ff   :  { %v2675_v42 = vsel %vm2621_vm3, %v2673_v23, %v8652_v55  ;;  %3295 = vmatpush.msrb.mxu2 %v4300_v51  ;;  %v8975_v23 = vld [vmem:[#allocation140_spill] sm:$0xff] }
 0x400   :  { %v2774_v16 = vadd.f32 %v2675_v42, %v2557_v38  ;;  %v7384_v53 = vadd.f32 %v8975_v23, %v8974_v31  ;;  %v4298_v38 = vld [vmem:[%s8593_s5 + $0x160] sm:$0xff]  ;;  %v2862_v42 = vmax.f32 %v2814_v61, 0.0  ;;  %v8977_v55 = vld [vmem:[#allocation136_spill] sm:$0xff]  ;;  %v4297_v23 = vld [vmem:[%s8593_s5 + $0x158] sm:$0xff] }
 0x401   :  { %3296 = vmatpush.msrb.mxu2 %v4299_v9  ;;  %v1955_v7 = vadd.f32 %v8977_v55, %v8976_v8  ;;  %v2802_v55 = vadd.f32 %v6888_v0, %v6893_v58  ;;  %v4295_v9 = vld [vmem:[%s8593_s5 + $0x148] sm:$0xff] }
 0x402   :  { %v2279_v52 = vpop.f32.mrf.mxu0  ;;  %v2344_v44 = vpop.f32.mrf.mxu1  ;;  %v2830_v60 = vadd.f32 %v7145_v34, %v2774_v16  ;;  %v2856_v16 = vmax.f32 %v2808_v47, 0.0  ;;  %v3779_v18 = vrot.slane %v2862_v42, 1  ;;  %v8979_v15 = vrot.slane %v7384_v53, 1 }
 0x403   :  { %3297 = vmatpush.msrb.mxu2 %v4298_v38  ;;  %v2465_v61 = vrot.slane %v1955_v7, 1  ;;  %v2345_v47 = vadd.f32 %v2344_v44, %v2279_v52  ;;  %v4294_v52 = vld [vmem:[%s8593_s5 + $0x140] sm:$0xff]  ;;  %v8980_v44 = vld [vmem:[#allocation97_spill] sm:$0xff]  ;;  %v2850_v63 = vmax.f32 %v2802_v55, 0.0  ;;  %v2826_v55 = vadd.f32 %v6888_v0, %v7033_v26 }
 0x404   :  { %v2878_v4 = vmax.f32 %v2830_v60, 0.0  ;;  %v4296_v60 = vld [vmem:[%s8593_s5 + $0x150] sm:$0xff]  ;;  %v3776_v38 = vrot.slane %v2856_v16, 1  ;;  %v7422_v24 = vmax.f32 %v2862_v42, %v3779_v18 }
 0x405   :  { %3298 = vmatpush.msrb.mxu2 %v4297_v23  ;;  %v2467_v58 = vsel %vm2404_vm2, %v2465_v61, %v8979_v15  ;;  %v2868_v23 = vmax.f32 %v2820_v57, 0.0  ;;  %v3773_v42 = vrot.slane %v2850_v63, 1 }
 0x406   :  { %v2935_v51 = vrot.slane %v2878_v4, 1  ;;  %8982 = vst [vmem:[#allocation25_spill] sm:$0xff] %v7422_v24  ;;  %v7425_v54 = vmax.f32 %v2856_v16, %v3776_v38 }
 0x407   :  { %3299 = vmatpush.msrb.mxu2 %v4296_v60  ;;  %v3782_v61 = vrot.slane %v2868_v23, 1  ;;  %v7448_v26 = vmax.f32 %v2850_v63, %v3773_v42 }
 0x408   :  { %v7400_v10 = vmax.f32 %v2878_v4, %v2935_v51  ;;  %v8981_v4 = vld [vmem:[#allocation98_spill] sm:$0xff]  ;;  %8983 = vst [vmem:[#allocation26_spill] sm:$0xff] %v7425_v54  ;;  %v4500_v18 = vpack.i.bf16 %v7422_v24, %v7425_v54 }
 0x409   :  { %v1565_v51 = vadd.f32 %v8981_v4, %v8980_v44  ;;  %3300 = vmatpush.msrb.mxu2 %v4295_v9 }
 0x40a   :  { %8978 = vst [vmem:[#allocation81_spill] sm:$0xff] %v7400_v10  ;;  %v2282_v8 = vpop.f32.mrf.mxu0  ;;  %v2347_v31 = vpop.f32.mrf.mxu1  ;;  %3048 = vrot.lane.b32.xlu1 %v7400_v10, %s4541_s4  ;;  %v2682_v10 = vrot.slane %v2345_v47, 2 }
 0x40b   :  { %v7415_v7 = vadd.f32 %v2347_v31, %v2282_v8  ;;  %v2563_v25 = vadd.f32 %v2467_v58, %v1565_v51  ;;  %3301 = vmatpush.msrb.mxu2 %v4294_v52  ;;  %v2832_v8 = vadd.f32 %v6888_v0, %v7068_v37  ;;  %v7440_v37 = vmax.f32 %v2868_v23, %v3782_v61  ;;  %v8988_v23 = vld [vmem:[#allocation101_spill] sm:$0xff] }
 0x40c   :  { %v2874_v52 = vmax.f32 %v2826_v55, 0.0 }
 0x40d   :  { %v8662_v60 = vrot.slane %v7415_v7, 2  ;;  %v2880_v38 = vmax.f32 %v2832_v8, 0.0  ;;  %v8986_v8 = vld [vmem:[#allocation89_spill] sm:$0xff]  ;;  %v4505_v24 = vpack.i.bf16 %v7440_v37, %v7448_v26 }
 0x40f   :  { %v2684_v31 = vsel %vm2621_vm3, %v2682_v10, %v8662_v60  ;;  %v2809_v10 = vadd.f32 %v7145_v34, %v7172_v46  ;;  %v2838_v60 = vadd.f32 %v6888_v0, %v7103_v33  ;;  %v3788_v63 = vrot.slane %v2880_v38, 1 }
 0x410   :  { %v2780_v57 = vadd.f32 %v2684_v31, %v2563_v25  ;;  %v7444_v25 = vadd.f32 %v6879_v49, %v6910_v36  ;;  %v8985_v31 = vld [vmem:[#allocation88_spill] sm:$0xff]  ;;  %v8993_v33 = vrot.slane %v7253_v45, 1  ;;  %v2803_v45 = vadd.f32 %v7145_v34, %v7148_v32 }
 0x411   :  { %v1556_v46 = vadd.f32 %v8986_v8, %v8985_v31  ;;  %v2857_v42 = vmax.f32 %v2809_v10, 0.0 }
 0x412   :  { %v2285_v47 = vpop.f32.mrf.mxu0  ;;  %v2350_v16 = vpop.f32.mrf.mxu1  ;;  %4501 = vrot.lane.b32.xlu1 %v4500_v18, %s4541_s4  ;;  %v2836_v9 = vadd.f32 %v7145_v34, %v2780_v57  ;;  %v8987_v57 = vld [vmem:[#allocation100_spill] sm:$0xff]  ;;  %v8989_v18 = vld [vmem:[#allocation103_spill] sm:$0xff] }
 0x413   :  { %v1568_v61 = vadd.f32 %v8988_v23, %v8987_v57  ;;  %v2351_v54 = vadd.f32 %v2350_v16, %v2285_v47  ;;  %v8991_v57 = vld [vmem:[#allocation106_spill] sm:$0xff]  ;;  %v8992_v23 = vld [vmem:[#allocation107_spill] sm:$0xff]  ;;  %v2554_v10 = vadd.f32 %v8993_v33, %v1556_v46  ;;  %v2886_v47 = vmax.f32 %v2838_v60, 0.0 }
 0x414   :  { %v2884_v15 = vmax.f32 %v2836_v9, 0.0  ;;  %v8990_v9 = vld [vmem:[#allocation104_spill] sm:$0xff]  ;;  %v7482_v46 = vmax.f32 %v2880_v38, %v3788_v63  ;;  %v8994_v38 = vrot.slane %v6847_v11, 1  ;;  %v8995_v33 = vrot.slane %v7286_v56, 2  ;;  %v8996_v56 = vld [vmem:[#allocation94_spill] sm:$0xff] }
 0x415   :  { %v7446_v58 = vpop.permute.xlu0 %4491  ;;  %v1571_v36 = vadd.f32 %v8990_v9, %v8989_v18  ;;  %v1574_v18 = vadd.f32 %v8992_v23, %v8991_v57  ;;  %v2855_v9 = vmax.f32 %v7444_v25, 0.0  ;;  %v3232_v11 = vrot.slane %v7185_v17, 2 }
 0x416   :  { %8984 = vst [vmem:[#allocation21_spill] sm:$0xff] %v7446_v58  ;;  %v8666_v44 = vunpack.i.h.bf16 %v7446_v58  ;;  %v4493_v4 = vunpack.i.l.bf16 %v7446_v58  ;;  %v2938_v51 = vrot.slane %v2884_v15, 1  ;;  %v3785_v58 = vrot.slane %v2874_v52, 1 }
 0x417   :  { %v2569_v32 = vadd.f32 %v6855_v29, %v1571_v36  ;;  %v2572_v63 = vadd.f32 %v8994_v38, %v1574_v18  ;;  %v3775_v23 = vrot.slane %v2855_v9, 1  ;;  %v8997_v36 = vld [vmem:[#allocation95_spill] sm:$0xff] }
 0x418   :  { %v3075_v55 = vsel %vm3062_vm4, %v4493_v4, %v8666_v44  ;;  %v7468_v8 = vmax.f32 %v2884_v15, %v2938_v51  ;;  %v3777_v51 = vrot.slane %v2857_v42, 1  ;;  %v7500_v57 = vmax.f32 %v2874_v52, %v3785_v58 }
 0x419   :  { %v7466_v31 = vmax.f32 %v7120_v2, %v3075_v55  ;;  %v7511_v58 = vadd.f32 %v7145_v34, %v7214_v20  ;;  %v3238_v52 = vrot.slane %v7273_v39, 7  ;;  %v1562_v18 = vadd.f32 %v8997_v36, %v8996_v56 }
 0x41a   :  { %v2353_v4 = vpop.f32.mrf.mxu1  ;;  %v2288_v44 = vpop.f32.mrf.mxu0  ;;  %4506 = vrot.lane.b32.xlu1 %v4505_v24, %s4541_s4  ;;  %3054 = vrot.lane.b32.xlu2 %v7468_v8, %s4541_s4  ;;  %v2691_v24 = vrot.slane %v2351_v54, 2  ;;  %v3233_v54 = vrot.slane %v7193_v28, 1  ;;  %v4510_v29 = vpack.i.bf16 %v7482_v46, %v7500_v57  ;;  %v7514_v28 = vmax.f32 %v2857_v42, %v3777_v51 }
 0x41b   :  { %v2354_v2 = vadd.f32 %v2353_v4, %v2288_v44  ;;  %v3356_v16 = vrot.slane %v7466_v31, 2  ;;  %v3503_v15 = vrot.slane %v7466_v31, 6  ;;  %v7487_v25 = vsel %vm3248_vm10, %v7466_v31, %v7341_v3 }
 0x41c   :  { %v3791_v3 = vrot.slane %v2886_v47, 1  ;;  %v2771_v4 = vadd.f32 %v8995_v33, %v2554_v10  ;;  %v8998_v10 = vrot.slane %v7384_v53, 1  ;;  %v3235_v17 = vsel %vm3234_vm5, %v3233_v54, %v3232_v11  ;;  %v4325_v53 = vld [vmem:[%s8593_s5 + $0x238] sm:$0xff] }
 0x41d   :  { %v2692_v60 = vrot.slane %v2354_v2, 2  ;;  %v7491_v44 = vsel %vm3248_vm10, %v3356_v16, %v7335_v48  ;;  %v7495_v55 = vsel %vm3248_vm10, %v3503_v15, %v7338_v41  ;;  %v2851_v2 = vmax.f32 %v2803_v45, 0.0  ;;  %3306 = vmatpush.msrb.mxu3 %v4325_v53 }
 0x41e   :  { %v2566_v15 = vadd.f32 %v8998_v10, %v1568_v61  ;;  %v7528_v20 = vmax.f32 %v2855_v9, %v3775_v23  ;;  %v7530_v39 = vmax.f32 %v2886_v47, %v3791_v3  ;;  %v7537_v61 = vadd.f32 %v6879_v49, %v7085_v50 }
 0x41f   :  { %v2693_v48 = vsel %vm2621_vm3, %v2691_v24, %v2692_v60  ;;  %v2789_v41 = vadd.f32 %v2692_v60, %v2572_v63  ;;  %v7524_v24 = vadd.f32 %v7145_v34, %v2771_v4  ;;  %v3237_v42 = vsel %vm3236_vm6, %v7225_v19, %v3235_v17 }
 0x420   :  { %v2786_v16 = vadd.f32 %v2693_v48, %v2569_v32  ;;  %v7544_v9 = vadd.f32 %v6879_v49, %v7118_v12  ;;  %v2863_v47 = vmax.f32 %v7511_v58, 0.0  ;;  %v3774_v38 = vrot.slane %v2851_v2, 1 }
 0x421   :  { %v2845_v51 = vadd.f32 %v7145_v34, %v2789_v41  ;;  %v3240_v63 = vsel %vm3239_vm7, %v3238_v52, %v3237_v42  ;;  %v3244_v3 = vrot.slane %v7313_v21, 5  ;;  %v3241_v54 = vrot.slane %v7267_v40, 6 }
 0x422   :  { %4511 = vrot.lane.b32.xlu1 %v4510_v29, %s4541_s4  ;;  %v2842_v45 = vadd.f32 %v7145_v34, %v2786_v16  ;;  %3878 = vrot.lane.b32.xlu2 %v7514_v28, %s4541_s4  ;;  %v2875_v33 = vmax.f32 %v7524_v24, 0.0  ;;  %v8999_v12 = vrot.slane %v7415_v7, 2  ;;  %v4515_v48 = vpack.i.bf16 %v7528_v20, %v7530_v39 }
 0x423   :  { %v2893_v16 = vmax.f32 %v2845_v51, 0.0  ;;  %v3247_v11 = vrot.slane %v7466_v31, 4  ;;  %v2891_v21 = vmax.f32 %v7544_v9, 0.0  ;;  %v7567_v58 = vmax.f32 %v2851_v2, %v3774_v38 }
 0x424   :  { %v2890_v60 = vmax.f32 %v2842_v45, 0.0  ;;  %v2783_v4 = vadd.f32 %v8999_v12, %v2566_v15  ;;  %v3243_v7 = vsel %vm3242_vm8, %v3241_v54, %v3240_v63  ;;  %v2821_v52 = vadd.f32 %v7145_v34, %v7247_v59 }
 0x425   :  { %v7547_v32 = vpop.permute.xlu1 %4496  ;;  %v3246_v56 = vsel %vm3245_vm9, %v3244_v3, %v3243_v7  ;;  %v3780_v31 = vrot.slane %v2863_v47, 1  ;;  %v3786_v17 = vrot.slane %v2875_v33, 1  ;;  %v3795_v24 = vrot.slane %v2893_v16, 1  ;;  %v7627_v7 = vpop.permute.xlu2 %3018 }
 0x426   :  { %v8669_v50 = vunpack.i.h.bf16 %v7547_v32  ;;  %v4498_v23 = vunpack.i.l.bf16 %v7547_v32  ;;  %v2941_v19 = vrot.slane %v2890_v60, 1  ;;  %v2839_v15 = vadd.f32 %v7145_v34, %v2783_v4 }
 0x427   :  { %v3249_v45 = vsel %vm3248_vm10, %v3247_v11, %v3246_v56  ;;  %v9001_v9 = vrot.slane %v7320_v43, 1  ;;  %v2885_v63 = vmax.f32 %v7537_v61, 0.0  ;;  %v9002_v3 = vrot.slane %v7360_v14, 2  ;;  %v4323_v14 = vld [vmem:[%s8593_s5 + $0x228] sm:$0xff] }
 0x428   :  { %v3077_v41 = vsel %vm3062_vm4, %v4498_v23, %v8669_v50  ;;  %v7562_v29 = vmax.f32 %v2890_v60, %v2941_v19  ;;  %v3793_v23 = vrot.slane %v2891_v21, 1  ;;  %v2869_v19 = vmax.f32 %v2821_v52, 0.0 }
 0x429   :  { %v3124_v40 = vmax.f32 %v7150_v6, %v3077_v41  ;;  %v4324_v6 = vld [vmem:[%s8593_s5 + $0x230] sm:$0xff]  ;;  %v2560_v38 = vadd.f32 %v9001_v9, %v1562_v18  ;;  %v7601_v54 = vmax.f32 %v2863_v47, %v3780_v31  ;;  %v7603_v12 = vmax.f32 %v2893_v16, %v3795_v24 }
 0x42a   :  { %3060 = vrot.lane.b32.xlu0 %v7562_v29, %s4541_s4  ;;  %4516 = vrot.lane.b32.xlu1 %v4515_v48, %s4541_s4  ;;  %v7607_v4 = vmax.f32 %v2875_v33, %v3786_v17  ;;  %v3790_v43 = vrot.slane %v2885_v63, 1  ;;  %v2801_v18 = vadd.f32 %v6879_v49, %v6876_v22  ;;  %v3783_v61 = vrot.slane %v2869_v19, 1 }
 0x42b   :  { %3872 = vrot.lane.b32.xlu2 %v7567_v58, %s4541_s4  ;;  %v3250_v2 = vrot.slane %v3124_v40, 3  ;;  %3307 = vmatpush.msrb.mxu3 %v4324_v6  ;;  %v3358_v36 = vrot.slane %v3124_v40, 1  ;;  %v3505_v59 = vrot.slane %v3124_v40, 5  ;;  %v3653_v10 = vrot.slane %v3124_v40, 7 }
 0x42c   :  { %v7621_v47 = vmax.f32 %v2891_v21, %v3793_v23  ;;  %v7623_v16 = vmax.f32 %v2885_v63, %v3790_v43  ;;  %v2849_v41 = vmax.f32 %v2801_v18, 0.0  ;;  %v2844_v11 = vadd.f32 %v6888_v0, %v7134_v13  ;;  %v4321_v63 = vld [vmem:[%s8593_s5 + $0x218] sm:$0xff]  ;;  %v4320_v18 = vld [vmem:[%s8593_s5 + $0x210] sm:$0xff] }
 0x42d   :  { %v3252_v53 = vsel %vm3251_vm11, %v3250_v2, %v3249_v45  ;;  %v7586_v42 = vsel %vm3251_vm11, %v3358_v36, %v7491_v44  ;;  %v7590_v51 = vsel %vm3251_vm11, %v3505_v59, %v7495_v55  ;;  %v7594_v60 = vsel %vm3251_vm11, %v3653_v10, %v7487_v25  ;;  %3308 = vmatpush.msrb.mxu3 %v4323_v14 }
 0x42e   :  { %9000 = vst [vmem:[#allocation22_spill] sm:$0xff] %v7594_v60  ;;  %3302 = vmatmul.f32.vlgmr.msrb.gmra.mxu2 %v3252_v53  ;;  %v2777_v44 = vadd.f32 %v9002_v3, %v2560_v38  ;;  %v2819_v55 = vadd.f32 %v6879_v49, %v6980_v35  ;;  %v2887_v25 = vmax.f32 %v2839_v15, 0.0  ;;  %v7629_v22 = vmax.f32 %v2869_v19, %v3783_v61  ;;  %v4318_v61 = vld [vmem:[%s8593_s5 + $0x200] sm:$0xff] }
 0x42f   :  { %9003 = vst [vmem:[#allocation31_spill] sm:$0xff] %v7621_v47  ;;  %v4535_v52 = vpack.i.bf16 %v7621_v47, %v7623_v16  ;;  %v2813_v56 = vadd.f32 %v6879_v49, %v6945_v62  ;;  %v7642_v0 = vmax.f32 %v7158_v1, %v7627_v7  ;;  %v3772_v13 = vrot.slane %v2849_v41, 1 }
 0x430   :  { %v2833_v35 = vadd.f32 %v7145_v34, %v2777_v44  ;;  %v2867_v33 = vmax.f32 %v2819_v55, 0.0  ;;  %v3792_v48 = vrot.slane %v2887_v25, 1  ;;  %v2892_v31 = vmax.f32 %v2844_v11, 0.0  ;;  %v4316_v11 = vld [vmem:[%s8593_s5 + $0x1f0] sm:$0xff] }
 0x431   :  { %v2861_v59 = vmax.f32 %v2813_v56, 0.0  ;;  %v3669_v10 = vrot.slane %v7642_v0, 6  ;;  %v7656_v15 = vmax.f32 %v2849_v41, %v3772_v13  ;;  %v2831_v45 = vadd.f32 %v6879_v49, %v7050_v5  ;;  %v4322_v5 = vld [vmem:[%s8593_s5 + $0x220] sm:$0xff]  ;;  %v4332_v41 = vld [vmem:[%s8593_s5 + $0x270] sm:$0xff] }
 0x432   :  { %3884 = vrot.lane.b32.xlu0 %v7601_v54, %s4541_s4  ;;  %3914 = vrot.lane.b32.xlu1 %v7603_v12, %s4541_s4  ;;  %v2881_v40 = vmax.f32 %v2833_v35, 0.0  ;;  %v7633_v34 = vmax.f32 %v2887_v25, %v3792_v48  ;;  %v3781_v21 = vrot.slane %v2867_v33, 1  ;;  %v3794_v17 = vrot.slane %v2892_v31, 1  ;;  %v4319_v35 = vld [vmem:[%s8593_s5 + $0x208] sm:$0xff]  ;;  %v4317_v48 = vld [vmem:[%s8593_s5 + $0x1f8] sm:$0xff] }
 0x433   :  { %3896 = vrot.lane.b32.xlu2 %v7607_v4, %s4541_s4  ;;  %v2825_v9 = vadd.f32 %v6879_v49, %v7015_v30  ;;  %v3778_v38 = vrot.slane %v2861_v59, 1  ;;  %v2879_v23 = vmax.f32 %v2831_v45, 0.0  ;;  %3309 = vmatpush.msrb.mxu3 %v4322_v5  ;;  %v4330_v56 = vld [vmem:[%s8593_s5 + $0x260] sm:$0xff]  ;;  %v9032_v60 = vunpack.i.h.bf16 %v7547_v32 }
 0x434   :  { %v3789_v2 = vrot.slane %v2881_v40, 1  ;;  %v7652_v36 = vmax.f32 %v2867_v33, %v3781_v21  ;;  %v7676_v19 = vmax.f32 %v2892_v31, %v3794_v17  ;;  %v4333_v33 = vld [vmem:[%s8593_s5 + $0x278] sm:$0xff]  ;;  %v4315_v21 = vld [vmem:[%s8593_s5 + $0x1e8] sm:$0xff]  ;;  %v4314_v13 = vld [vmem:[%s8593_s5 + $0x1e0] sm:$0xff] }
 0x435   :  { %v2873_v3 = vmax.f32 %v2825_v9, 0.0  ;;  %v7678_v49 = vmax.f32 %v2861_v59, %v3778_v38  ;;  %3310 = vmatpush.msrb.mxu3 %v4321_v63  ;;  %v3787_v30 = vrot.slane %v2879_v23, 1  ;;  %3334 = vmatpush.msra.mxu2 %v4333_v33  ;;  %v4329_v31 = vld [vmem:[%s8593_s5 + $0x258] sm:$0xff]  ;;  %v9006_v45 = vld [vmem:[#allocation78_spill] sm:$0xff]  ;;  %v4312_v38 = vld [vmem:[%s8593_s5 + $0x1d0] sm:$0xff] }
 0x436   :  { %v7660_v24 = vmax.f32 %v2881_v40, %v3789_v2  ;;  %9004 = vst [vmem:[#allocation32_spill] sm:$0xff] %v7676_v19  ;;  %v7711_v40 = vpop.permute.xlu2 %3030  ;;  %v9005_v2 = vld [vmem:[#allocation20_spill] sm:$0xff]  ;;  %v4327_v63 = vld [vmem:[%s8593_s5 + $0x248] sm:$0xff] }
 0x437   :  { %v4520_v44 = vpack.i.bf16 %v7678_v49, %v7676_v19  ;;  %v3784_v55 = vrot.slane %v2873_v3, 1  ;;  %v7683_v25 = vmax.f32 %v2879_v23, %v3787_v30  ;;  %3311 = vmatpush.msrb.mxu3 %v4320_v18  ;;  %3335 = vmatpush.msra.mxu2 %v4332_v41  ;;  %v7730_v59 = vmax.f32 %v9005_v2, %v7711_v40  ;;  %v4311_v23 = vld [vmem:[%s8593_s5 + $0x1c8] sm:$0xff]  ;;  %v4326_v30 = vld [vmem:[%s8593_s5 + $0x240] sm:$0xff]  ;;  %v3142_v18 = vld [vmem:[%s8593_s5 + $0x78] sm:$0xff] }
 0x438   :  { %v3141_v33 = vld [vmem:[%s8593_s5 + $0x70] sm:$0xff]  ;;  %v3156_v41 = vld [vmem:[%s8593_s5 + $0xe8] sm:$0xff]  ;;  %v3138_v2 = vld [vmem:[%s8593_s5 + $0x58] sm:$0xff] }
 0x439   :  { %v7685_v43 = vmax.f32 %v2873_v3, %v3784_v55  ;;  %3312 = vmatpush.msrb.mxu3 %v4319_v35  ;;  %v3672_v9 = vrot.slane %v7730_v59, 4  ;;  %v4433_v35 = vld [vmem:[%s8593_s5 + $0x578] sm:$0xff]  ;;  %v9031_v19 = vld [vmem:[#allocation15_spill] sm:$0xff] }
 0x43a   :  { %3890 = vrot.lane.b32.xlu0 %v7629_v22, %s4541_s4  ;;  %4536 = vrot.lane.b32.xlu1 %v4535_v52, %s4541_s4  ;;  %v4331_v52 = vld [vmem:[%s8593_s5 + $0x268] sm:$0xff] }
 0x43b   :  { %3908 = vrot.lane.b32.xlu2 %v7633_v34, %s4541_s4  ;;  %v4530_v14 = vpack.i.bf16 %v7683_v25, %v7685_v43  ;;  %3313 = vmatpush.msrb.mxu3 %v4318_v61  ;;  %v3157_v61 = vld [vmem:[%s8593_s5 + $0xf0] sm:$0xff] }
 0x43c   :  { %v7646_v6 = vpop.permute.xlu0 %3024  ;;  %3336 = vmatpush.msra.mxu2 %v4331_v52  ;;  %4091 = vmatpush.msra.mxu1 %v4433_v35  ;;  %v4406_v52 = vld [vmem:[%s8593_s5 + $0x4a8] sm:$0xff]  ;;  %v4401_v35 = vld [vmem:[%s8593_s5 + $0x480] sm:$0xff] }
 0x43d   :  { %v7650_v62 = vmax.f32 %v7190_v27, %v7646_v6  ;;  %v4525_v27 = vpack.i.bf16 %v7652_v36, %v7656_v15  ;;  %3314 = vmatpush.msrb.mxu3 %v4317_v48  ;;  %v4407_v48 = vld [vmem:[%s8593_s5 + $0x4b0] sm:$0xff] }
 0x43e   :  { %3337 = vmatpush.msra.mxu2 %v4330_v56  ;;  %v3139_v56 = vld [vmem:[%s8593_s5 + $0x60] sm:$0xff] }
 0x43f   :  { %v3670_v1 = vrot.slane %v7650_v62, 5  ;;  %3315 = vmatpush.msrb.mxu3 %v4316_v11  ;;  %v3140_v11 = vld [vmem:[%s8593_s5 + $0x68] sm:$0xff] }
 0x440   :  { %3338 = vmatpush.msra.mxu2 %v4329_v31  ;;  %v3154_v31 = vld [vmem:[%s8593_s5 + $0xd8] sm:$0xff] }
 0x441   :  { %v3671_v53 = vsel %vm3234_vm5, %v3670_v1, %v3669_v10  ;;  %3316 = vmatpush.msrb.mxu3 %v4315_v21  ;;  %v4313_v1 = vld [vmem:[%s8593_s5 + $0x1d8] sm:$0xff]  ;;  %v3155_v21 = vld [vmem:[%s8593_s5 + $0xe0] sm:$0xff] }
 0x442   :  { %3902 = vrot.lane.b32.xlu0 %v7660_v24, %s4541_s4  ;;  %v3673_v3 = vsel %vm3236_vm6, %v3672_v9, %v3671_v53  ;;  %v3158_v53 = vld [vmem:[%s8593_s5 + $0xf8] sm:$0xff]  ;;  %v9007_v9 = vld [vmem:[#allocation3_spill] sm:$0xff] }
 0x443   :  { %4526 = vrot.lane.b32.xlu2 %v4525_v27, %s4541_s4  ;;  %3317 = vmatpush.msrb.mxu3 %v4314_v13  ;;  %v4328_v27 = vld [vmem:[%s8593_s5 + $0x250] sm:$0xff]  ;;  %v4405_v13 = vld [vmem:[%s8593_s5 + $0x4a0] sm:$0xff] }
 0x444   :  { %3339 = vmatpush.msra.mxu2 %v4328_v27 }
 0x445   :  { %3318 = vmatpush.msrb.mxu3 %v4313_v1  ;;  %v4404_v1 = vld [vmem:[%s8593_s5 + $0x498] sm:$0xff] }
 0x446   :  { %3340 = vmatpush.msra.mxu2 %v4327_v63  ;;  %v3137_v63 = vld [vmem:[%s8593_s5 + $0x50] sm:$0xff] }
 0x447   :  { %3319 = vmatpush.msrb.mxu3 %v4312_v38 }
 0x448   :  { %3341 = vmatpush.msra.mxu2 %v4326_v30  ;;  %v3152_v30 = vld [vmem:[%s8593_s5 + $0xc8] sm:$0xff] }
 0x449   :  { %3320 = vmatpush.msrb.mxu3 %v4311_v23  ;;  %v4403_v23 = vld [vmem:[%s8593_s5 + $0x490] sm:$0xff] }
 0x44a   :  { %4521 = vrot.lane.b32.xlu0 %v4520_v44, %s4541_s4  ;;  %v4408_v44 = vld [vmem:[%s8593_s5 + $0x4b8] sm:$0xff]  ;;  %3412 = vmatpush.msrb.mxu2 %v3158_v53  ;;  %v3151_v53 = vld [vmem:[%s8593_s5 + $0xc0] sm:$0xff] }
 0x44b   :  { %3707 = vmatpush.msra.mxu0 %v4408_v44  ;;  %v3136_v44 = vld [vmem:[%s8593_s5 + $0x48] sm:$0xff] }
 0x44c   :  { %3413 = vmatpush.msrb.mxu2 %v3157_v61 }
 0x44d   :  { %3708 = vmatpush.msra.mxu0 %v4407_v48  ;;  %v3134_v48 = vld [vmem:[%s8593_s5 + $0x38] sm:$0xff] }
 0x44e   :  { %3414 = vmatpush.msrb.mxu2 %v3156_v41  ;;  %v4400_v41 = vld [vmem:[%s8593_s5 + $0x478] sm:$0xff] }
 0x44f   :  { %3709 = vmatpush.msra.mxu0 %v4406_v52  ;;  %v3149_v52 = vld [vmem:[%s8593_s5 + $0xb0] sm:$0xff] }
 0x450   :  { %3415 = vmatpush.msrb.mxu2 %v3155_v21  ;;  %v3133_v21 = vld [vmem:[%s8593_s5 + $0x30] sm:$0xff] }
 0x451   :  { %3710 = vmatpush.msra.mxu0 %v4405_v13  ;;  %v3148_v13 = vld [vmem:[%s8593_s5 + $0xa8] sm:$0xff] }
 0x452   :  { %4531 = vrot.lane.b32.xlu0 %v4530_v14, %s4541_s4  ;;  %v4310_v14 = vld [vmem:[%s8593_s5 + $0x1c0] sm:$0xff]  ;;  %3416 = vmatpush.msrb.mxu2 %v3154_v31  ;;  %v3132_v31 = vld [vmem:[%s8593_s5 + $0x28] sm:$0xff] }
 0x453   :  { %3321 = vmatpush.msrb.mxu3 %v4310_v14  ;;  %3711 = vmatpush.msra.mxu0 %v4404_v1  ;;  %v4402_v14 = vld [vmem:[%s8593_s5 + $0x488] sm:$0xff]  ;;  %v3147_v1 = vld [vmem:[%s8593_s5 + $0xa0] sm:$0xff] }
 0x455   :  { %3392 = vmatpush.msra.mxu3 %v3142_v18  ;;  %3712 = vmatpush.msra.mxu0 %v4403_v23  ;;  %v3135_v18 = vld [vmem:[%s8593_s5 + $0x40] sm:$0xff]  ;;  %v4396_v23 = vld [vmem:[%s8593_s5 + $0x458] sm:$0xff] }
 0x457   :  { %3393 = vmatpush.msra.mxu3 %v3141_v33  ;;  %3713 = vmatpush.msra.mxu0 %v4402_v14  ;;  %v3150_v33 = vld [vmem:[%s8593_s5 + $0xb8] sm:$0xff] }
 0x458   :  { %v9008_v14 = vld [vmem:[#allocation81_spill] sm:$0xff] }
 0x459   :  { %3394 = vmatpush.msra.mxu3 %v3140_v11  ;;  %3714 = vmatpush.msra.mxu0 %v4401_v35  ;;  %v3129_v35 = vld [vmem:[%s8593_s5 + $0x10] sm:$0xff] }
 0x45b   :  { %3395 = vmatpush.msra.mxu3 %v3139_v56  ;;  %3715 = vmatpush.msra.mxu0 %v4400_v41  ;;  %v4399_v56 = vld [vmem:[%s8593_s5 + $0x470] sm:$0xff] }
 0x45c   :  { %v7732_v10 = vpop.permute.xlu1 %3036 }
 0x45d   :  { %v7739_v17 = vmax.f32 %v9006_v45, %v7732_v10  ;;  %v4432_v45 = vld [vmem:[%s8593_s5 + $0x570] sm:$0xff]  ;;  %3396 = vmatpush.msra.mxu3 %v3138_v2  ;;  %3716 = vmatpush.msra.mxu0 %v4399_v56  ;;  %v4398_v2 = vld [vmem:[%s8593_s5 + $0x468] sm:$0xff]  ;;  %v3143_v56 = vld [vmem:[%s8593_s5 + $0x80] sm:$0xff] }
 0x45e   :  { %4092 = vmatpush.msra.mxu1 %v4432_v45  ;;  %v3131_v45 = vld [vmem:[%s8593_s5 + $0x20] sm:$0xff] }
 0x45f   :  { %v3674_v5 = vrot.slane %v7739_v17, 3  ;;  %3397 = vmatpush.msra.mxu3 %v3137_v63  ;;  %3717 = vmatpush.msra.mxu0 %v4398_v2  ;;  %v3130_v63 = vld [vmem:[%s8593_s5 + $0x18] sm:$0xff] }
 0x461   :  { %v3675_v55 = vsel %vm3239_vm7, %v3674_v5, %v3673_v3  ;;  %v3153_v5 = vld [vmem:[%s8593_s5 + $0xd0] sm:$0xff]  ;;  %3398 = vmatpush.msra.mxu3 %v3136_v44 }
 0x462   :  { %3417 = vmatpush.msrb.mxu2 %v3153_v5  ;;  %v3146_v5 = vld [vmem:[%s8593_s5 + $0x98] sm:$0xff] }
 0x463   :  { %3399 = vmatpush.msra.mxu3 %v3135_v18  ;;  %v3145_v18 = vld [vmem:[%s8593_s5 + $0x90] sm:$0xff] }
 0x464   :  { %3418 = vmatpush.msrb.mxu2 %v3152_v30  ;;  %v4430_v30 = vld [vmem:[%s8593_s5 + $0x560] sm:$0xff] }
 0x465   :  { %3400 = vmatpush.msra.mxu3 %v3134_v48  ;;  %v3144_v48 = vld [vmem:[%s8593_s5 + $0x88] sm:$0xff] }
 0x466   :  { %3419 = vmatpush.msrb.mxu2 %v3151_v53 }
 0x467   :  { %3401 = vmatpush.msra.mxu3 %v3133_v21 }
 0x468   :  { %3420 = vmatpush.msrb.mxu2 %v3150_v33  ;;  %v4395_v33 = vld [vmem:[%s8593_s5 + $0x450] sm:$0xff] }
 0x469   :  { %3402 = vmatpush.msra.mxu3 %v3132_v31  ;;  %v4393_v31 = vld [vmem:[%s8593_s5 + $0x440] sm:$0xff] }
 0x46a   :  { %3421 = vmatpush.msrb.mxu2 %v3149_v52  ;;  %v4394_v52 = vld [vmem:[%s8593_s5 + $0x448] sm:$0xff] }
 0x46b   :  { %3403 = vmatpush.msra.mxu3 %v3131_v45 }
 0x46c   :  { %v7814_v27 = vpop.permute.xlu0 %3042  ;;  %3422 = vmatpush.msrb.mxu2 %v3148_v13  ;;  %v3127_v13 = vld [vmem:[%s8593_s5] sm:$0xff] }
 0x46d   :  { %v7818_v38 = vmax.f32 %v9007_v9, %v7814_v27  ;;  %v4397_v9 = vld [vmem:[%s8593_s5 + $0x460] sm:$0xff]  ;;  %3404 = vmatpush.msra.mxu3 %v3130_v63 }
 0x46e   :  { %3423 = vmatpush.msrb.mxu2 %v3147_v1  ;;  %3718 = vmatpush.msra.mxu0 %v4397_v9 }
 0x46f   :  { %v3676_v3 = vrot.slane %v7818_v38, 2  ;;  %3405 = vmatpush.msra.mxu3 %v3129_v35 }
 0x470   :  { %3424 = vmatpush.msrb.mxu2 %v3146_v5  ;;  %3719 = vmatpush.msra.mxu0 %v4396_v23  ;;  %v4429_v23 = vld [vmem:[%s8593_s5 + $0x558] sm:$0xff] }
 0x471   :  { %v7849_v61 = vsel %vm3242_vm8, %v3676_v3, %v3675_v55  ;;  %v4431_v55 = vld [vmem:[%s8593_s5 + $0x568] sm:$0xff] }
 0x472   :  { %4093 = vmatpush.msra.mxu1 %v4431_v55  ;;  %3425 = vmatpush.msrb.mxu2 %v3145_v18  ;;  %v3128_v55 = vld [vmem:[%s8593_s5 + $0x8] sm:$0xff] }
 0x473   :  { %3720 = vmatpush.msra.mxu0 %v4395_v33  ;;  %3406 = vmatpush.msra.mxu3 %v3128_v55  ;;  %v4428_v55 = vld [vmem:[%s8593_s5 + $0x550] sm:$0xff] }
 0x474   :  { %v7863_v11 = vpop.permute.xlu2 %3054  ;;  %4094 = vmatpush.msra.mxu1 %v4430_v30  ;;  %3426 = vmatpush.msrb.mxu2 %v3144_v48 }
 0x475   :  { %3721 = vmatpush.msra.mxu0 %v4394_v52  ;;  %v7941_v2 = vmax.f32 %v7468_v8, %v7863_v11  ;;  %3407 = vmatpush.msra.mxu3 %v3127_v13  ;;  %v9012_v52 = vld [vmem:[#allocation23_spill] sm:$0xff] }
 0x476   :  { %3427 = vmatpush.msrb.mxu2 %v3143_v56  ;;  %4095 = vmatpush.msra.mxu1 %v4429_v23  ;;  %v9014_v13 = vld [vmem:[#allocation19_spill] sm:$0xff] }
 0x477   :  { %3722 = vmatpush.msra.mxu0 %v4393_v31  ;;  %v9015_v31 = vunpack.i.h.bf16 %v9014_v13  ;;  %v9024_v13 = vld [vmem:[#allocation2_spill] sm:$0xff] }
 0x478   :  { %4096 = vmatpush.msra.mxu1 %v4428_v55 }
 0x47c   :  { %v7901_v3 = vpop.permute.xlu1 %3048  ;;  %v3879_v44 = vpop.permute.xlu2 %3878 }
 0x47d   :  { %v7908_v53 = vmax.f32 %v9008_v14, %v7901_v3  ;;  %v3961_v21 = vmax.f32 %v7514_v28, %v3879_v44 }
 0x47f   :  { %v3678_v41 = vrot.slane %v7908_v53, 1  ;;  %v4073_v5 = vrot.slane %v3961_v21, 7  ;;  %v9013_v21 = vunpack.i.h.bf16 %v9012_v52 }
 0x481   :  { %v3679_v9 = vsel %vm3245_vm9, %v3678_v41, %v7849_v61  ;;  %v9009_v61 = vld [vmem:[#allocation26_spill] sm:$0xff] }
 0x482   :  { %v7954_v8 = vsel %vm3248_vm10, %v7941_v2, %v3679_v9  ;;  %v9016_v9 = vld [vmem:[#allocation6_spill] sm:$0xff] }
 0x484   :  { %v7943_v28 = vpop.permute.xlu1 %4501 }
 0x485   :  { %v3873_v1 = vpop.permute.xlu2 %3872  ;;  %v8668_v45 = vunpack.i.l.bf16 %v7943_v28 }
 0x486   :  { %v3958_v63 = vmax.f32 %v7567_v58, %v3873_v1  ;;  %v9010_v58 = vld [vmem:[#allocation24_spill] sm:$0xff] }
 0x487   :  { %v3919_v14 = vsel %vm3062_vm4, %v8668_v45, %v3879_v44  ;;  %v9011_v33 = vunpack.i.h.bf16 %v9010_v58  ;;  %v3064_v44 = vsel %vm3062_vm4, %v9013_v21, %v7627_v7  ;;  %v9018_v58 = vld [vmem:[#allocation7_spill] sm:$0xff] }
 0x488   :  { %v7957_v30 = vsel %vm3234_vm5, %v4073_v5, %v3958_v63  ;;  %v3960_v18 = vmax.f32 %v9009_v61, %v3919_v14  ;;  %v9017_v14 = vld [vmem:[#allocation72_spill] sm:$0xff] }
 0x489   :  { %v3066_v48 = vsel %vm3062_vm4, %v9011_v33, %v7646_v6  ;;  %v3068_v6 = vsel %vm3062_vm4, %v9015_v31, %v7711_v40  ;;  %v7989_v61 = vmax.f32 %v9017_v14, %v3064_v44  ;;  %v9020_v33 = vld [vmem:[#allocation114_spill] sm:$0xff]  ;;  %v9025_v31 = vunpack.i.h.bf16 %v9024_v13 }
 0x48a   :  { %v7985_v5 = vmax.f32 %v9016_v9, %v3066_v48  ;;  %v4059_v63 = vrot.slane %v3960_v18, 7  ;;  %v9021_v55 = vunpack.i.h.bf16 %v9020_v33  ;;  %v3268_v18 = vrot.slane %v7650_v62, 1  ;;  %v9027_v33 = vld [vmem:[#allocation17_spill] sm:$0xff] }
 0x48b   :  { %v3267_v9 = vrot.slane %v7642_v0, 2  ;;  %v3655_v14 = vrot.slane %v7989_v61, 6 }
 0x48c   :  { %v7963_v35 = vpop.permute.xlu1 %4506  ;;  %v3070_v40 = vsel %vm3062_vm4, %v9021_v55, %v7732_v10  ;;  %v3254_v48 = vrot.slane %v7985_v5, 1  ;;  %v3360_v44 = vrot.slane %v7985_v5, 7  ;;  %v3253_v10 = vrot.slane %v7989_v61, 2 }
 0x48d   :  { %v8667_v41 = vunpack.i.l.bf16 %v7963_v35 }
 0x48f   :  { %v3917_v56 = vsel %vm3062_vm4, %v8667_v41, %v3873_v1  ;;  %v7995_v1 = vmax.f32 %v9018_v58, %v3068_v6  ;;  %v3074_v6 = vsel %vm3062_vm4, %v9025_v31, %v7901_v3  ;;  %v3255_v3 = vsel %vm3234_vm5, %v3254_v48, %v3253_v10 }
 0x490   :  { %v3957_v23 = vmax.f32 %v7448_v26, %v3917_v56  ;;  %v9022_v26 = vld [vmem:[#allocation113_spill] sm:$0xff]  ;;  %v3656_v56 = vrot.slane %v7985_v5, 5 }
 0x491   :  { %9019 = vst [vmem:[#allocation27_spill] sm:$0xff] %v7995_v1  ;;  %v9023_v52 = vunpack.i.h.bf16 %v9022_v26  ;;  %v3362_v58 = vrot.slane %v7995_v1, 6  ;;  %v3269_v26 = vsel %vm3234_vm5, %v3268_v18, %v3267_v9  ;;  %v3658_v31 = vrot.slane %v7995_v1, 4  ;;  %v9029_v18 = vld [vmem:[#allocation21_spill] sm:$0xff] }
 0x492   :  { %v7992_v7 = vsel %vm3234_vm5, %v4059_v63, %v3957_v23  ;;  %v9026_v63 = vld [vmem:[#allocation75_spill] sm:$0xff]  ;;  %v3657_v41 = vsel %vm3234_vm5, %v3656_v56, %v3655_v14  ;;  %v9030_v10 = vunpack.i.h.bf16 %v9029_v18  ;;  %v3256_v14 = vsel %vm3236_vm6, %v7995_v1, %v3255_v3  ;;  %v9033_v1 = vld [vmem:[#allocation16_spill] sm:$0xff] }
 0x493   :  { %v3072_v21 = vsel %vm3062_vm4, %v9023_v52, %v7814_v27  ;;  %v8016_v23 = vmax.f32 %v9026_v63, %v3070_v40  ;;  %v4427_v27 = vld [vmem:[%s8593_s5 + $0x548] sm:$0xff]  ;;  %v3271_v52 = vrot.slane %v7739_v17, 7  ;;  %v9028_v40 = vld [vmem:[#allocation18_spill] sm:$0xff]  ;;  %v3361_v63 = vsel %vm3234_vm5, %v3360_v44, %v7989_v61 }
 0x494   :  { %v8024_v55 = vmax.f32 %v9027_v33, %v3072_v21  ;;  %4097 = vmatpush.msra.mxu1 %v4427_v27  ;;  %v8030_v13 = vmax.f32 %v9028_v40, %v3074_v6  ;;  %v3273_v21 = vrot.slane %v7818_v38, 6  ;;  %v3076_v9 = vsel %vm3062_vm4, %v9030_v10, %v7863_v11 }
 0x495   :  { %v3257_v27 = vrot.slane %v8016_v23, 7  ;;  %v3660_v48 = vrot.slane %v8016_v23, 3  ;;  %v3275_v6 = vrot.slane %v7908_v53, 5  ;;  %v3270_v33 = vsel %vm3236_vm6, %v7730_v59, %v3269_v26 }
 0x496   :  { %v3259_v44 = vrot.slane %v8024_v55, 6  ;;  %v3662_v56 = vrot.slane %v8024_v55, 2  ;;  %v3272_v40 = vsel %vm3239_vm7, %v3271_v52, %v3270_v33  ;;  %v3261_v45 = vrot.slane %v8030_v13, 5  ;;  %v4426_v52 = vld [vmem:[%s8593_s5 + $0x540] sm:$0xff]  ;;  %v8067_v33 = vpop.permute.xlu1 %4511 }
 0x497   :  { %v3664_v18 = vrot.slane %v8030_v13, 1  ;;  %v3659_v11 = vsel %vm3236_vm6, %v3658_v31, %v3657_v41  ;;  %v3274_v10 = vsel %vm3242_vm8, %v3273_v21, %v3272_v40  ;;  %v8056_v26 = vmax.f32 %v9031_v19, %v3076_v9  ;;  %4098 = vmatpush.msra.mxu1 %v4426_v52 }
 0x498   :  { %v3276_v31 = vsel %vm3245_vm9, %v3275_v6, %v3274_v10  ;;  %v3258_v19 = vsel %vm3239_vm7, %v3257_v27, %v3256_v14  ;;  %v3661_v32 = vsel %vm3239_vm7, %v3660_v48, %v3659_v11  ;;  %v3364_v9 = vrot.slane %v8016_v23, 5  ;;  %v4351_v14 = vld [vmem:[%s8593_s5 + $0x2f8] sm:$0xff] }
 0x499   :  { %v3663_v21 = vsel %vm3242_vm8, %v3662_v56, %v3661_v32  ;;  %v3366_v27 = vrot.slane %v8024_v55, 4  ;;  %v3263_v48 = vrot.slane %v8056_v26, 4  ;;  %v3368_v56 = vrot.slane %v8030_v13, 3 }
 0x49a   :  { %v4504_v11 = vunpack.i.h.bf16 %v7943_v28 }
 0x49c   :  { %v3061_v50 = vpop.permute.xlu0 %3060 }
 0x49d   :  { %v3078_v47 = vsel %vm3062_vm4, %v9032_v60, %v3061_v50  ;;  %v8062_v3 = vmax.f32 %v7562_v29, %v3061_v50  ;;  %v3277_v60 = vrot.slane %v7941_v2, 4  ;;  %v3260_v29 = vsel %vm3242_vm8, %v3259_v44, %v3258_v19  ;;  %v4425_v19 = vld [vmem:[%s8593_s5 + $0x538] sm:$0xff] }
 0x49e   :  { %v8070_v41 = vmax.f32 %v9033_v1, %v3078_v47  ;;  %v3262_v47 = vsel %vm3245_vm9, %v3261_v45, %v3260_v29  ;;  %v3665_v1 = vsel %vm3245_vm9, %v3664_v18, %v3663_v21  ;;  %v3363_v44 = vsel %vm3236_vm6, %v3362_v58, %v3361_v63  ;;  %v3166_v58 = vld [vmem:[%s8593_s5 + $0x138] sm:$0xff]  ;;  %4099 = vmatpush.msra.mxu1 %v4425_v19 }
 0x49f   :  { %v3279_v50 = vrot.slane %v8062_v3, 3  ;;  %v3278_v6 = vsel %vm3248_vm10, %v3277_v60, %v3276_v31  ;;  %v3681_v10 = vrot.slane %v8062_v3, 7  ;;  %v3264_v52 = vsel %vm3248_vm10, %v3263_v48, %v3262_v47  ;;  %v4350_v31 = vld [vmem:[%s8593_s5 + $0x2f0] sm:$0xff] }
 0x4a0   :  { %v3265_v45 = vrot.slane %v8070_v41, 3  ;;  %v3667_v18 = vrot.slane %v8070_v41, 7  ;;  %v3666_v63 = vsel %vm3248_vm10, %v8056_v26, %v3665_v1  ;;  %v3365_v29 = vsel %vm3239_vm7, %v3364_v9, %v3363_v44  ;;  %v3165_v48 = vld [vmem:[%s8593_s5 + $0x130] sm:$0xff]  ;;  %v8126_v44 = vpop.permute.xlu2 %3896 }
 0x4a1   :  { %v3280_v40 = vsel %vm3251_vm11, %v3279_v50, %v3278_v6  ;;  %v3374_v21 = vrot.slane %v7650_v62, 7  ;;  %v4349_v6 = vld [vmem:[%s8593_s5 + $0x2e8] sm:$0xff]  ;;  %v3367_v9 = vsel %vm3242_vm8, %v3366_v27, %v3365_v29 }
 0x4a2   :  { %4334 = vmatmul.msk.f32.vlgmr.msra.gmra.mxu2 %vm3283_vm12, %v3280_v40  ;;  %v3266_v32 = vsel %vm3251_vm11, %v3265_v45, %v3264_v52  ;;  %v3668_v60 = vsel %vm3251_vm11, %v3667_v18, %v3666_v63  ;;  %v4513_v40 = vunpack.i.l.bf16 %v8067_v33  ;;  %v3369_v18 = vsel %vm3245_vm9, %v3368_v56, %v3367_v9  ;;  %v3164_v27 = vld [vmem:[%s8593_s5 + $0x128] sm:$0xff] }
 0x4a3   :  { %3539 = vmatpush.msra.mxu2 %v4351_v14  ;;  %3322 = vmatmul.f32.vlgmr.msrb.gmra.mxu3 %v3266_v32  ;;  %v4424_v14 = vld [vmem:[%s8593_s5 + $0x530] sm:$0xff]  ;;  %v3372_v52 = vrot.slane %v8070_v41, 1  ;;  %v3370_v63 = vrot.slane %v8056_v26, 2  ;;  %v4348_v32 = vld [vmem:[%s8593_s5 + $0x2e0] sm:$0xff]  ;;  %v8144_v56 = vsel %vm3251_vm11, %v3681_v10, %v7954_v8  ;;  %v3375_v29 = vsel %vm3234_vm5, %v3374_v21, %v7642_v0  ;;  %v4347_v10 = vld [vmem:[%s8593_s5 + $0x2d8] sm:$0xff] }
 0x4a4   :  { %v3885_v50 = vpop.permute.xlu0 %3884  ;;  %3723 = vmatmul.f32.vlgmr.msra.gmra.mxu0 %v3668_v60  ;;  %3440 = vmatpush.msrb.mxu3 %v3166_v58  ;;  %v4423_v58 = vld [vmem:[%s8593_s5 + $0x528] sm:$0xff]  ;;  %v3378_v21 = vrot.slane %v7739_v17, 5 }
 0x4a5   :  { %v3921_v47 = vsel %vm3062_vm4, %v4504_v11, %v3885_v50  ;;  %v3964_v1 = vmax.f32 %v7601_v54, %v3885_v50  ;;  %v9034_v54 = vld [vmem:[#allocation25_spill] sm:$0xff]  ;;  %3540 = vmatpush.msra.mxu2 %v4350_v31  ;;  %4100 = vmatpush.msra.mxu1 %v4424_v14  ;;  %v8146_v31 = vpop.permute.xlu1 %4516  ;;  %v3376_v50 = vrot.slane %v7730_v59, 6  ;;  %v3371_v8 = vsel %vm3248_vm10, %v3370_v63, %v3369_v18  ;;  %v4346_v18 = vld [vmem:[%s8593_s5 + $0x2d0] sm:$0xff] }
 0x4a6   :  { %v3963_v45 = vmax.f32 %v9034_v54, %v3921_v47  ;;  %3441 = vmatpush.msrb.mxu3 %v3165_v48  ;;  %v4422_v48 = vld [vmem:[%s8593_s5 + $0x520] sm:$0xff]  ;;  %v3373_v9 = vsel %vm3251_vm11, %v3372_v52, %v3371_v8  ;;  %v3380_v14 = vrot.slane %v7818_v38, 4  ;;  %v4509_v54 = vunpack.i.h.bf16 %v7963_v35  ;;  %v3160_v8 = vld [vmem:[%s8593_s5 + $0x108] sm:$0xff] }
 0x4a7   :  { %v4075_v19 = vrot.slane %v3964_v1, 6  ;;  %3541 = vmatpush.msra.mxu2 %v4349_v6  ;;  %v3163_v1 = vld [vmem:[%s8593_s5 + $0x120] sm:$0xff]  ;;  %4101 = vmatpush.msra.mxu1 %v4423_v58  ;;  %v3377_v52 = vsel %vm3236_vm6, %v3376_v50, %v3375_v29  ;;  %v3382_v63 = vrot.slane %v7908_v53, 3  ;;  %v4518_v58 = vunpack.i.l.bf16 %v8146_v31  ;;  %v3161_v29 = vld [vmem:[%s8593_s5 + $0x110] sm:$0xff] }
 0x4a8   :  { %v4061_v60 = vrot.slane %v3963_v45, 6  ;;  %3442 = vmatpush.msrb.mxu3 %v3164_v27  ;;  %v3162_v45 = vld [vmem:[%s8593_s5 + $0x118] sm:$0xff] }
 0x4a9   :  { %v4076_v47 = vsel %vm3236_vm6, %v4075_v19, %v7957_v30  ;;  %v3925_v30 = vsel %vm3062_vm4, %v4513_v40, %v8126_v44  ;;  %3542 = vmatpush.msra.mxu2 %v4348_v32  ;;  %4102 = vmatpush.msra.mxu1 %v4422_v48  ;;  %v3970_v19 = vmax.f32 %v7607_v4, %v8126_v44  ;;  %v4345_v4 = vld [vmem:[%s8593_s5 + $0x2c8] sm:$0xff] }
 0x4aa   :  { %v4062_v6 = vsel %vm3236_vm6, %v4061_v60, %v7992_v7  ;;  %3428 = vmatmul.f32.vlgmr.msrb.gmra.mxu2 %v3373_v9  ;;  %v4421_v7 = vld [vmem:[%s8593_s5 + $0x518] sm:$0xff]  ;;  %3443 = vmatpush.msrb.mxu3 %v3163_v1  ;;  %v3969_v32 = vmax.f32 %v7500_v57, %v3925_v30  ;;  %v4420_v57 = vld [vmem:[%s8593_s5 + $0x510] sm:$0xff]  ;;  %v4419_v48 = vld [vmem:[%s8593_s5 + $0x508] sm:$0xff]  ;;  %v3909_v30 = vpop.permute.xlu2 %3908 }
 0x4ab   :  { %3543 = vmatpush.msra.mxu2 %v4347_v10  ;;  %3408 = vmatmul.f32.vlgmr.msra.gmra.mxu3 %v7586_v42  ;;  %v3379_v42 = vsel %vm3239_vm7, %v3378_v21, %v3377_v52  ;;  %v4344_v10 = vld [vmem:[%s8593_s5 + $0x2c0] sm:$0xff]  ;;  %v4079_v21 = vrot.slane %v3970_v19, 4  ;;  %v4343_v19 = vld [vmem:[%s8593_s5 + $0x2b8] sm:$0xff] }
 0x4ac   :  { %v3891_v27 = vpop.permute.xlu0 %3890  ;;  %4103 = vmatpush.msra.mxu1 %v4421_v7  ;;  %3444 = vmatpush.msrb.mxu3 %v3162_v45  ;;  %v3386_v45 = vrot.slane %v8062_v3, 1  ;;  %v3159_v52 = vld [vmem:[%s8593_s5 + $0x100] sm:$0xff] }
 0x4ad   :  { %v3923_v60 = vsel %vm3062_vm4, %v4509_v54, %v3891_v27  ;;  %v3967_v50 = vmax.f32 %v7629_v22, %v3891_v27  ;;  %3544 = vmatpush.msra.mxu2 %v4346_v18  ;;  %v3381_v22 = vsel %vm3242_vm8, %v3380_v14, %v3379_v42  ;;  %v4065_v14 = vrot.slane %v3969_v32, 4  ;;  %v8230_v32 = vpop.permute.xlu1 %3914 }
 0x4ae   :  { %v3966_v44 = vmax.f32 %v7440_v37, %v3923_v60  ;;  %4104 = vmatpush.msra.mxu1 %v4420_v57  ;;  %3445 = vmatpush.msrb.mxu3 %v3161_v29  ;;  %v3383_v9 = vsel %vm3245_vm9, %v3382_v63, %v3381_v22  ;;  %v3929_v18 = vsel %vm3062_vm4, %v4518_v58, %v3909_v30  ;;  %v4418_v63 = vld [vmem:[%s8593_s5 + $0x500] sm:$0xff]  ;;  %v3384_v27 = vrot.slane %v7941_v2, 2  ;;  %v4342_v57 = vld [vmem:[%s8593_s5 + $0x2b0] sm:$0xff] }
 0x4af   :  { %v4077_v1 = vrot.slane %v3967_v50, 5  ;;  %3545 = vmatpush.msra.mxu2 %v4345_v4  ;;  %v4514_v29 = vunpack.i.h.bf16 %v8067_v33  ;;  %v3976_v42 = vmax.f32 %v7633_v34, %v3909_v30  ;;  %v4356_v33 = vld [vmem:[%s8593_s5 + $0x320] sm:$0xff] }
 0x4b0   :  { %v4063_v37 = vrot.slane %v3966_v44, 5  ;;  %4105 = vmatpush.msra.mxu1 %v4419_v48  ;;  %3446 = vmatpush.msrb.mxu3 %v3160_v8  ;;  %v3385_v44 = vsel %vm3248_vm10, %v3384_v27, %v3383_v9  ;;  %v3979_v8 = vmax.f32 %v7603_v12, %v8230_v32  ;;  %v4341_v48 = vld [vmem:[%s8593_s5 + $0x2a8] sm:$0xff]  ;;  %v4519_v9 = vunpack.i.h.bf16 %v8146_v31 }
 0x4b1   :  { %v4078_v7 = vsel %vm3239_vm7, %v4077_v1, %v4076_v47  ;;  %3546 = vmatpush.msra.mxu2 %v4344_v10  ;;  %v4367_v47 = vld [vmem:[%s8593_s5 + $0x378] sm:$0xff]  ;;  %v4366_v1 = vld [vmem:[%s8593_s5 + $0x370] sm:$0xff]  ;;  %v3387_v10 = vsel %vm3251_vm11, %v3386_v45, %v3385_v44  ;;  %v4365_v12 = vld [vmem:[%s8593_s5 + $0x368] sm:$0xff] }
 0x4b2   :  { %v4064_v60 = vsel %vm3239_vm7, %v4063_v37, %v4062_v6  ;;  %v4080_v50 = vsel %vm3242_vm8, %v4079_v21, %v4078_v7  ;;  %4106 = vmatpush.msra.mxu1 %v4418_v63  ;;  %v3975_v6 = vmax.f32 %v7530_v39, %v3929_v18  ;;  %3447 = vmatpush.msrb.mxu3 %v3159_v52  ;;  %v4340_v37 = vld [vmem:[%s8593_s5 + $0x2a0] sm:$0xff]  ;;  %v4085_v18 = vrot.slane %v3979_v8, 1  ;;  %v4339_v52 = vld [vmem:[%s8593_s5 + $0x298] sm:$0xff]  ;;  %v4362_v44 = vld [vmem:[%s8593_s5 + $0x350] sm:$0xff] }
 0x4b3   :  { %v4066_v4 = vsel %vm3242_vm8, %v4065_v14, %v4064_v60  ;;  %3547 = vmatpush.msra.mxu2 %v4343_v19  ;;  %4335 = vmatmul.msk.f32.vlgmr.msrb.gmra.mxu3 %vm3283_vm12, %v3387_v10  ;;  %v4527_v19 = vpop.permute.xlu2 %4526  ;;  %v4363_v60 = vld [vmem:[%s8593_s5 + $0x358] sm:$0xff]  ;;  %v4337_v8 = vld [vmem:[%s8593_s5 + $0x288] sm:$0xff] }
 0x4b4   :  { %v3903_v22 = vpop.permute.xlu0 %3902  ;;  %3559 = vmatpush.msra.mxu3 %v4367_v47  ;;  %v4069_v45 = vrot.slane %v3975_v6, 2  ;;  %v4338_v47 = vld [vmem:[%s8593_s5 + $0x290] sm:$0xff]  ;;  %v4529_v10 = vunpack.i.h.bf16 %v4527_v19  ;;  %v4357_v31 = vld [vmem:[%s8593_s5 + $0x328] sm:$0xff] }
 0x4b5   :  { %v3927_v34 = vsel %vm3062_vm4, %v4514_v29, %v3903_v22  ;;  %v3973_v39 = vmax.f32 %v7660_v24, %v3903_v22  ;;  %3548 = vmatpush.msra.mxu2 %v4342_v57  ;;  %v4083_v24 = vrot.slane %v3976_v42, 2  ;;  %v4528_v22 = vunpack.i.l.bf16 %v4527_v19 }
 0x4b6   :  { %v3972_v21 = vmax.f32 %v7482_v46, %v3927_v34  ;;  %3560 = vmatpush.msra.mxu3 %v4366_v1  ;;  %v4364_v46 = vld [vmem:[%s8593_s5 + $0x360] sm:$0xff]  ;;  %v4537_v34 = vpop.permute.xlu1 %4536 }
 0x4b7   :  { %v4081_v30 = vrot.slane %v3973_v39, 3  ;;  %3549 = vmatpush.msra.mxu2 %v4341_v48  ;;  %v4361_v39 = vld [vmem:[%s8593_s5 + $0x348] sm:$0xff] }
 0x4b8   :  { %v4067_v14 = vrot.slane %v3972_v21, 3  ;;  %3561 = vmatpush.msra.mxu3 %v4365_v12  ;;  %v4336_v12 = vld [vmem:[%s8593_s5 + $0x280] sm:$0xff] }
 0x4b9   :  { %v4082_v7 = vsel %vm3245_vm9, %v4081_v30, %v4080_v50  ;;  %3550 = vmatpush.msra.mxu2 %v4340_v37  ;;  %v4360_v37 = vld [vmem:[%s8593_s5 + $0x340] sm:$0xff] }
 0x4ba   :  { %v4068_v63 = vsel %vm3245_vm9, %v4067_v14, %v4066_v4  ;;  %v4084_v27 = vsel %vm3248_vm10, %v4083_v24, %v4082_v7  ;;  %3562 = vmatpush.msra.mxu3 %v4364_v46  ;;  %v9035_v4 = vunpack.i.l.bf16 %v7943_v28  ;;  %v9036_v24 = vunpack.i.l.bf16 %v7963_v35  ;;  %v4375_v28 = vld [vmem:[%s8593_s5 + $0x3b8] sm:$0xff] }
 0x4bb   :  { %v8283_v50 = vsel %vm3248_vm10, %v4069_v45, %v4068_v63  ;;  %v8286_v57 = vsel %vm3251_vm11, %v4085_v18, %v4084_v27  ;;  %3551 = vmatpush.msra.mxu2 %v4339_v52  ;;  %v4359_v46 = vld [vmem:[%s8593_s5 + $0x338] sm:$0xff]  ;;  %v3521_v45 = vrot.slane %v7642_v0, 4  ;;  %v3508_v35 = vrot.slane %v7985_v5, 3  ;;  %v4358_v0 = vld [vmem:[%s8593_s5 + $0x330] sm:$0xff] }
 0x4bc   :  { %v3918_v42 = vsel %vm3062_vm4, %v4519_v9, %v9035_v4  ;;  %v8291_v6 = vpop.permute.xlu0 %4521  ;;  %3563 = vmatpush.msra.mxu3 %v4363_v60  ;;  %v4538_v9 = vunpack.i.l.bf16 %v4537_v34  ;;  %v4539_v7 = vunpack.i.h.bf16 %v4537_v34  ;;  %v3507_v5 = vrot.slane %v7989_v61, 4  ;;  %v9037_v34 = vld [vmem:[#allocation31_spill] sm:$0xff] }
 0x4bd   :  { %v4524_v1 = vunpack.i.h.bf16 %v8291_v6  ;;  %3552 = vmatpush.msra.mxu2 %v4338_v47  ;;  %v3959_v48 = vmax.f32 %v7528_v20, %v3918_v42  ;;  %v3916_v20 = vsel %vm3062_vm4, %v4528_v22, %v9036_v24  ;;  %v4523_v14 = vunpack.i.l.bf16 %v8291_v6  ;;  %v4436_v6 = vld [vmem:[%s8593_s5 + $0x590] sm:$0xff] }
 0x4be   :  { %3564 = vmatpush.msra.mxu3 %v4362_v44  ;;  %v3524_v47 = vrot.slane %v7730_v59, 2  ;;  %v4372_v44 = vld [vmem:[%s8593_s5 + $0x3a0] sm:$0xff] }
 0x4bf   :  { %v3920_v21 = vsel %vm3062_vm4, %v4524_v1, %v4504_v11  ;;  %3553 = vmatpush.msra.mxu2 %v4337_v8  ;;  %v3522_v11 = vrot.slane %v7650_v62, 3  ;;  %v4045_v18 = vrot.slane %v3959_v48, 7  ;;  %v4374_v62 = vld [vmem:[%s8593_s5 + $0x3b0] sm:$0xff] }
 0x4c0   :  { %v3962_v30 = vmax.f32 %v7678_v49, %v3920_v21  ;;  %3565 = vmatpush.msra.mxu3 %v4361_v39  ;;  %v3922_v49 = vsel %vm3062_vm4, %v4529_v10, %v4509_v54  ;;  %v3956_v54 = vmax.f32 %v7656_v15, %v3916_v20  ;;  %v4373_v15 = vld [vmem:[%s8593_s5 + $0x3a8] sm:$0xff]  ;;  %v4370_v20 = vld [vmem:[%s8593_s5 + $0x390] sm:$0xff] }
 0x4c1   :  { %3554 = vmatpush.msra.mxu2 %v4336_v12  ;;  %v3965_v63 = vmax.f32 %v7652_v36, %v3922_v49  ;;  %v3523_v4 = vsel %vm3234_vm5, %v3522_v11, %v3521_v45  ;;  %v3930_v36 = vsel %vm3062_vm4, %v4539_v7, %v4523_v14  ;;  %v4354_v49 = vld [vmem:[%s8593_s5 + $0x310] sm:$0xff]  ;;  %v4353_v7 = vld [vmem:[%s8593_s5 + $0x308] sm:$0xff] }
 0x4c2   :  { %3566 = vmatpush.msra.mxu3 %v4360_v37  ;;  %3555 = vmatmul.f32.vlgmr.msra.gmra.mxu2 %v7590_v51  ;;  %v4047_v52 = vrot.slane %v3962_v30, 6  ;;  %v3928_v51 = vsel %vm3062_vm4, %v4538_v9, %v4518_v58  ;;  %v3526_v58 = vrot.slane %v7739_v17, 1  ;;  %v4046_v42 = vsel %vm3234_vm5, %v4045_v18, %v3956_v54  ;;  %v4355_v30 = vld [vmem:[%s8593_s5 + $0x318] sm:$0xff]  ;;  %v4369_v18 = vld [vmem:[%s8593_s5 + $0x388] sm:$0xff] }
 0x4c3   :  { %3587 = vmatpush.msrb.mxu2 %v4375_v28  ;;  %v3974_v22 = vmax.f32 %v7623_v16, %v3928_v51  ;;  %v4049_v10 = vrot.slane %v3965_v63, 5  ;;  %v3977_v39 = vmax.f32 %v9037_v34, %v3930_v36  ;;  %v4371_v16 = vld [vmem:[%s8593_s5 + $0x398] sm:$0xff]  ;;  %v3515_v37 = vrot.slane %v8030_v13, 7  ;;  %v4414_v36 = vld [vmem:[%s8593_s5 + $0x4e8] sm:$0xff]  ;;  %v4383_v34 = vld [vmem:[%s8593_s5 + $0x3f0] sm:$0xff] }
 0x4c4   :  { %v4532_v19 = vpop.permute.xlu0 %4531  ;;  %3567 = vmatpush.msra.mxu3 %v4359_v46  ;;  %v4048_v1 = vsel %vm3236_vm6, %v4047_v52, %v4046_v42  ;;  %v3533_v54 = vrot.slane %v8062_v3, 5  ;;  %v3519_v63 = vrot.slane %v8070_v41, 5  ;;  %v3517_v51 = vrot.slane %v8056_v26, 6  ;;  %v4392_v26 = vld [vmem:[%s8593_s5 + $0x438] sm:$0xff]  ;;  %v4389_v42 = vld [vmem:[%s8593_s5 + $0x420] sm:$0xff] }
 0x4c5   :  { %v4534_v27 = vunpack.i.h.bf16 %v4532_v19  ;;  %v4533_v60 = vunpack.i.l.bf16 %v4532_v19  ;;  %3588 = vmatpush.msrb.mxu2 %v4374_v62  ;;  %v4050_v24 = vsel %vm3239_vm7, %v4049_v10, %v4048_v1  ;;  %v4055_v28 = vrot.slane %v3974_v22, 2  ;;  %v4387_v22 = vld [vmem:[%s8593_s5 + $0x410] sm:$0xff]  ;;  %v4410_v1 = vld [vmem:[%s8593_s5 + $0x4c8] sm:$0xff] }
 0x4c6   :  { %3568 = vmatpush.msra.mxu3 %v4358_v0  ;;  %v4057_v45 = vrot.slane %v3977_v39, 1  ;;  %v3531_v19 = vrot.slane %v7941_v2, 6  ;;  %v4368_v0 = vld [vmem:[%s8593_s5 + $0x380] sm:$0xff]  ;;  %v4448_v10 = vld [vmem:[%s8593_s5 + $0x5f0] sm:$0xff]  ;;  %v4447_v39 = vld [vmem:[%s8593_s5 + $0x5e8] sm:$0xff] }
 0x4c7   :  { %v3924_v61 = vsel %vm3062_vm4, %v4533_v60, %v4513_v40  ;;  %v3926_v59 = vsel %vm3062_vm4, %v4534_v27, %v4514_v29  ;;  %3589 = vmatpush.msrb.mxu2 %v4373_v15  ;;  %v3509_v40 = vsel %vm3234_vm5, %v3508_v35, %v3507_v5  ;;  %v3512_v29 = vrot.slane %v8016_v23, 1  ;;  %v4352_v27 = vld [vmem:[%s8593_s5 + $0x300] sm:$0xff]  ;;  %v4416_v60 = vld [vmem:[%s8593_s5 + $0x4f8] sm:$0xff] }
 0x4c8   :  { %v3968_v17 = vmax.f32 %v7685_v43, %v3924_v61  ;;  %v3971_v8 = vmax.f32 %v7683_v25, %v3926_v59  ;;  %3569 = vmatpush.msra.mxu3 %v4357_v31  ;;  %v9038_v43 = vld [vmem:[#allocation27_spill] sm:$0xff]  ;;  %v3529_v25 = vrot.slane %v7908_v53, 7  ;;  %v3525_v23 = vsel %vm3236_vm6, %v3524_v47, %v3523_v4  ;;  %v4415_v47 = vld [vmem:[%s8593_s5 + $0x4f0] sm:$0xff]  ;;  %v4412_v61 = vld [vmem:[%s8593_s5 + $0x4d8] sm:$0xff] }
 0x4c9   :  { %v3510_v48 = vrot.slane %v9038_v43, 2  ;;  %3590 = vmatpush.msrb.mxu2 %v4372_v44  ;;  %v3527_v9 = vsel %vm3239_vm7, %v3526_v58, %v3525_v23  ;;  %v4391_v4 = vld [vmem:[%s8593_s5 + $0x430] sm:$0xff]  ;;  %v4390_v31 = vld [vmem:[%s8593_s5 + $0x428] sm:$0xff]  ;;  %v4413_v58 = vld [vmem:[%s8593_s5 + $0x4e0] sm:$0xff] }
 0x4ca   :  { %v4051_v21 = vrot.slane %v3968_v17, 4  ;;  %v4053_v12 = vrot.slane %v3971_v8, 3  ;;  %3570 = vmatpush.msra.mxu3 %v4356_v33  ;;  %v3528_v46 = vsel %vm3242_vm8, %v7818_v38, %v3527_v9  ;;  %v4388_v59 = vld [vmem:[%s8593_s5 + $0x418] sm:$0xff]  ;;  %v4411_v44 = vld [vmem:[%s8593_s5 + $0x4d0] sm:$0xff]  ;;  %v4386_v17 = vld [vmem:[%s8593_s5 + $0x408] sm:$0xff] }
 0x4cb   :  { %v3511_v53 = vsel %vm3236_vm6, %v3510_v48, %v3509_v40  ;;  %3591 = vmatpush.msrb.mxu2 %v4371_v16  ;;  %v3530_v38 = vsel %vm3245_vm9, %v3529_v25, %v3528_v46  ;;  %v4409_v8 = vld [vmem:[%s8593_s5 + $0x4c0] sm:$0xff]  ;;  %v4449_v40 = vld [vmem:[%s8593_s5 + $0x5f8] sm:$0xff]  ;;  %v4382_v16 = vld [vmem:[%s8593_s5 + $0x3e8] sm:$0xff]  ;;  %v3931_v46 = vsel %vm3062_vm4, %v4523_v14, %v8230_v32 }
 0x4cc   :  { %v4052_v11 = vsel %vm3242_vm8, %v4051_v21, %v4050_v24  ;;  %v3513_v13 = vsel %vm3239_vm7, %v3512_v29, %v3511_v53  ;;  %3571 = vmatpush.msra.mxu3 %v4355_v30  ;;  %v3532_v2 = vsel %vm3248_vm10, %v3531_v19, %v3530_v38  ;;  %v4385_v33 = vld [vmem:[%s8593_s5 + $0x400] sm:$0xff]  ;;  %v4384_v29 = vld [vmem:[%s8593_s5 + $0x3f8] sm:$0xff]  ;;  %v4444_v21 = vld [vmem:[%s8593_s5 + $0x5d0] sm:$0xff] }
 0x4cd   :  { %v4054_v62 = vsel %vm3245_vm9, %v4053_v12, %v4052_v11  ;;  %v3514_v35 = vsel %vm3242_vm8, %v8024_v55, %v3513_v13  ;;  %3592 = vmatpush.msrb.mxu2 %v4370_v20  ;;  %v3534_v15 = vsel %vm3251_vm11, %v3533_v54, %v3532_v2  ;;  %v4381_v43 = vld [vmem:[%s8593_s5 + $0x3e0] sm:$0xff]  ;;  %v4445_v48 = vld [vmem:[%s8593_s5 + $0x5d8] sm:$0xff]  ;;  %v4379_v12 = vld [vmem:[%s8593_s5 + $0x3d0] sm:$0xff] }
 0x4ce   :  { %v4056_v52 = vsel %vm3248_vm10, %v4055_v28, %v4054_v62  ;;  %3572 = vmatpush.msra.mxu3 %v4354_v49  ;;  %v3516_v3 = vsel %vm3245_vm9, %v3515_v37, %v3514_v35  ;;  %v4380_v25 = vld [vmem:[%s8593_s5 + $0x3d8] sm:$0xff]  ;;  %v4443_v30 = vld [vmem:[%s8593_s5 + $0x5c8] sm:$0xff]  ;;  %v4442_v37 = vld [vmem:[%s8593_s5 + $0x5c0] sm:$0xff] }
 0x4cf   :  { %v4058_v55 = vsel %vm3251_vm11, %v4057_v45, %v4056_v52  ;;  %3593 = vmatpush.msrb.mxu2 %v4369_v18  ;;  %v3518_v41 = vsel %vm3248_vm10, %v3517_v51, %v3516_v3  ;;  %v4378_v23 = vld [vmem:[%s8593_s5 + $0x3c8] sm:$0xff]  ;;  %v4377_v24 = vld [vmem:[%s8593_s5 + $0x3c0] sm:$0xff]  ;;  %v4441_v20 = vld [vmem:[%s8593_s5 + $0x5b8] sm:$0xff]  ;;  %v3303_v3 = vpop.f32.mrf.mxu2 }
 0x4d0   :  { %4107 = vmatmul.f32.vlgmr.msra.gmra.mxu1 %v4058_v55  ;;  %3573 = vmatpush.msra.mxu3 %v4353_v7  ;;  %v3520_v5 = vsel %vm3251_vm11, %v3519_v63, %v3518_v41  ;;  %v4457_v53 = vld [vmem:[%s8593_s5 + $0x638] sm:$0xff]  ;;  %v4440_v9 = vld [vmem:[%s8593_s5 + $0x5b0] sm:$0xff]  ;;  %v9039_v28 = vld [vmem:[#allocation22_spill] sm:$0xff] }
 0x4d1   :  { %3594 = vmatpush.msrb.mxu2 %v4368_v0  ;;  %v4456_v11 = vld [vmem:[%s8593_s5 + $0x630] sm:$0xff]  ;;  %v4439_v49 = vld [vmem:[%s8593_s5 + $0x5a8] sm:$0xff]  ;;  %v4438_v45 = vld [vmem:[%s8593_s5 + $0x5a0] sm:$0xff] }
 0x4d2   :  { %3574 = vmatpush.msra.mxu3 %v4352_v27  ;;  %4376 = vmatmul.msk.f32.vlgmr.msrb.gmra.mxu2 %vm3283_vm12, %v3534_v15  ;;  %v4455_v13 = vld [vmem:[%s8593_s5 + $0x628] sm:$0xff]  ;;  %v4454_v18 = vld [vmem:[%s8593_s5 + $0x620] sm:$0xff]  ;;  %v4437_v62 = vld [vmem:[%s8593_s5 + $0x598] sm:$0xff] }
 0x4d3   :  { %3735 = vmatpush.msra.mxu2 %v4416_v60  ;;  %3575 = vmatmul.f32.vlgmr.msra.gmra.mxu3 %v3520_v5  ;;  %v9040_v35 = vld [vmem:[#allocation32_spill] sm:$0xff]  ;;  %v4453_v32 = vld [vmem:[%s8593_s5 + $0x618] sm:$0xff]  ;;  %v4435_v7 = vld [vmem:[%s8593_s5 + $0x588] sm:$0xff] }
 0x4d4   :  { %3687 = vmatpush.msrb.mxu3 %v4392_v26  ;;  %v3978_v54 = vmax.f32 %v9040_v35, %v3931_v46  ;;  %v4452_v14 = vld [vmem:[%s8593_s5 + $0x610] sm:$0xff]  ;;  %v4451_v52 = vld [vmem:[%s8593_s5 + $0x608] sm:$0xff]  ;;  %v4434_v19 = vld [vmem:[%s8593_s5 + $0x580] sm:$0xff] }
 0x4d5   :  { %3736 = vmatpush.msra.mxu2 %v4415_v47  ;;  %v4450_v0 = vld [vmem:[%s8593_s5 + $0x600] sm:$0xff] }
 0x4d6   :  { %3688 = vmatpush.msrb.mxu3 %v4391_v4  ;;  %v4071_v38 = vrot.slane %v3978_v54, 1 }
 0x4d7   :  { %3737 = vmatpush.msra.mxu2 %v4414_v36 }
 0x4d8   :  { %3689 = vmatpush.msrb.mxu3 %v4390_v31  ;;  %v4072_v55 = vsel %vm3251_vm11, %v4071_v38, %v8283_v50 }
 0x4d9   :  { %3738 = vmatpush.msra.mxu2 %v4413_v58 }
 0x4da   :  { %3690 = vmatpush.msrb.mxu3 %v4389_v42 }
 0x4db   :  { %3739 = vmatpush.msra.mxu2 %v4412_v61 }
 0x4dc   :  { %3691 = vmatpush.msrb.mxu3 %v4388_v59 }
 0x4dd   :  { %3740 = vmatpush.msra.mxu2 %v4411_v44 }
 0x4de   :  { %3692 = vmatpush.msrb.mxu3 %v4387_v22 }
 0x4df   :  { %3741 = vmatpush.msra.mxu2 %v4410_v1 }
 0x4e0   :  { %3693 = vmatpush.msrb.mxu3 %v4386_v17 }
 0x4e1   :  { %3742 = vmatpush.msra.mxu2 %v4409_v8 }
 0x4e2   :  { %3694 = vmatpush.msrb.mxu3 %v4385_v33  ;;  %4417 = vmatmul.msk.f32.vlgmr.msra.gmra.mxu2 %vm3283_vm12, %v8144_v56  ;;  %v4446_v56 = vld [vmem:[%s8593_s5 + $0x5e0] sm:$0xff] }
 0x4e3   :  { %4111 = vmatpush.msrb.mxu2 %v4449_v40 }
 0x4e4   :  { %3695 = vmatpush.msrb.mxu3 %v4384_v29 }
 0x4e5   :  { %4112 = vmatpush.msrb.mxu2 %v4448_v10  ;;  %v4540_v10 = vld [vmem:[%s8594_s6] ss:$0 sm:$0xff] }
 0x4e6   :  { %3696 = vmatpush.msrb.mxu3 %v4383_v34 }
 0x4e7   :  { %4113 = vmatpush.msrb.mxu2 %v4447_v39 }
 0x4e8   :  { %3697 = vmatpush.msrb.mxu3 %v4382_v16 }
 0x4e9   :  { %4114 = vmatpush.msrb.mxu2 %v4446_v56 }
 0x4ea   :  { %3698 = vmatpush.msrb.mxu3 %v4381_v43 }
 0x4eb   :  { %4115 = vmatpush.msrb.mxu2 %v4445_v48 }
 0x4ec   :  { %3699 = vmatpush.msrb.mxu3 %v4380_v25 }
 0x4ed   :  { %4116 = vmatpush.msrb.mxu2 %v4444_v21 }
 0x4ee   :  { %3700 = vmatpush.msrb.mxu3 %v4379_v12 }
 0x4ef   :  { %4117 = vmatpush.msrb.mxu2 %v4443_v30 }
 0x4f0   :  { %3701 = vmatpush.msrb.mxu3 %v4378_v23 }
 0x4f1   :  { %4118 = vmatpush.msrb.mxu2 %v4442_v37 }
 0x4f2   :  { %3702 = vmatpush.msrb.mxu3 %v4377_v24 }
 0x4f3   :  { %4119 = vmatpush.msrb.mxu2 %v4441_v20  ;;  %3703 = vmatmul.f32.vlgmr.msrb.gmra.mxu3 %v9039_v28 }
 0x4f4   :  { %4139 = vmatpush.msra.mxu3 %v4457_v53 }
 0x4f5   :  { %4120 = vmatpush.msrb.mxu2 %v4440_v9 }
 0x4f6   :  { %4140 = vmatpush.msra.mxu3 %v4456_v11 }
 0x4f7   :  { %4121 = vmatpush.msrb.mxu2 %v4439_v49 }
 0x4f8   :  { %4141 = vmatpush.msra.mxu3 %v4455_v13 }
 0x4f9   :  { %4122 = vmatpush.msrb.mxu2 %v4438_v45 }
 0x4fa   :  { %4142 = vmatpush.msra.mxu3 %v4454_v18 }
 0x4fb   :  { %4123 = vmatpush.msrb.mxu2 %v4437_v62 }
 0x4fc   :  { %4143 = vmatpush.msra.mxu3 %v4453_v32 }
 0x4fd   :  { %4124 = vmatpush.msrb.mxu2 %v4436_v6 }
 0x4fe   :  { %4144 = vmatpush.msra.mxu3 %v4452_v14 }
 0x4ff   :  { %4125 = vmatpush.msrb.mxu2 %v4435_v7 }
 0x500   :  { %4145 = vmatpush.msra.mxu3 %v4451_v52 }
 0x501   :  { %4126 = vmatpush.msrb.mxu2 %v4434_v19 }
 0x502   :  { %4127 = vmatmul.f32.vlgmr.msrb.gmra.mxu2 %v4072_v55  ;;  %4146 = vmatpush.msra.mxu3 %v4450_v0 }
 0x503   :  { %4458 = vmatmul.msk.f32.vlgmr.msra.gmra.mxu3 %vm3283_vm12, %v8286_v57 }
 0x521   :  { %v3724_v58 = vpop.f32.mrf.mxu0 }
 0x525   :  { %v3343_v51 = vpop.f32.mrf.mxu2 }
 0x526   :  { %v3323_v63 = vpop.f32.mrf.mxu3 }
 0x527   :  { %v3324_v5 = vadd.f32 %v3323_v63, %v3303_v3 }
 0x529   :  { %v3344_v47 = vadd.f32 %v3343_v51, %v3324_v5 }
 0x52d   :  { %v3429_v2 = vpop.f32.mrf.mxu2 }
 0x52e   :  { %v3409_v27 = vpop.f32.mrf.mxu3 }
 0x52f   :  { %v3410_v31 = vadd.f32 %v3409_v27, %v3344_v47 }
 0x531   :  { %v3430_v61 = vadd.f32 %v3429_v2, %v3410_v31 }
 0x536   :  { %v3449_v60 = vpop.f32.mrf.mxu3 }
 0x537   :  { %v3450_v57 = vadd.f32 %v3449_v60, %v3430_v61 }
 0x545   :  { %v3556_v15 = vpop.f32.mrf.mxu2 }
 0x54d   :  { %v4108_v22 = vpop.f32.mrf.mxu1 }
 0x555   :  { %v3596_v41 = vpop.f32.mrf.mxu2 }
 0x556   :  { %v3576_v26 = vpop.f32.mrf.mxu3 }
 0x557   :  { %v3577_v50 = vadd.f32 %v3576_v26, %v3556_v15 }
 0x559   :  { %v3597_v59 = vadd.f32 %v3596_v41, %v3577_v50 }
 0x55b   :  { %v3599_v17 = vadd.f32 %v3597_v59, %v3450_v57 }
 0x565   :  { %v3744_v4 = vpop.f32.mrf.mxu2 }
 0x576   :  { %v3704_v36 = vpop.f32.mrf.mxu3 }
 0x577   :  { %v3725_v42 = vadd.f32 %v3724_v58, %v3704_v36 }
 0x579   :  { %v3745_v44 = vadd.f32 %v3744_v4, %v3725_v42 }
 0x57b   :  { %v3747_v40 = vadd.f32 %v3745_v44, %v3599_v17 }
 0x585   :  { %v4128_v1 = vpop.f32.mrf.mxu2 }
 0x586   :  { %v4129_v8 = vadd.f32 %v4128_v1, %v4108_v22  ;;  %v4148_v33 = vpop.f32.mrf.mxu3 }
 0x588   :  { %v4149_v29 = vadd.f32 %v4148_v33, %v4129_v8 }
 0x58a   :  { %v4151_v34 = vadd.f32 %v4149_v29, %v3747_v40 }
 0x58c   :  { %v4156_v39 = vadd.f32 %v4540_v10, %v4151_v34 }
 0x58e   :  { %4157 = vst [vmem:[%s8595_s7] sm:$0xff] %v4156_v39 }

</bundles_post_ra>
